<compile_context>
chip_gen: v6e
topology: v6e:2x2x1
jax: 0.10.0
libtpu: 0.0.40
codegen_flags: <defaults>
</compile_context>

<pallas_src>
import functools

import jax
import jax.numpy as jnp
from jax.experimental import pallas as pl
from jax.experimental.pallas import tpu as pltpu

HP = 128      # lane-padded hidden width (one full vreg lane dim)
B_BLK = 8     # sequences per grid step = one full sublane tile


def _sigmoid(x):
    # sigmoid(x) == 0.5 * (1 + tanh(x/2)): one EUP op instead of exp + reciprocal.
    return 0.5 * (jnp.tanh(0.5 * x) + 1.0)


def gru_kernel(caps_ref, table_ref, whh_ref, bhn_ref, h0_ref,
               out_ref, hn_ref, gi_buf):
    """Batched GRU recurrence; one sublane tile (B_BLK sequences) per grid step.

    caps_ref:  SMEM (B_pad, T) int32   token ids (scalar-prefetched, full array).
    table_ref: VMEM (vocab, 1, 3*HP)   fused  emb @ W_ih^T + b_ih (+ b_hr, b_hz),
                                       gate blocks r|z|n at lane offsets 0/HP/2*HP.
    whh_ref:   VMEM (HP, 3*HP)         W_hh^T, rows/lanes >= H zero-padded.
    bhn_ref:   VMEM (B_BLK, HP)        b_hn tiled over the batch sublanes.
    h0_ref:    VMEM (B_BLK, HP)        initial hidden states for this batch block.
    out_ref:   VMEM (T, B_BLK, HP)     per-step hidden states.
    hn_ref:    VMEM (B_BLK, HP)        final hidden states.
    gi_buf:    VMEM (B_BLK, 3*HP)      scratch for the gathered fused rows.
    """
    T = out_ref.shape[0]
    Bb = h0_ref.shape[0]
    Hp = h0_ref.shape[1]
    base = pl.program_id(0) * Bb

    bhn = bhn_ref[...]                       # 1 vreg, held live across the loop

    def step(t, h):
        # Fused embedding + input-projection gather for this step. Independent
        # of h -> off the serial critical path; the scheduler overlaps it with
        # the previous step's EUP/store work.
        for bi in range(Bb):
            tok = caps_ref[base + bi, t]
            gi_buf[pl.ds(bi, 1), :] = table_ref[tok]        # (1, 3*HP) row copy
        gi = gi_buf[...]                                    # (Bb, 3*HP)

        # Only h-dependent work on the serial chain: one (Bb,HP)x(HP,3*HP) MXU op.
        # W_hh rows are padded to HP, so no h[:, :H] lane slice is needed.
        gh = jnp.dot(h, whh_ref[...], preferred_element_type=jnp.float32)

        # Gate extraction = whole-vreg (128-lane-aligned) slices.
        r = _sigmoid(gi[:, 0:Hp] + gh[:, 0:Hp])
        z = _sigmoid(gi[:, Hp:2 * Hp] + gh[:, Hp:2 * Hp])
        # b_hn must stay inside the r-gated term (torch.nn.GRU semantics).
        n = jnp.tanh(gi[:, 2 * Hp:] + r * (gh[:, 2 * Hp:] + bhn))
        h_new = n + z * (h - n)                             # == (1-z)*n + z*h

        # Full (8,128) unmasked tile store, off the h->h chain.
        out_ref[t, :, :] = h_new
        return h_new

    h = h0_ref[...]
    if T <= 64:
        for t in range(T):        # trace-time unroll: max scheduler visibility
            h = step(t, h)
    else:
        h = jax.lax.fori_loop(0, T, step, h, unroll=4)
    hn_ref[...] = h


def prepare_params(emb_table, w_ih, w_hh, b_ih, b_hh, hp=HP):
    """One-time folding of module parameters into the kernel layout.

    emb_table: (vocab, E); w_ih: (3H, E); w_hh: (3H, H); b_ih, b_hh: (3H,)
    Returns fused_table (vocab,1,3*hp), whh_pad (hp,3*hp), bhn_pad (B_BLK,hp), H.
    """
    H = w_hh.shape[1]
    assert hp >= H and w_ih.shape[0] == 3 * H and w_hh.shape[0] == 3 * H
    vocab = emb_table.shape[0]

    def place_gates(m):  # (rows, 3H) -> (rows, 3*hp): each gate in its own lane block
        out = jnp.zeros((m.shape[0], 3 * hp), jnp.float32)
        for g in range(3):
            out = out.at[:, g * hp:g * hp + H].set(m[:, g * H:(g + 1) * H])
        return out

    # b_hr, b_hz fold into the input-side bias (added pre-sigmoid -> exact);
    # b_hn stays inside the r-gated term.
    bias = jnp.concatenate([b_ih[:2 * H] + b_hh[:2 * H], b_ih[2 * H:]])
    fused = jnp.dot(emb_table, w_ih.T,
                    precision=jax.lax.Precision.HIGHEST) + bias[None, :]   # (vocab, 3H)
    fused_table = place_gates(fused).reshape(vocab, 1, 3 * hp)

    whh_pad = jnp.zeros((hp, 3 * hp), jnp.float32).at[:H, :].set(place_gates(w_hh.T))
    bhn_pad = jnp.zeros((B_BLK, hp), jnp.float32).at[:, :H].set(
        jnp.broadcast_to(b_hh[2 * H:], (B_BLK, H)))
    return fused_table, whh_pad, bhn_pad, H


@functools.partial(jax.jit, static_argnames=("hidden_dim",))
def reward_network_rnn_forward(captions, h0, fused_table, whh_pad, bhn_pad, *,
                               hidden_dim):
    """Batched forward. captions: (B, T) int32; h0: (B, H).

    Returns (output (T, B, H), hidden (1, B, H)) in torch.nn.GRU's
    (seq, batch, hidden) layout; each row b is an independent
    RewardNetworkRNN.forward(captions[b]) with hidden_cell = h0[b].
    """
    B, T = captions.shape
    H = hidden_dim
    Hp = whh_pad.shape[0]
    vocab = fused_table.shape[0]

    nb = pl.cdiv(B, B_BLK)
    B_pad = nb * B_BLK
    caps_pad = jnp.zeros((B_pad, T), jnp.int32).at[:B, :].set(captions.astype(jnp.int32))
    h0_pad = jnp.zeros((B_pad, Hp), jnp.float32).at[:B, :H].set(h0.astype(jnp.float32))

    # Scoped-VMEM request ~= actual footprint (x2 for double buffering) + headroom.
    buf_bytes = 4 * (vocab * 8 * 3 * Hp + Hp * 3 * Hp + 3 * B_BLK * Hp
                     + T * B_BLK * Hp + B_BLK * 3 * Hp)
    vmem_limit = int(min(2 * buf_bytes + (1 << 20), 64 << 20))

    cost = pl.CostEstimate(
        flops=int(B_pad * T * (2 * Hp * 3 * Hp + 12 * Hp)),
        transcendentals=int(B_pad * T * 3 * Hp),
        bytes_accessed=int(4 * (vocab * 3 * Hp + Hp * 3 * Hp
                                + B_pad * T + 2 * B_pad * Hp + T * B_pad * Hp)),
    )

    out_pad, hn_pad = pl.pallas_call(
        gru_kernel,
        out_shape=(
            jax.ShapeDtypeStruct((T, B_pad, Hp), jnp.float32),
            jax.ShapeDtypeStruct((B_pad, Hp), jnp.float32),
        ),
        grid_spec=pltpu.PrefetchScalarGridSpec(
            num_scalar_prefetch=1,
            grid=(nb,),
            in_specs=[
                pl.BlockSpec((vocab, 1, 3 * Hp), lambda b, caps: (0, 0, 0)),
                pl.BlockSpec((Hp, 3 * Hp), lambda b, caps: (0, 0)),
                pl.BlockSpec((B_BLK, Hp), lambda b, caps: (0, 0)),
                pl.BlockSpec((B_BLK, Hp), lambda b, caps: (b, 0)),
            ],
            out_specs=(
                pl.BlockSpec((T, B_BLK, Hp), lambda b, caps: (0, b, 0)),
                pl.BlockSpec((B_BLK, Hp), lambda b, caps: (b, 0)),
            ),
            scratch_shapes=[pltpu.VMEM((B_BLK, 3 * Hp), jnp.float32)],
        ),
        compiler_params=pltpu.CompilerParams(
            # Batch blocks are independent -> shards across v7x's 2 TensorCores.
            dimension_semantics=("parallel",),
            vmem_limit_bytes=vmem_limit,
        ),
        cost_estimate=cost,
    )(caps_pad, fused_table, whh_pad, bhn_pad, h0_pad)

    out = out_pad[:, :B, :H]
    hn = hn_pad[:B, :H][None]
    return out, hn


def gru_reference(x, w_ih_t, w_hh_t, b_ih, b_hh, h0):
    """Pure-JAX reference matching torch.nn.GRU semantics (batch=1), unfused weights."""
    H = h0.shape[-1]
    h = h0.reshape(1, H)
    hi = jax.lax.Precision.HIGHEST

    def step(h, x_t):
        gi = jnp.dot(x_t[None, :], w_ih_t, precision=hi) + b_ih[None, :]
        gh = jnp.dot(h, w_hh_t, precision=hi) + b_hh[None, :]
        r = jax.nn.sigmoid(gi[:, :H] + gh[:, :H])
        z = jax.nn.sigmoid(gi[:, H:2 * H] + gh[:, H:2 * H])
        n = jnp.tanh(gi[:, 2 * H:] + r * gh[:, 2 * H:])
        h_new = (1.0 - z) * n + z * h
        return h_new, h_new[0]

    h_fin, outs = jax.lax.scan(step, h, x)
    return outs, h_fin


if __name__ == "__main__":
    # Small deterministic shapes consistent with the module's forward.
    vocab_size = 16
    wordvec_dim = 32      # wordvec_dimensions
    hidden_dim = 32       # hidden_dimensions
    T = 8                 # caption length
    B = 4                 # independent captions batched into the sublane dim

    key = jax.random.PRNGKey(0)
    k_emb, k_wih, k_whh, k_bih, k_bhh, k_cap = jax.random.split(key, 6)

    # nn.Embedding init: N(0, 1)
    emb_table = jax.random.normal(k_emb, (vocab_size, wordvec_dim), dtype=jnp.float32)

    # nn.GRU init: U(-1/sqrt(H), 1/sqrt(H)); weight_ih (3H, E), weight_hh (3H, H).
    bound = 1.0 / float(hidden_dim) ** 0.5
    w_ih = jax.random.uniform(k_wih, (3 * hidden_dim, wordvec_dim),
                              minval=-bound, maxval=bound, dtype=jnp.float32)
    w_hh = jax.random.uniform(k_whh, (3 * hidden_dim, hidden_dim),
                              minval=-bound, maxval=bound, dtype=jnp.float32)
    b_ih = jax.random.uniform(k_bih, (3 * hidden_dim,),
                              minval=-bound, maxval=bound, dtype=jnp.float32)
    b_hh = jax.random.uniform(k_bhh, (3 * hidden_dim,),
                              minval=-bound, maxval=bound, dtype=jnp.float32)

    captions = jax.random.randint(k_cap, (B, T), 0, vocab_size, dtype=jnp.int32)
    # self.hidden_cell = zeros(1, 1, H) for every sequence.
    h0 = jnp.zeros((B, hidden_dim), dtype=jnp.float32)

    # One-time parameter folding (embedding + input projection + bias fold + layout).
    fused_table, whh_pad, bhn_pad, H = prepare_params(emb_table, w_ih, w_hh, b_ih, b_hh)

    out, hn = reward_network_rnn_forward(captions, h0, fused_table, whh_pad, bhn_pad,
                                         hidden_dim=H)
    out = jax.block_until_ready(out)
    hn = jax.block_until_ready(hn)
    assert out.shape == (T, B, hidden_dim)
    assert hn.shape == (1, B, hidden_dim)

    # Correctness: each batch row must match an independent torch-style GRU run.
    for b in range(B):
        x = emb_table[captions[b]]
        out_ref, hn_ref = gru_reference(x, w_ih.T, w_hh.T, b_ih, b_hh, h0[b])
        assert jnp.allclose(out[:, b, :], out_ref, atol=2e-3, rtol=2e-3), b
        assert jnp.allclose(hn[0, b, :], hn_ref[0], atol=2e-3, rtol=2e-3), b

    print("KERNEL_OK")
</pallas_src>

<mosaic_0001>
module attributes {stable_mosaic.version = 11 : i64} {
  func.func @gru_kernel(%arg0: i32, %arg1: memref<8x8xi32, #tpu.memory_space<smem>>, %arg2: memref<16x1x384xf32, #tpu.memory_space<vmem>>, %arg3: memref<128x384xf32, #tpu.memory_space<vmem>>, %arg4: memref<8x128xf32, #tpu.memory_space<vmem>>, %arg5: memref<8x128xf32, #tpu.memory_space<vmem>>, %arg6: memref<8x8x128xf32, #tpu.memory_space<vmem>>, %arg7: memref<8x128xf32, #tpu.memory_space<vmem>>, %arg8: memref<8x384xf32, #tpu.memory_space<vmem>>) attributes {dimension_semantics = [#tpu.dimension_semantics<parallel>], iteration_bounds = array<i64: 1>, scalar_prefetch = 1 : i64, scratch_operands = 1 : i64, tpu.core_type = #tpu.core_type<tc>, window_params = [{pipeline_mode = #tpu.pipeline_mode<synchronous>, transform_indices = @transform_0, window_bounds = array<i64: 16, 1, 384>}, {pipeline_mode = #tpu.pipeline_mode<synchronous>, transform_indices = @transform_1, window_bounds = array<i64: 128, 384>}, {pipeline_mode = #tpu.pipeline_mode<synchronous>, transform_indices = @transform_2, window_bounds = array<i64: 8, 128>}, {transform_indices = @transform_3, window_bounds = array<i64: 8, 128>}, {transform_indices = @transform_4, window_bounds = array<i64: 8, 8, 128>}, {transform_indices = @transform_5, window_bounds = array<i64: 8, 128>}]} {
    %c8_i32 = arith.constant 8 : i32
    %0 = arith.muli %arg0, %c8_i32 : i32
    %c0 = arith.constant 0 : index
    %c0_0 = arith.constant 0 : index
    %1 = vector.load %arg4[%c0, %c0_0] : memref<8x128xf32, #tpu.memory_space<vmem>>, vector<8x128xf32>
    %c0_1 = arith.constant 0 : index
    %c0_2 = arith.constant 0 : index
    %2 = vector.load %arg5[%c0_1, %c0_2] : memref<8x128xf32, #tpu.memory_space<vmem>>, vector<8x128xf32>
    %c0_i32 = arith.constant 0 : i32
    %3 = arith.addi %0, %c0_i32 : i32
    %4 = arith.index_cast %3 : i32 to index
    %c0_3 = arith.constant 0 : index
    %5 = memref.load %arg1[%4, %c0_3] : memref<8x8xi32, #tpu.memory_space<smem>>
    %6 = arith.index_cast %5 : i32 to index
    %c0_4 = arith.constant 0 : index
    %c0_5 = arith.constant 0 : index
    %7 = vector.load %arg2[%6, %c0_4, %c0_5] : memref<16x1x384xf32, #tpu.memory_space<vmem>>, vector<1x1x384xf32>
    %8 = vector.shape_cast %7 : vector<1x1x384xf32> to vector<1x384xf32>
    %c0_6 = arith.constant 0 : index
    %c0_7 = arith.constant 0 : index
    %9 = vector.load %arg8[%c0_6, %c0_7] : memref<8x384xf32, #tpu.memory_space<vmem>>, vector<1x384xf32>
    tpu.vector_store %arg8[%c0_6, %c0_7], %8 {strides = array<i32>} : memref<8x384xf32, #tpu.memory_space<vmem>>, vector<1x384xf32>,
    %c1_i32 = arith.constant 1 : i32
    %10 = arith.addi %0, %c1_i32 : i32
    %11 = arith.index_cast %10 : i32 to index
    %c0_8 = arith.constant 0 : index
    %12 = memref.load %arg1[%11, %c0_8] : memref<8x8xi32, #tpu.memory_space<smem>>
    %13 = arith.index_cast %12 : i32 to index
    %c0_9 = arith.constant 0 : index
    %c0_10 = arith.constant 0 : index
    %14 = vector.load %arg2[%13, %c0_9, %c0_10] : memref<16x1x384xf32, #tpu.memory_space<vmem>>, vector<1x1x384xf32>
    %15 = vector.shape_cast %14 : vector<1x1x384xf32> to vector<1x384xf32>
    %c1 = arith.constant 1 : index
    %c0_11 = arith.constant 0 : index
    %16 = vector.load %arg8[%c1, %c0_11] : memref<8x384xf32, #tpu.memory_space<vmem>>, vector<1x384xf32>
    tpu.vector_store %arg8[%c1, %c0_11], %15 {strides = array<i32>} : memref<8x384xf32, #tpu.memory_space<vmem>>, vector<1x384xf32>,
    %c2_i32 = arith.constant 2 : i32
    %17 = arith.addi %0, %c2_i32 : i32
    %18 = arith.index_cast %17 : i32 to index
    %c0_12 = arith.constant 0 : index
    %19 = memref.load %arg1[%18, %c0_12] : memref<8x8xi32, #tpu.memory_space<smem>>
    %20 = arith.index_cast %19 : i32 to index
    %c0_13 = arith.constant 0 : index
    %c0_14 = arith.constant 0 : index
    %21 = vector.load %arg2[%20, %c0_13, %c0_14] : memref<16x1x384xf32, #tpu.memory_space<vmem>>, vector<1x1x384xf32>
    %22 = vector.shape_cast %21 : vector<1x1x384xf32> to vector<1x384xf32>
    %c2 = arith.constant 2 : index
    %c0_15 = arith.constant 0 : index
    %23 = vector.load %arg8[%c2, %c0_15] : memref<8x384xf32, #tpu.memory_space<vmem>>, vector<1x384xf32>
    tpu.vector_store %arg8[%c2, %c0_15], %22 {strides = array<i32>} : memref<8x384xf32, #tpu.memory_space<vmem>>, vector<1x384xf32>,
    %c3_i32 = arith.constant 3 : i32
    %24 = arith.addi %0, %c3_i32 : i32
    %25 = arith.index_cast %24 : i32 to index
    %c0_16 = arith.constant 0 : index
    %26 = memref.load %arg1[%25, %c0_16] : memref<8x8xi32, #tpu.memory_space<smem>>
    %27 = arith.index_cast %26 : i32 to index
    %c0_17 = arith.constant 0 : index
    %c0_18 = arith.constant 0 : index
    %28 = vector.load %arg2[%27, %c0_17, %c0_18] : memref<16x1x384xf32, #tpu.memory_space<vmem>>, vector<1x1x384xf32>
    %29 = vector.shape_cast %28 : vector<1x1x384xf32> to vector<1x384xf32>
    %c3 = arith.constant 3 : index
    %c0_19 = arith.constant 0 : index
    %30 = vector.load %arg8[%c3, %c0_19] : memref<8x384xf32, #tpu.memory_space<vmem>>, vector<1x384xf32>
    tpu.vector_store %arg8[%c3, %c0_19], %29 {strides = array<i32>} : memref<8x384xf32, #tpu.memory_space<vmem>>, vector<1x384xf32>,
    %c4_i32 = arith.constant 4 : i32
    %31 = arith.addi %0, %c4_i32 : i32
    %32 = arith.index_cast %31 : i32 to index
    %c0_20 = arith.constant 0 : index
    %33 = memref.load %arg1[%32, %c0_20] : memref<8x8xi32, #tpu.memory_space<smem>>
    %34 = arith.index_cast %33 : i32 to index
    %c0_21 = arith.constant 0 : index
    %c0_22 = arith.constant 0 : index
    %35 = vector.load %arg2[%34, %c0_21, %c0_22] : memref<16x1x384xf32, #tpu.memory_space<vmem>>, vector<1x1x384xf32>
    %36 = vector.shape_cast %35 : vector<1x1x384xf32> to vector<1x384xf32>
    %c4 = arith.constant 4 : index
    %c0_23 = arith.constant 0 : index
    %37 = vector.load %arg8[%c4, %c0_23] : memref<8x384xf32, #tpu.memory_space<vmem>>, vector<1x384xf32>
    tpu.vector_store %arg8[%c4, %c0_23], %36 {strides = array<i32>} : memref<8x384xf32, #tpu.memory_space<vmem>>, vector<1x384xf32>,
    %c5_i32 = arith.constant 5 : i32
    %38 = arith.addi %0, %c5_i32 : i32
    %39 = arith.index_cast %38 : i32 to index
    %c0_24 = arith.constant 0 : index
    %40 = memref.load %arg1[%39, %c0_24] : memref<8x8xi32, #tpu.memory_space<smem>>
    %41 = arith.index_cast %40 : i32 to index
    %c0_25 = arith.constant 0 : index
    %c0_26 = arith.constant 0 : index
    %42 = vector.load %arg2[%41, %c0_25, %c0_26] : memref<16x1x384xf32, #tpu.memory_space<vmem>>, vector<1x1x384xf32>
    %43 = vector.shape_cast %42 : vector<1x1x384xf32> to vector<1x384xf32>
    %c5 = arith.constant 5 : index
    %c0_27 = arith.constant 0 : index
    %44 = vector.load %arg8[%c5, %c0_27] : memref<8x384xf32, #tpu.memory_space<vmem>>, vector<1x384xf32>
    tpu.vector_store %arg8[%c5, %c0_27], %43 {strides = array<i32>} : memref<8x384xf32, #tpu.memory_space<vmem>>, vector<1x384xf32>,
    %c6_i32 = arith.constant 6 : i32
    %45 = arith.addi %0, %c6_i32 : i32
    %46 = arith.index_cast %45 : i32 to index
    %c0_28 = arith.constant 0 : index
    %47 = memref.load %arg1[%46, %c0_28] : memref<8x8xi32, #tpu.memory_space<smem>>
    %48 = arith.index_cast %47 : i32 to index
    %c0_29 = arith.constant 0 : index
    %c0_30 = arith.constant 0 : index
    %49 = vector.load %arg2[%48, %c0_29, %c0_30] : memref<16x1x384xf32, #tpu.memory_space<vmem>>, vector<1x1x384xf32>
    %50 = vector.shape_cast %49 : vector<1x1x384xf32> to vector<1x384xf32>
    %c6 = arith.constant 6 : index
    %c0_31 = arith.constant 0 : index
    %51 = vector.load %arg8[%c6, %c0_31] : memref<8x384xf32, #tpu.memory_space<vmem>>, vector<1x384xf32>
    tpu.vector_store %arg8[%c6, %c0_31], %50 {strides = array<i32>} : memref<8x384xf32, #tpu.memory_space<vmem>>, vector<1x384xf32>,
    %c7_i32 = arith.constant 7 : i32
    %52 = arith.addi %0, %c7_i32 : i32
    %53 = arith.index_cast %52 : i32 to index
    %c0_32 = arith.constant 0 : index
    %54 = memref.load %arg1[%53, %c0_32] : memref<8x8xi32, #tpu.memory_space<smem>>
    %55 = arith.index_cast %54 : i32 to index
    %c0_33 = arith.constant 0 : index
    %c0_34 = arith.constant 0 : index
    %56 = vector.load %arg2[%55, %c0_33, %c0_34] : memref<16x1x384xf32, #tpu.memory_space<vmem>>, vector<1x1x384xf32>
    %57 = vector.shape_cast %56 : vector<1x1x384xf32> to vector<1x384xf32>
    %c7 = arith.constant 7 : index
    %c0_35 = arith.constant 0 : index
    %58 = vector.load %arg8[%c7, %c0_35] : memref<8x384xf32, #tpu.memory_space<vmem>>, vector<1x384xf32>
    tpu.vector_store %arg8[%c7, %c0_35], %57 {strides = array<i32>} : memref<8x384xf32, #tpu.memory_space<vmem>>, vector<1x384xf32>,
    %c0_36 = arith.constant 0 : index
    %c0_37 = arith.constant 0 : index
    %59 = vector.load %arg8[%c0_36, %c0_37] : memref<8x384xf32, #tpu.memory_space<vmem>>, vector<8x384xf32>
    %c0_38 = arith.constant 0 : index
    %c0_39 = arith.constant 0 : index
    %60 = vector.load %arg3[%c0_38, %c0_39] : memref<128x384xf32, #tpu.memory_space<vmem>>, vector<128x384xf32>
    %cst = arith.constant dense<0.000000e+00> : vector<8x384xf32>
    %61 = tpu.matmul %2, %60, %cst {dimension_numbers = #tpu.dot_dimension_numbers<[1], [0], [0], [1], [0, 0, 1, 1], [], []>} : vector<8x128xf32>, vector<128x384xf32>, vector<8x384xf32> -> vector<8x384xf32>
    %62 = vector.extract_strided_slice %59 {offsets = [0, 0], sizes = [8, 128], strides = [1, 1]} : vector<8x384xf32> to vector<8x128xf32>
    %63 = vector.extract_strided_slice %61 {offsets = [0, 0], sizes = [8, 128], strides = [1, 1]} : vector<8x384xf32> to vector<8x128xf32>
    %64 = arith.addf %62, %63 : vector<8x128xf32>
    %cst_40 = arith.constant 5.000000e-01 : f32
    %65 = vector.broadcast %cst_40 : f32 to vector<8x128xf32>
    %66 = arith.mulf %65, %64 : vector<8x128xf32>
    %67 = math.tanh %66 : vector<8x128xf32>
    %cst_41 = arith.constant 1.000000e+00 : f32
    %68 = vector.broadcast %cst_41 : f32 to vector<8x128xf32>
    %69 = arith.addf %67, %68 : vector<8x128xf32>
    %cst_42 = arith.constant 5.000000e-01 : f32
    %70 = vector.broadcast %cst_42 : f32 to vector<8x128xf32>
    %71 = arith.mulf %70, %69 : vector<8x128xf32>
    %72 = vector.extract_strided_slice %59 {offsets = [0, 128], sizes = [8, 128], strides = [1, 1]} : vector<8x384xf32> to vector<8x128xf32>
    %73 = vector.extract_strided_slice %61 {offsets = [0, 128], sizes = [8, 128], strides = [1, 1]} : vector<8x384xf32> to vector<8x128xf32>
    %74 = arith.addf %72, %73 : vector<8x128xf32>
    %cst_43 = arith.constant 5.000000e-01 : f32
    %75 = vector.broadcast %cst_43 : f32 to vector<8x128xf32>
    %76 = arith.mulf %75, %74 : vector<8x128xf32>
    %77 = math.tanh %76 : vector<8x128xf32>
    %cst_44 = arith.constant 1.000000e+00 : f32
    %78 = vector.broadcast %cst_44 : f32 to vector<8x128xf32>
    %79 = arith.addf %77, %78 : vector<8x128xf32>
    %cst_45 = arith.constant 5.000000e-01 : f32
    %80 = vector.broadcast %cst_45 : f32 to vector<8x128xf32>
    %81 = arith.mulf %80, %79 : vector<8x128xf32>
    %82 = vector.extract_strided_slice %59 {offsets = [0, 256], sizes = [8, 128], strides = [1, 1]} : vector<8x384xf32> to vector<8x128xf32>
    %83 = vector.extract_strided_slice %61 {offsets = [0, 256], sizes = [8, 128], strides = [1, 1]} : vector<8x384xf32> to vector<8x128xf32>
    %84 = arith.addf %83, %1 : vector<8x128xf32>
    %85 = arith.mulf %71, %84 : vector<8x128xf32>
    %86 = arith.addf %82, %85 : vector<8x128xf32>
    %87 = math.tanh %86 : vector<8x128xf32>
    %88 = arith.subf %2, %87 : vector<8x128xf32>
    %89 = arith.mulf %81, %88 : vector<8x128xf32>
    %90 = arith.addf %87, %89 : vector<8x128xf32>
    %c0_46 = arith.constant 0 : index
    %c0_47 = arith.constant 0 : index
    %c0_48 = arith.constant 0 : index
    %91 = vector.load %arg6[%c0_46, %c0_47, %c0_48] : memref<8x8x128xf32, #tpu.memory_space<vmem>>, vector<1x8x128xf32>
    %92 = vector.shape_cast %91 : vector<1x8x128xf32> to vector<8x128xf32>
    %93 = vector.shape_cast %90 : vector<8x128xf32> to vector<1x8x128xf32>
    tpu.vector_store %arg6[%c0_46, %c0_47, %c0_48], %93 {strides = array<i32>} : memref<8x8x128xf32, #tpu.memory_space<vmem>>, vector<1x8x128xf32>,
    %c0_i32_49 = arith.constant 0 : i32
    %94 = arith.addi %0, %c0_i32_49 : i32
    %95 = arith.index_cast %94 : i32 to index
    %c1_50 = arith.constant 1 : index
    %96 = memref.load %arg1[%95, %c1_50] : memref<8x8xi32, #tpu.memory_space<smem>>
    %97 = arith.index_cast %96 : i32 to index
    %c0_51 = arith.constant 0 : index
    %c0_52 = arith.constant 0 : index
    %98 = vector.load %arg2[%97, %c0_51, %c0_52] : memref<16x1x384xf32, #tpu.memory_space<vmem>>, vector<1x1x384xf32>
    %99 = vector.shape_cast %98 : vector<1x1x384xf32> to vector<1x384xf32>
    %c0_53 = arith.constant 0 : index
    %c0_54 = arith.constant 0 : index
    %100 = vector.load %arg8[%c0_53, %c0_54] : memref<8x384xf32, #tpu.memory_space<vmem>>, vector<1x384xf32>
    tpu.vector_store %arg8[%c0_53, %c0_54], %99 {strides = array<i32>} : memref<8x384xf32, #tpu.memory_space<vmem>>, vector<1x384xf32>,
    %c1_i32_55 = arith.constant 1 : i32
    %101 = arith.addi %0, %c1_i32_55 : i32
    %102 = arith.index_cast %101 : i32 to index
    %c1_56 = arith.constant 1 : index
    %103 = memref.load %arg1[%102, %c1_56] : memref<8x8xi32, #tpu.memory_space<smem>>
    %104 = arith.index_cast %103 : i32 to index
    %c0_57 = arith.constant 0 : index
    %c0_58 = arith.constant 0 : index
    %105 = vector.load %arg2[%104, %c0_57, %c0_58] : memref<16x1x384xf32, #tpu.memory_space<vmem>>, vector<1x1x384xf32>
    %106 = vector.shape_cast %105 : vector<1x1x384xf32> to vector<1x384xf32>
    %c1_59 = arith.constant 1 : index
    %c0_60 = arith.constant 0 : index
    %107 = vector.load %arg8[%c1_59, %c0_60] : memref<8x384xf32, #tpu.memory_space<vmem>>, vector<1x384xf32>
    tpu.vector_store %arg8[%c1_59, %c0_60], %106 {strides = array<i32>} : memref<8x384xf32, #tpu.memory_space<vmem>>, vector<1x384xf32>,
    %c2_i32_61 = arith.constant 2 : i32
    %108 = arith.addi %0, %c2_i32_61 : i32
    %109 = arith.index_cast %108 : i32 to index
    %c1_62 = arith.constant 1 : index
    %110 = memref.load %arg1[%109, %c1_62] : memref<8x8xi32, #tpu.memory_space<smem>>
    %111 = arith.index_cast %110 : i32 to index
    %c0_63 = arith.constant 0 : index
    %c0_64 = arith.constant 0 : index
    %112 = vector.load %arg2[%111, %c0_63, %c0_64] : memref<16x1x384xf32, #tpu.memory_space<vmem>>, vector<1x1x384xf32>
    %113 = vector.shape_cast %112 : vector<1x1x384xf32> to vector<1x384xf32>
    %c2_65 = arith.constant 2 : index
    %c0_66 = arith.constant 0 : index
    %114 = vector.load %arg8[%c2_65, %c0_66] : memref<8x384xf32, #tpu.memory_space<vmem>>, vector<1x384xf32>
    tpu.vector_store %arg8[%c2_65, %c0_66], %113 {strides = array<i32>} : memref<8x384xf32, #tpu.memory_space<vmem>>, vector<1x384xf32>,
    %c3_i32_67 = arith.constant 3 : i32
    %115 = arith.addi %0, %c3_i32_67 : i32
    %116 = arith.index_cast %115 : i32 to index
    %c1_68 = arith.constant 1 : index
    %117 = memref.load %arg1[%116, %c1_68] : memref<8x8xi32, #tpu.memory_space<smem>>
    %118 = arith.index_cast %117 : i32 to index
    %c0_69 = arith.constant 0 : index
    %c0_70 = arith.constant 0 : index
    %119 = vector.load %arg2[%118, %c0_69, %c0_70] : memref<16x1x384xf32, #tpu.memory_space<vmem>>, vector<1x1x384xf32>
    %120 = vector.shape_cast %119 : vector<1x1x384xf32> to vector<1x384xf32>
    %c3_71 = arith.constant 3 : index
    %c0_72 = arith.constant 0 : index
    %121 = vector.load %arg8[%c3_71, %c0_72] : memref<8x384xf32, #tpu.memory_space<vmem>>, vector<1x384xf32>
    tpu.vector_store %arg8[%c3_71, %c0_72], %120 {strides = array<i32>} : memref<8x384xf32, #tpu.memory_space<vmem>>, vector<1x384xf32>,
    %c4_i32_73 = arith.constant 4 : i32
    %122 = arith.addi %0, %c4_i32_73 : i32
    %123 = arith.index_cast %122 : i32 to index
    %c1_74 = arith.constant 1 : index
    %124 = memref.load %arg1[%123, %c1_74] : memref<8x8xi32, #tpu.memory_space<smem>>
    %125 = arith.index_cast %124 : i32 to index
    %c0_75 = arith.constant 0 : index
    %c0_76 = arith.constant 0 : index
    %126 = vector.load %arg2[%125, %c0_75, %c0_76] : memref<16x1x384xf32, #tpu.memory_space<vmem>>, vector<1x1x384xf32>
    %127 = vector.shape_cast %126 : vector<1x1x384xf32> to vector<1x384xf32>
    %c4_77 = arith.constant 4 : index
    %c0_78 = arith.constant 0 : index
    %128 = vector.load %arg8[%c4_77, %c0_78] : memref<8x384xf32, #tpu.memory_space<vmem>>, vector<1x384xf32>
    tpu.vector_store %arg8[%c4_77, %c0_78], %127 {strides = array<i32>} : memref<8x384xf32, #tpu.memory_space<vmem>>, vector<1x384xf32>,
    %c5_i32_79 = arith.constant 5 : i32
    %129 = arith.addi %0, %c5_i32_79 : i32
    %130 = arith.index_cast %129 : i32 to index
    %c1_80 = arith.constant 1 : index
    %131 = memref.load %arg1[%130, %c1_80] : memref<8x8xi32, #tpu.memory_space<smem>>
    %132 = arith.index_cast %131 : i32 to index
    %c0_81 = arith.constant 0 : index
    %c0_82 = arith.constant 0 : index
    %133 = vector.load %arg2[%132, %c0_81, %c0_82] : memref<16x1x384xf32, #tpu.memory_space<vmem>>, vector<1x1x384xf32>
    %134 = vector.shape_cast %133 : vector<1x1x384xf32> to vector<1x384xf32>
    %c5_83 = arith.constant 5 : index
    %c0_84 = arith.constant 0 : index
    %135 = vector.load %arg8[%c5_83, %c0_84] : memref<8x384xf32, #tpu.memory_space<vmem>>, vector<1x384xf32>
    tpu.vector_store %arg8[%c5_83, %c0_84], %134 {strides = array<i32>} : memref<8x384xf32, #tpu.memory_space<vmem>>, vector<1x384xf32>,
    %c6_i32_85 = arith.constant 6 : i32
    %136 = arith.addi %0, %c6_i32_85 : i32
    %137 = arith.index_cast %136 : i32 to index
    %c1_86 = arith.constant 1 : index
    %138 = memref.load %arg1[%137, %c1_86] : memref<8x8xi32, #tpu.memory_space<smem>>
    %139 = arith.index_cast %138 : i32 to index
    %c0_87 = arith.constant 0 : index
    %c0_88 = arith.constant 0 : index
    %140 = vector.load %arg2[%139, %c0_87, %c0_88] : memref<16x1x384xf32, #tpu.memory_space<vmem>>, vector<1x1x384xf32>
    %141 = vector.shape_cast %140 : vector<1x1x384xf32> to vector<1x384xf32>
    %c6_89 = arith.constant 6 : index
    %c0_90 = arith.constant 0 : index
    %142 = vector.load %arg8[%c6_89, %c0_90] : memref<8x384xf32, #tpu.memory_space<vmem>>, vector<1x384xf32>
    tpu.vector_store %arg8[%c6_89, %c0_90], %141 {strides = array<i32>} : memref<8x384xf32, #tpu.memory_space<vmem>>, vector<1x384xf32>,
    %c7_i32_91 = arith.constant 7 : i32
    %143 = arith.addi %0, %c7_i32_91 : i32
    %144 = arith.index_cast %143 : i32 to index
    %c1_92 = arith.constant 1 : index
    %145 = memref.load %arg1[%144, %c1_92] : memref<8x8xi32, #tpu.memory_space<smem>>
    %146 = arith.index_cast %145 : i32 to index
    %c0_93 = arith.constant 0 : index
    %c0_94 = arith.constant 0 : index
    %147 = vector.load %arg2[%146, %c0_93, %c0_94] : memref<16x1x384xf32, #tpu.memory_space<vmem>>, vector<1x1x384xf32>
    %148 = vector.shape_cast %147 : vector<1x1x384xf32> to vector<1x384xf32>
    %c7_95 = arith.constant 7 : index
    %c0_96 = arith.constant 0 : index
    %149 = vector.load %arg8[%c7_95, %c0_96] : memref<8x384xf32, #tpu.memory_space<vmem>>, vector<1x384xf32>
    tpu.vector_store %arg8[%c7_95, %c0_96], %148 {strides = array<i32>} : memref<8x384xf32, #tpu.memory_space<vmem>>, vector<1x384xf32>,
    %c0_97 = arith.constant 0 : index
    %c0_98 = arith.constant 0 : index
    %150 = vector.load %arg8[%c0_97, %c0_98] : memref<8x384xf32, #tpu.memory_space<vmem>>, vector<8x384xf32>
    %c0_99 = arith.constant 0 : index
    %c0_100 = arith.constant 0 : index
    %151 = vector.load %arg3[%c0_99, %c0_100] : memref<128x384xf32, #tpu.memory_space<vmem>>, vector<128x384xf32>
    %cst_101 = arith.constant dense<0.000000e+00> : vector<8x384xf32>
    %152 = tpu.matmul %90, %151, %cst_101 {dimension_numbers = #tpu.dot_dimension_numbers<[1], [0], [0], [1], [0, 0, 1, 1], [], []>} : vector<8x128xf32>, vector<128x384xf32>, vector<8x384xf32> -> vector<8x384xf32>
    %153 = vector.extract_strided_slice %150 {offsets = [0, 0], sizes = [8, 128], strides = [1, 1]} : vector<8x384xf32> to vector<8x128xf32>
    %154 = vector.extract_strided_slice %152 {offsets = [0, 0], sizes = [8, 128], strides = [1, 1]} : vector<8x384xf32> to vector<8x128xf32>
    %155 = arith.addf %153, %154 : vector<8x128xf32>
    %cst_102 = arith.constant 5.000000e-01 : f32
    %156 = vector.broadcast %cst_102 : f32 to vector<8x128xf32>
    %157 = arith.mulf %156, %155 : vector<8x128xf32>
    %158 = math.tanh %157 : vector<8x128xf32>
    %cst_103 = arith.constant 1.000000e+00 : f32
    %159 = vector.broadcast %cst_103 : f32 to vector<8x128xf32>
    %160 = arith.addf %158, %159 : vector<8x128xf32>
    %cst_104 = arith.constant 5.000000e-01 : f32
    %161 = vector.broadcast %cst_104 : f32 to vector<8x128xf32>
    %162 = arith.mulf %161, %160 : vector<8x128xf32>
    %163 = vector.extract_strided_slice %150 {offsets = [0, 128], sizes = [8, 128], strides = [1, 1]} : vector<8x384xf32> to vector<8x128xf32>
    %164 = vector.extract_strided_slice %152 {offsets = [0, 128], sizes = [8, 128], strides = [1, 1]} : vector<8x384xf32> to vector<8x128xf32>
    %165 = arith.addf %163, %164 : vector<8x128xf32>
    %cst_105 = arith.constant 5.000000e-01 : f32
    %166 = vector.broadcast %cst_105 : f32 to vector<8x128xf32>
    %167 = arith.mulf %166, %165 : vector<8x128xf32>
    %168 = math.tanh %167 : vector<8x128xf32>
    %cst_106 = arith.constant 1.000000e+00 : f32
    %169 = vector.broadcast %cst_106 : f32 to vector<8x128xf32>
    %170 = arith.addf %168, %169 : vector<8x128xf32>
    %cst_107 = arith.constant 5.000000e-01 : f32
    %171 = vector.broadcast %cst_107 : f32 to vector<8x128xf32>
    %172 = arith.mulf %171, %170 : vector<8x128xf32>
    %173 = vector.extract_strided_slice %150 {offsets = [0, 256], sizes = [8, 128], strides = [1, 1]} : vector<8x384xf32> to vector<8x128xf32>
    %174 = vector.extract_strided_slice %152 {offsets = [0, 256], sizes = [8, 128], strides = [1, 1]} : vector<8x384xf32> to vector<8x128xf32>
    %175 = arith.addf %174, %1 : vector<8x128xf32>
    %176 = arith.mulf %162, %175 : vector<8x128xf32>
    %177 = arith.addf %173, %176 : vector<8x128xf32>
    %178 = math.tanh %177 : vector<8x128xf32>
    %179 = arith.subf %90, %178 : vector<8x128xf32>
    %180 = arith.mulf %172, %179 : vector<8x128xf32>
    %181 = arith.addf %178, %180 : vector<8x128xf32>
    %c1_108 = arith.constant 1 : index
    %c0_109 = arith.constant 0 : index
    %c0_110 = arith.constant 0 : index
    %182 = vector.load %arg6[%c1_108, %c0_109, %c0_110] : memref<8x8x128xf32, #tpu.memory_space<vmem>>, vector<1x8x128xf32>
    %183 = vector.shape_cast %182 : vector<1x8x128xf32> to vector<8x128xf32>
    %184 = vector.shape_cast %181 : vector<8x128xf32> to vector<1x8x128xf32>
    tpu.vector_store %arg6[%c1_108, %c0_109, %c0_110], %184 {strides = array<i32>} : memref<8x8x128xf32, #tpu.memory_space<vmem>>, vector<1x8x128xf32>,
    %c0_i32_111 = arith.constant 0 : i32
    %185 = arith.addi %0, %c0_i32_111 : i32
    %186 = arith.index_cast %185 : i32 to index
    %c2_112 = arith.constant 2 : index
    %187 = memref.load %arg1[%186, %c2_112] : memref<8x8xi32, #tpu.memory_space<smem>>
    %188 = arith.index_cast %187 : i32 to index
    %c0_113 = arith.constant 0 : index
    %c0_114 = arith.constant 0 : index
    %189 = vector.load %arg2[%188, %c0_113, %c0_114] : memref<16x1x384xf32, #tpu.memory_space<vmem>>, vector<1x1x384xf32>
    %190 = vector.shape_cast %189 : vector<1x1x384xf32> to vector<1x384xf32>
    %c0_115 = arith.constant 0 : index
    %c0_116 = arith.constant 0 : index
    %191 = vector.load %arg8[%c0_115, %c0_116] : memref<8x384xf32, #tpu.memory_space<vmem>>, vector<1x384xf32>
    tpu.vector_store %arg8[%c0_115, %c0_116], %190 {strides = array<i32>} : memref<8x384xf32, #tpu.memory_space<vmem>>, vector<1x384xf32>,
    %c1_i32_117 = arith.constant 1 : i32
    %192 = arith.addi %0, %c1_i32_117 : i32
    %193 = arith.index_cast %192 : i32 to index
    %c2_118 = arith.constant 2 : index
    %194 = memref.load %arg1[%193, %c2_118] : memref<8x8xi32, #tpu.memory_space<smem>>
    %195 = arith.index_cast %194 : i32 to index
    %c0_119 = arith.constant 0 : index
    %c0_120 = arith.constant 0 : index
    %196 = vector.load %arg2[%195, %c0_119, %c0_120] : memref<16x1x384xf32, #tpu.memory_space<vmem>>, vector<1x1x384xf32>
    %197 = vector.shape_cast %196 : vector<1x1x384xf32> to vector<1x384xf32>
    %c1_121 = arith.constant 1 : index
    %c0_122 = arith.constant 0 : index
    %198 = vector.load %arg8[%c1_121, %c0_122] : memref<8x384xf32, #tpu.memory_space<vmem>>, vector<1x384xf32>
    tpu.vector_store %arg8[%c1_121, %c0_122], %197 {strides = array<i32>} : memref<8x384xf32, #tpu.memory_space<vmem>>, vector<1x384xf32>,
    %c2_i32_123 = arith.constant 2 : i32
    %199 = arith.addi %0, %c2_i32_123 : i32
    %200 = arith.index_cast %199 : i32 to index
    %c2_124 = arith.constant 2 : index
    %201 = memref.load %arg1[%200, %c2_124] : memref<8x8xi32, #tpu.memory_space<smem>>
    %202 = arith.index_cast %201 : i32 to index
    %c0_125 = arith.constant 0 : index
    %c0_126 = arith.constant 0 : index
    %203 = vector.load %arg2[%202, %c0_125, %c0_126] : memref<16x1x384xf32, #tpu.memory_space<vmem>>, vector<1x1x384xf32>
    %204 = vector.shape_cast %203 : vector<1x1x384xf32> to vector<1x384xf32>
    %c2_127 = arith.constant 2 : index
    %c0_128 = arith.constant 0 : index
    %205 = vector.load %arg8[%c2_127, %c0_128] : memref<8x384xf32, #tpu.memory_space<vmem>>, vector<1x384xf32>
    tpu.vector_store %arg8[%c2_127, %c0_128], %204 {strides = array<i32>} : memref<8x384xf32, #tpu.memory_space<vmem>>, vector<1x384xf32>,
    %c3_i32_129 = arith.constant 3 : i32
    %206 = arith.addi %0, %c3_i32_129 : i32
    %207 = arith.index_cast %206 : i32 to index
    %c2_130 = arith.constant 2 : index
    %208 = memref.load %arg1[%207, %c2_130] : memref<8x8xi32, #tpu.memory_space<smem>>
    %209 = arith.index_cast %208 : i32 to index
    %c0_131 = arith.constant 0 : index
    %c0_132 = arith.constant 0 : index
    %210 = vector.load %arg2[%209, %c0_131, %c0_132] : memref<16x1x384xf32, #tpu.memory_space<vmem>>, vector<1x1x384xf32>
    %211 = vector.shape_cast %210 : vector<1x1x384xf32> to vector<1x384xf32>
    %c3_133 = arith.constant 3 : index
    %c0_134 = arith.constant 0 : index
    %212 = vector.load %arg8[%c3_133, %c0_134] : memref<8x384xf32, #tpu.memory_space<vmem>>, vector<1x384xf32>
    tpu.vector_store %arg8[%c3_133, %c0_134], %211 {strides = array<i32>} : memref<8x384xf32, #tpu.memory_space<vmem>>, vector<1x384xf32>,
    %c4_i32_135 = arith.constant 4 : i32
    %213 = arith.addi %0, %c4_i32_135 : i32
    %214 = arith.index_cast %213 : i32 to index
    %c2_136 = arith.constant 2 : index
    %215 = memref.load %arg1[%214, %c2_136] : memref<8x8xi32, #tpu.memory_space<smem>>
    %216 = arith.index_cast %215 : i32 to index
    %c0_137 = arith.constant 0 : index
    %c0_138 = arith.constant 0 : index
    %217 = vector.load %arg2[%216, %c0_137, %c0_138] : memref<16x1x384xf32, #tpu.memory_space<vmem>>, vector<1x1x384xf32>
    %218 = vector.shape_cast %217 : vector<1x1x384xf32> to vector<1x384xf32>
    %c4_139 = arith.constant 4 : index
    %c0_140 = arith.constant 0 : index
    %219 = vector.load %arg8[%c4_139, %c0_140] : memref<8x384xf32, #tpu.memory_space<vmem>>, vector<1x384xf32>
    tpu.vector_store %arg8[%c4_139, %c0_140], %218 {strides = array<i32>} : memref<8x384xf32, #tpu.memory_space<vmem>>, vector<1x384xf32>,
    %c5_i32_141 = arith.constant 5 : i32
    %220 = arith.addi %0, %c5_i32_141 : i32
    %221 = arith.index_cast %220 : i32 to index
    %c2_142 = arith.constant 2 : index
    %222 = memref.load %arg1[%221, %c2_142] : memref<8x8xi32, #tpu.memory_space<smem>>
    %223 = arith.index_cast %222 : i32 to index
    %c0_143 = arith.constant 0 : index
    %c0_144 = arith.constant 0 : index
    %224 = vector.load %arg2[%223, %c0_143, %c0_144] : memref<16x1x384xf32, #tpu.memory_space<vmem>>, vector<1x1x384xf32>
    %225 = vector.shape_cast %224 : vector<1x1x384xf32> to vector<1x384xf32>
    %c5_145 = arith.constant 5 : index
    %c0_146 = arith.constant 0 : index
    %226 = vector.load %arg8[%c5_145, %c0_146] : memref<8x384xf32, #tpu.memory_space<vmem>>, vector<1x384xf32>
    tpu.vector_store %arg8[%c5_145, %c0_146], %225 {strides = array<i32>} : memref<8x384xf32, #tpu.memory_space<vmem>>, vector<1x384xf32>,
    %c6_i32_147 = arith.constant 6 : i32
    %227 = arith.addi %0, %c6_i32_147 : i32
    %228 = arith.index_cast %227 : i32 to index
    %c2_148 = arith.constant 2 : index
    %229 = memref.load %arg1[%228, %c2_148] : memref<8x8xi32, #tpu.memory_space<smem>>
    %230 = arith.index_cast %229 : i32 to index
    %c0_149 = arith.constant 0 : index
    %c0_150 = arith.constant 0 : index
    %231 = vector.load %arg2[%230, %c0_149, %c0_150] : memref<16x1x384xf32, #tpu.memory_space<vmem>>, vector<1x1x384xf32>
    %232 = vector.shape_cast %231 : vector<1x1x384xf32> to vector<1x384xf32>
    %c6_151 = arith.constant 6 : index
    %c0_152 = arith.constant 0 : index
    %233 = vector.load %arg8[%c6_151, %c0_152] : memref<8x384xf32, #tpu.memory_space<vmem>>, vector<1x384xf32>
    tpu.vector_store %arg8[%c6_151, %c0_152], %232 {strides = array<i32>} : memref<8x384xf32, #tpu.memory_space<vmem>>, vector<1x384xf32>,
    %c7_i32_153 = arith.constant 7 : i32
    %234 = arith.addi %0, %c7_i32_153 : i32
    %235 = arith.index_cast %234 : i32 to index
    %c2_154 = arith.constant 2 : index
    %236 = memref.load %arg1[%235, %c2_154] : memref<8x8xi32, #tpu.memory_space<smem>>
    %237 = arith.index_cast %236 : i32 to index
    %c0_155 = arith.constant 0 : index
    %c0_156 = arith.constant 0 : index
    %238 = vector.load %arg2[%237, %c0_155, %c0_156] : memref<16x1x384xf32, #tpu.memory_space<vmem>>, vector<1x1x384xf32>
    %239 = vector.shape_cast %238 : vector<1x1x384xf32> to vector<1x384xf32>
    %c7_157 = arith.constant 7 : index
    %c0_158 = arith.constant 0 : index
    %240 = vector.load %arg8[%c7_157, %c0_158] : memref<8x384xf32, #tpu.memory_space<vmem>>, vector<1x384xf32>
    tpu.vector_store %arg8[%c7_157, %c0_158], %239 {strides = array<i32>} : memref<8x384xf32, #tpu.memory_space<vmem>>, vector<1x384xf32>,
    %c0_159 = arith.constant 0 : index
    %c0_160 = arith.constant 0 : index
    %241 = vector.load %arg8[%c0_159, %c0_160] : memref<8x384xf32, #tpu.memory_space<vmem>>, vector<8x384xf32>
    %c0_161 = arith.constant 0 : index
    %c0_162 = arith.constant 0 : index
    %242 = vector.load %arg3[%c0_161, %c0_162] : memref<128x384xf32, #tpu.memory_space<vmem>>, vector<128x384xf32>
    %cst_163 = arith.constant dense<0.000000e+00> : vector<8x384xf32>
    %243 = tpu.matmul %181, %242, %cst_163 {dimension_numbers = #tpu.dot_dimension_numbers<[1], [0], [0], [1], [0, 0, 1, 1], [], []>} : vector<8x128xf32>, vector<128x384xf32>, vector<8x384xf32> -> vector<8x384xf32>
    %244 = vector.extract_strided_slice %241 {offsets = [0, 0], sizes = [8, 128], strides = [1, 1]} : vector<8x384xf32> to vector<8x128xf32>
    %245 = vector.extract_strided_slice %243 {offsets = [0, 0], sizes = [8, 128], strides = [1, 1]} : vector<8x384xf32> to vector<8x128xf32>
    %246 = arith.addf %244, %245 : vector<8x128xf32>
    %cst_164 = arith.constant 5.000000e-01 : f32
    %247 = vector.broadcast %cst_164 : f32 to vector<8x128xf32>
    %248 = arith.mulf %247, %246 : vector<8x128xf32>
    %249 = math.tanh %248 : vector<8x128xf32>
    %cst_165 = arith.constant 1.000000e+00 : f32
    %250 = vector.broadcast %cst_165 : f32 to vector<8x128xf32>
    %251 = arith.addf %249, %250 : vector<8x128xf32>
    %cst_166 = arith.constant 5.000000e-01 : f32
    %252 = vector.broadcast %cst_166 : f32 to vector<8x128xf32>
    %253 = arith.mulf %252, %251 : vector<8x128xf32>
    %254 = vector.extract_strided_slice %241 {offsets = [0, 128], sizes = [8, 128], strides = [1, 1]} : vector<8x384xf32> to vector<8x128xf32>
    %255 = vector.extract_strided_slice %243 {offsets = [0, 128], sizes = [8, 128], strides = [1, 1]} : vector<8x384xf32> to vector<8x128xf32>
    %256 = arith.addf %254, %255 : vector<8x128xf32>
    %cst_167 = arith.constant 5.000000e-01 : f32
    %257 = vector.broadcast %cst_167 : f32 to vector<8x128xf32>
    %258 = arith.mulf %257, %256 : vector<8x128xf32>
    %259 = math.tanh %258 : vector<8x128xf32>
    %cst_168 = arith.constant 1.000000e+00 : f32
    %260 = vector.broadcast %cst_168 : f32 to vector<8x128xf32>
    %261 = arith.addf %259, %260 : vector<8x128xf32>
    %cst_169 = arith.constant 5.000000e-01 : f32
    %262 = vector.broadcast %cst_169 : f32 to vector<8x128xf32>
    %263 = arith.mulf %262, %261 : vector<8x128xf32>
    %264 = vector.extract_strided_slice %241 {offsets = [0, 256], sizes = [8, 128], strides = [1, 1]} : vector<8x384xf32> to vector<8x128xf32>
    %265 = vector.extract_strided_slice %243 {offsets = [0, 256], sizes = [8, 128], strides = [1, 1]} : vector<8x384xf32> to vector<8x128xf32>
    %266 = arith.addf %265, %1 : vector<8x128xf32>
    %267 = arith.mulf %253, %266 : vector<8x128xf32>
    %268 = arith.addf %264, %267 : vector<8x128xf32>
    %269 = math.tanh %268 : vector<8x128xf32>
    %270 = arith.subf %181, %269 : vector<8x128xf32>
    %271 = arith.mulf %263, %270 : vector<8x128xf32>
    %272 = arith.addf %269, %271 : vector<8x128xf32>
    %c2_170 = arith.constant 2 : index
    %c0_171 = arith.constant 0 : index
    %c0_172 = arith.constant 0 : index
    %273 = vector.load %arg6[%c2_170, %c0_171, %c0_172] : memref<8x8x128xf32, #tpu.memory_space<vmem>>, vector<1x8x128xf32>
    %274 = vector.shape_cast %273 : vector<1x8x128xf32> to vector<8x128xf32>
    %275 = vector.shape_cast %272 : vector<8x128xf32> to vector<1x8x128xf32>
    tpu.vector_store %arg6[%c2_170, %c0_171, %c0_172], %275 {strides = array<i32>} : memref<8x8x128xf32, #tpu.memory_space<vmem>>, vector<1x8x128xf32>,
    %c0_i32_173 = arith.constant 0 : i32
    %276 = arith.addi %0, %c0_i32_173 : i32
    %277 = arith.index_cast %276 : i32 to index
    %c3_174 = arith.constant 3 : index
    %278 = memref.load %arg1[%277, %c3_174] : memref<8x8xi32, #tpu.memory_space<smem>>
    %279 = arith.index_cast %278 : i32 to index
    %c0_175 = arith.constant 0 : index
    %c0_176 = arith.constant 0 : index
    %280 = vector.load %arg2[%279, %c0_175, %c0_176] : memref<16x1x384xf32, #tpu.memory_space<vmem>>, vector<1x1x384xf32>
    %281 = vector.shape_cast %280 : vector<1x1x384xf32> to vector<1x384xf32>
    %c0_177 = arith.constant 0 : index
    %c0_178 = arith.constant 0 : index
    %282 = vector.load %arg8[%c0_177, %c0_178] : memref<8x384xf32, #tpu.memory_space<vmem>>, vector<1x384xf32>
    tpu.vector_store %arg8[%c0_177, %c0_178], %281 {strides = array<i32>} : memref<8x384xf32, #tpu.memory_space<vmem>>, vector<1x384xf32>,
    %c1_i32_179 = arith.constant 1 : i32
    %283 = arith.addi %0, %c1_i32_179 : i32
    %284 = arith.index_cast %283 : i32 to index
    %c3_180 = arith.constant 3 : index
    %285 = memref.load %arg1[%284, %c3_180] : memref<8x8xi32, #tpu.memory_space<smem>>
    %286 = arith.index_cast %285 : i32 to index
    %c0_181 = arith.constant 0 : index
    %c0_182 = arith.constant 0 : index
    %287 = vector.load %arg2[%286, %c0_181, %c0_182] : memref<16x1x384xf32, #tpu.memory_space<vmem>>, vector<1x1x384xf32>
    %288 = vector.shape_cast %287 : vector<1x1x384xf32> to vector<1x384xf32>
    %c1_183 = arith.constant 1 : index
    %c0_184 = arith.constant 0 : index
    %289 = vector.load %arg8[%c1_183, %c0_184] : memref<8x384xf32, #tpu.memory_space<vmem>>, vector<1x384xf32>
    tpu.vector_store %arg8[%c1_183, %c0_184], %288 {strides = array<i32>} : memref<8x384xf32, #tpu.memory_space<vmem>>, vector<1x384xf32>,
    %c2_i32_185 = arith.constant 2 : i32
    %290 = arith.addi %0, %c2_i32_185 : i32
    %291 = arith.index_cast %290 : i32 to index
    %c3_186 = arith.constant 3 : index
    %292 = memref.load %arg1[%291, %c3_186] : memref<8x8xi32, #tpu.memory_space<smem>>
    %293 = arith.index_cast %292 : i32 to index
    %c0_187 = arith.constant 0 : index
    %c0_188 = arith.constant 0 : index
    %294 = vector.load %arg2[%293, %c0_187, %c0_188] : memref<16x1x384xf32, #tpu.memory_space<vmem>>, vector<1x1x384xf32>
    %295 = vector.shape_cast %294 : vector<1x1x384xf32> to vector<1x384xf32>
    %c2_189 = arith.constant 2 : index
    %c0_190 = arith.constant 0 : index
    %296 = vector.load %arg8[%c2_189, %c0_190] : memref<8x384xf32, #tpu.memory_space<vmem>>, vector<1x384xf32>
    tpu.vector_store %arg8[%c2_189, %c0_190], %295 {strides = array<i32>} : memref<8x384xf32, #tpu.memory_space<vmem>>, vector<1x384xf32>,
    %c3_i32_191 = arith.constant 3 : i32
    %297 = arith.addi %0, %c3_i32_191 : i32
    %298 = arith.index_cast %297 : i32 to index
    %c3_192 = arith.constant 3 : index
    %299 = memref.load %arg1[%298, %c3_192] : memref<8x8xi32, #tpu.memory_space<smem>>
    %300 = arith.index_cast %299 : i32 to index
    %c0_193 = arith.constant 0 : index
    %c0_194 = arith.constant 0 : index
    %301 = vector.load %arg2[%300, %c0_193, %c0_194] : memref<16x1x384xf32, #tpu.memory_space<vmem>>, vector<1x1x384xf32>
    %302 = vector.shape_cast %301 : vector<1x1x384xf32> to vector<1x384xf32>
    %c3_195 = arith.constant 3 : index
    %c0_196 = arith.constant 0 : index
    %303 = vector.load %arg8[%c3_195, %c0_196] : memref<8x384xf32, #tpu.memory_space<vmem>>, vector<1x384xf32>
    tpu.vector_store %arg8[%c3_195, %c0_196], %302 {strides = array<i32>} : memref<8x384xf32, #tpu.memory_space<vmem>>, vector<1x384xf32>,
    %c4_i32_197 = arith.constant 4 : i32
    %304 = arith.addi %0, %c4_i32_197 : i32
    %305 = arith.index_cast %304 : i32 to index
    %c3_198 = arith.constant 3 : index
    %306 = memref.load %arg1[%305, %c3_198] : memref<8x8xi32, #tpu.memory_space<smem>>
    %307 = arith.index_cast %306 : i32 to index
    %c0_199 = arith.constant 0 : index
    %c0_200 = arith.constant 0 : index
    %308 = vector.load %arg2[%307, %c0_199, %c0_200] : memref<16x1x384xf32, #tpu.memory_space<vmem>>, vector<1x1x384xf32>
    %309 = vector.shape_cast %308 : vector<1x1x384xf32> to vector<1x384xf32>
    %c4_201 = arith.constant 4 : index
    %c0_202 = arith.constant 0 : index
    %310 = vector.load %arg8[%c4_201, %c0_202] : memref<8x384xf32, #tpu.memory_space<vmem>>, vector<1x384xf32>
    tpu.vector_store %arg8[%c4_201, %c0_202], %309 {strides = array<i32>} : memref<8x384xf32, #tpu.memory_space<vmem>>, vector<1x384xf32>,
    %c5_i32_203 = arith.constant 5 : i32
    %311 = arith.addi %0, %c5_i32_203 : i32
    %312 = arith.index_cast %311 : i32 to index
    %c3_204 = arith.constant 3 : index
    %313 = memref.load %arg1[%312, %c3_204] : memref<8x8xi32, #tpu.memory_space<smem>>
    %314 = arith.index_cast %313 : i32 to index
    %c0_205 = arith.constant 0 : index
    %c0_206 = arith.constant 0 : index
    %315 = vector.load %arg2[%314, %c0_205, %c0_206] : memref<16x1x384xf32, #tpu.memory_space<vmem>>, vector<1x1x384xf32>
    %316 = vector.shape_cast %315 : vector<1x1x384xf32> to vector<1x384xf32>
    %c5_207 = arith.constant 5 : index
    %c0_208 = arith.constant 0 : index
    %317 = vector.load %arg8[%c5_207, %c0_208] : memref<8x384xf32, #tpu.memory_space<vmem>>, vector<1x384xf32>
    tpu.vector_store %arg8[%c5_207, %c0_208], %316 {strides = array<i32>} : memref<8x384xf32, #tpu.memory_space<vmem>>, vector<1x384xf32>,
    %c6_i32_209 = arith.constant 6 : i32
    %318 = arith.addi %0, %c6_i32_209 : i32
    %319 = arith.index_cast %318 : i32 to index
    %c3_210 = arith.constant 3 : index
    %320 = memref.load %arg1[%319, %c3_210] : memref<8x8xi32, #tpu.memory_space<smem>>
    %321 = arith.index_cast %320 : i32 to index
    %c0_211 = arith.constant 0 : index
    %c0_212 = arith.constant 0 : index
    %322 = vector.load %arg2[%321, %c0_211, %c0_212] : memref<16x1x384xf32, #tpu.memory_space<vmem>>, vector<1x1x384xf32>
    %323 = vector.shape_cast %322 : vector<1x1x384xf32> to vector<1x384xf32>
    %c6_213 = arith.constant 6 : index
    %c0_214 = arith.constant 0 : index
    %324 = vector.load %arg8[%c6_213, %c0_214] : memref<8x384xf32, #tpu.memory_space<vmem>>, vector<1x384xf32>
    tpu.vector_store %arg8[%c6_213, %c0_214], %323 {strides = array<i32>} : memref<8x384xf32, #tpu.memory_space<vmem>>, vector<1x384xf32>,
    %c7_i32_215 = arith.constant 7 : i32
    %325 = arith.addi %0, %c7_i32_215 : i32
    %326 = arith.index_cast %325 : i32 to index
    %c3_216 = arith.constant 3 : index
    %327 = memref.load %arg1[%326, %c3_216] : memref<8x8xi32, #tpu.memory_space<smem>>
    %328 = arith.index_cast %327 : i32 to index
    %c0_217 = arith.constant 0 : index
    %c0_218 = arith.constant 0 : index
    %329 = vector.load %arg2[%328, %c0_217, %c0_218] : memref<16x1x384xf32, #tpu.memory_space<vmem>>, vector<1x1x384xf32>
    %330 = vector.shape_cast %329 : vector<1x1x384xf32> to vector<1x384xf32>
    %c7_219 = arith.constant 7 : index
    %c0_220 = arith.constant 0 : index
    %331 = vector.load %arg8[%c7_219, %c0_220] : memref<8x384xf32, #tpu.memory_space<vmem>>, vector<1x384xf32>
    tpu.vector_store %arg8[%c7_219, %c0_220], %330 {strides = array<i32>} : memref<8x384xf32, #tpu.memory_space<vmem>>, vector<1x384xf32>,
    %c0_221 = arith.constant 0 : index
    %c0_222 = arith.constant 0 : index
    %332 = vector.load %arg8[%c0_221, %c0_222] : memref<8x384xf32, #tpu.memory_space<vmem>>, vector<8x384xf32>
    %c0_223 = arith.constant 0 : index
    %c0_224 = arith.constant 0 : index
    %333 = vector.load %arg3[%c0_223, %c0_224] : memref<128x384xf32, #tpu.memory_space<vmem>>, vector<128x384xf32>
    %cst_225 = arith.constant dense<0.000000e+00> : vector<8x384xf32>
    %334 = tpu.matmul %272, %333, %cst_225 {dimension_numbers = #tpu.dot_dimension_numbers<[1], [0], [0], [1], [0, 0, 1, 1], [], []>} : vector<8x128xf32>, vector<128x384xf32>, vector<8x384xf32> -> vector<8x384xf32>
    %335 = vector.extract_strided_slice %332 {offsets = [0, 0], sizes = [8, 128], strides = [1, 1]} : vector<8x384xf32> to vector<8x128xf32>
    %336 = vector.extract_strided_slice %334 {offsets = [0, 0], sizes = [8, 128], strides = [1, 1]} : vector<8x384xf32> to vector<8x128xf32>
    %337 = arith.addf %335, %336 : vector<8x128xf32>
    %cst_226 = arith.constant 5.000000e-01 : f32
    %338 = vector.broadcast %cst_226 : f32 to vector<8x128xf32>
    %339 = arith.mulf %338, %337 : vector<8x128xf32>
    %340 = math.tanh %339 : vector<8x128xf32>
    %cst_227 = arith.constant 1.000000e+00 : f32
    %341 = vector.broadcast %cst_227 : f32 to vector<8x128xf32>
    %342 = arith.addf %340, %341 : vector<8x128xf32>
    %cst_228 = arith.constant 5.000000e-01 : f32
    %343 = vector.broadcast %cst_228 : f32 to vector<8x128xf32>
    %344 = arith.mulf %343, %342 : vector<8x128xf32>
    %345 = vector.extract_strided_slice %332 {offsets = [0, 128], sizes = [8, 128], strides = [1, 1]} : vector<8x384xf32> to vector<8x128xf32>
    %346 = vector.extract_strided_slice %334 {offsets = [0, 128], sizes = [8, 128], strides = [1, 1]} : vector<8x384xf32> to vector<8x128xf32>
    %347 = arith.addf %345, %346 : vector<8x128xf32>
    %cst_229 = arith.constant 5.000000e-01 : f32
    %348 = vector.broadcast %cst_229 : f32 to vector<8x128xf32>
    %349 = arith.mulf %348, %347 : vector<8x128xf32>
    %350 = math.tanh %349 : vector<8x128xf32>
    %cst_230 = arith.constant 1.000000e+00 : f32
    %351 = vector.broadcast %cst_230 : f32 to vector<8x128xf32>
    %352 = arith.addf %350, %351 : vector<8x128xf32>
    %cst_231 = arith.constant 5.000000e-01 : f32
    %353 = vector.broadcast %cst_231 : f32 to vector<8x128xf32>
    %354 = arith.mulf %353, %352 : vector<8x128xf32>
    %355 = vector.extract_strided_slice %332 {offsets = [0, 256], sizes = [8, 128], strides = [1, 1]} : vector<8x384xf32> to vector<8x128xf32>
    %356 = vector.extract_strided_slice %334 {offsets = [0, 256], sizes = [8, 128], strides = [1, 1]} : vector<8x384xf32> to vector<8x128xf32>
    %357 = arith.addf %356, %1 : vector<8x128xf32>
    %358 = arith.mulf %344, %357 : vector<8x128xf32>
    %359 = arith.addf %355, %358 : vector<8x128xf32>
    %360 = math.tanh %359 : vector<8x128xf32>
    %361 = arith.subf %272, %360 : vector<8x128xf32>
    %362 = arith.mulf %354, %361 : vector<8x128xf32>
    %363 = arith.addf %360, %362 : vector<8x128xf32>
    %c3_232 = arith.constant 3 : index
    %c0_233 = arith.constant 0 : index
    %c0_234 = arith.constant 0 : index
    %364 = vector.load %arg6[%c3_232, %c0_233, %c0_234] : memref<8x8x128xf32, #tpu.memory_space<vmem>>, vector<1x8x128xf32>
    %365 = vector.shape_cast %364 : vector<1x8x128xf32> to vector<8x128xf32>
    %366 = vector.shape_cast %363 : vector<8x128xf32> to vector<1x8x128xf32>
    tpu.vector_store %arg6[%c3_232, %c0_233, %c0_234], %366 {strides = array<i32>} : memref<8x8x128xf32, #tpu.memory_space<vmem>>, vector<1x8x128xf32>,
    %c0_i32_235 = arith.constant 0 : i32
    %367 = arith.addi %0, %c0_i32_235 : i32
    %368 = arith.index_cast %367 : i32 to index
    %c4_236 = arith.constant 4 : index
    %369 = memref.load %arg1[%368, %c4_236] : memref<8x8xi32, #tpu.memory_space<smem>>
    %370 = arith.index_cast %369 : i32 to index
    %c0_237 = arith.constant 0 : index
    %c0_238 = arith.constant 0 : index
    %371 = vector.load %arg2[%370, %c0_237, %c0_238] : memref<16x1x384xf32, #tpu.memory_space<vmem>>, vector<1x1x384xf32>
    %372 = vector.shape_cast %371 : vector<1x1x384xf32> to vector<1x384xf32>
    %c0_239 = arith.constant 0 : index
    %c0_240 = arith.constant 0 : index
    %373 = vector.load %arg8[%c0_239, %c0_240] : memref<8x384xf32, #tpu.memory_space<vmem>>, vector<1x384xf32>
    tpu.vector_store %arg8[%c0_239, %c0_240], %372 {strides = array<i32>} : memref<8x384xf32, #tpu.memory_space<vmem>>, vector<1x384xf32>,
    %c1_i32_241 = arith.constant 1 : i32
    %374 = arith.addi %0, %c1_i32_241 : i32
    %375 = arith.index_cast %374 : i32 to index
    %c4_242 = arith.constant 4 : index
    %376 = memref.load %arg1[%375, %c4_242] : memref<8x8xi32, #tpu.memory_space<smem>>
    %377 = arith.index_cast %376 : i32 to index
    %c0_243 = arith.constant 0 : index
    %c0_244 = arith.constant 0 : index
    %378 = vector.load %arg2[%377, %c0_243, %c0_244] : memref<16x1x384xf32, #tpu.memory_space<vmem>>, vector<1x1x384xf32>
    %379 = vector.shape_cast %378 : vector<1x1x384xf32> to vector<1x384xf32>
    %c1_245 = arith.constant 1 : index
    %c0_246 = arith.constant 0 : index
    %380 = vector.load %arg8[%c1_245, %c0_246] : memref<8x384xf32, #tpu.memory_space<vmem>>, vector<1x384xf32>
    tpu.vector_store %arg8[%c1_245, %c0_246], %379 {strides = array<i32>} : memref<8x384xf32, #tpu.memory_space<vmem>>, vector<1x384xf32>,
    %c2_i32_247 = arith.constant 2 : i32
    %381 = arith.addi %0, %c2_i32_247 : i32
    %382 = arith.index_cast %381 : i32 to index
    %c4_248 = arith.constant 4 : index
    %383 = memref.load %arg1[%382, %c4_248] : memref<8x8xi32, #tpu.memory_space<smem>>
    %384 = arith.index_cast %383 : i32 to index
    %c0_249 = arith.constant 0 : index
    %c0_250 = arith.constant 0 : index
    %385 = vector.load %arg2[%384, %c0_249, %c0_250] : memref<16x1x384xf32, #tpu.memory_space<vmem>>, vector<1x1x384xf32>
    %386 = vector.shape_cast %385 : vector<1x1x384xf32> to vector<1x384xf32>
    %c2_251 = arith.constant 2 : index
    %c0_252 = arith.constant 0 : index
    %387 = vector.load %arg8[%c2_251, %c0_252] : memref<8x384xf32, #tpu.memory_space<vmem>>, vector<1x384xf32>
    tpu.vector_store %arg8[%c2_251, %c0_252], %386 {strides = array<i32>} : memref<8x384xf32, #tpu.memory_space<vmem>>, vector<1x384xf32>,
    %c3_i32_253 = arith.constant 3 : i32
    %388 = arith.addi %0, %c3_i32_253 : i32
    %389 = arith.index_cast %388 : i32 to index
    %c4_254 = arith.constant 4 : index
    %390 = memref.load %arg1[%389, %c4_254] : memref<8x8xi32, #tpu.memory_space<smem>>
    %391 = arith.index_cast %390 : i32 to index
    %c0_255 = arith.constant 0 : index
    %c0_256 = arith.constant 0 : index
    %392 = vector.load %arg2[%391, %c0_255, %c0_256] : memref<16x1x384xf32, #tpu.memory_space<vmem>>, vector<1x1x384xf32>
    %393 = vector.shape_cast %392 : vector<1x1x384xf32> to vector<1x384xf32>
    %c3_257 = arith.constant 3 : index
    %c0_258 = arith.constant 0 : index
    %394 = vector.load %arg8[%c3_257, %c0_258] : memref<8x384xf32, #tpu.memory_space<vmem>>, vector<1x384xf32>
    tpu.vector_store %arg8[%c3_257, %c0_258], %393 {strides = array<i32>} : memref<8x384xf32, #tpu.memory_space<vmem>>, vector<1x384xf32>,
    %c4_i32_259 = arith.constant 4 : i32
    %395 = arith.addi %0, %c4_i32_259 : i32
    %396 = arith.index_cast %395 : i32 to index
    %c4_260 = arith.constant 4 : index
    %397 = memref.load %arg1[%396, %c4_260] : memref<8x8xi32, #tpu.memory_space<smem>>
    %398 = arith.index_cast %397 : i32 to index
    %c0_261 = arith.constant 0 : index
    %c0_262 = arith.constant 0 : index
    %399 = vector.load %arg2[%398, %c0_261, %c0_262] : memref<16x1x384xf32, #tpu.memory_space<vmem>>, vector<1x1x384xf32>
    %400 = vector.shape_cast %399 : vector<1x1x384xf32> to vector<1x384xf32>
    %c4_263 = arith.constant 4 : index
    %c0_264 = arith.constant 0 : index
    %401 = vector.load %arg8[%c4_263, %c0_264] : memref<8x384xf32, #tpu.memory_space<vmem>>, vector<1x384xf32>
    tpu.vector_store %arg8[%c4_263, %c0_264], %400 {strides = array<i32>} : memref<8x384xf32, #tpu.memory_space<vmem>>, vector<1x384xf32>,
    %c5_i32_265 = arith.constant 5 : i32
    %402 = arith.addi %0, %c5_i32_265 : i32
    %403 = arith.index_cast %402 : i32 to index
    %c4_266 = arith.constant 4 : index
    %404 = memref.load %arg1[%403, %c4_266] : memref<8x8xi32, #tpu.memory_space<smem>>
    %405 = arith.index_cast %404 : i32 to index
    %c0_267 = arith.constant 0 : index
    %c0_268 = arith.constant 0 : index
    %406 = vector.load %arg2[%405, %c0_267, %c0_268] : memref<16x1x384xf32, #tpu.memory_space<vmem>>, vector<1x1x384xf32>
    %407 = vector.shape_cast %406 : vector<1x1x384xf32> to vector<1x384xf32>
    %c5_269 = arith.constant 5 : index
    %c0_270 = arith.constant 0 : index
    %408 = vector.load %arg8[%c5_269, %c0_270] : memref<8x384xf32, #tpu.memory_space<vmem>>, vector<1x384xf32>
    tpu.vector_store %arg8[%c5_269, %c0_270], %407 {strides = array<i32>} : memref<8x384xf32, #tpu.memory_space<vmem>>, vector<1x384xf32>,
    %c6_i32_271 = arith.constant 6 : i32
    %409 = arith.addi %0, %c6_i32_271 : i32
    %410 = arith.index_cast %409 : i32 to index
    %c4_272 = arith.constant 4 : index
    %411 = memref.load %arg1[%410, %c4_272] : memref<8x8xi32, #tpu.memory_space<smem>>
    %412 = arith.index_cast %411 : i32 to index
    %c0_273 = arith.constant 0 : index
    %c0_274 = arith.constant 0 : index
    %413 = vector.load %arg2[%412, %c0_273, %c0_274] : memref<16x1x384xf32, #tpu.memory_space<vmem>>, vector<1x1x384xf32>
    %414 = vector.shape_cast %413 : vector<1x1x384xf32> to vector<1x384xf32>
    %c6_275 = arith.constant 6 : index
    %c0_276 = arith.constant 0 : index
    %415 = vector.load %arg8[%c6_275, %c0_276] : memref<8x384xf32, #tpu.memory_space<vmem>>, vector<1x384xf32>
    tpu.vector_store %arg8[%c6_275, %c0_276], %414 {strides = array<i32>} : memref<8x384xf32, #tpu.memory_space<vmem>>, vector<1x384xf32>,
    %c7_i32_277 = arith.constant 7 : i32
    %416 = arith.addi %0, %c7_i32_277 : i32
    %417 = arith.index_cast %416 : i32 to index
    %c4_278 = arith.constant 4 : index
    %418 = memref.load %arg1[%417, %c4_278] : memref<8x8xi32, #tpu.memory_space<smem>>
    %419 = arith.index_cast %418 : i32 to index
    %c0_279 = arith.constant 0 : index
    %c0_280 = arith.constant 0 : index
    %420 = vector.load %arg2[%419, %c0_279, %c0_280] : memref<16x1x384xf32, #tpu.memory_space<vmem>>, vector<1x1x384xf32>
    %421 = vector.shape_cast %420 : vector<1x1x384xf32> to vector<1x384xf32>
    %c7_281 = arith.constant 7 : index
    %c0_282 = arith.constant 0 : index
    %422 = vector.load %arg8[%c7_281, %c0_282] : memref<8x384xf32, #tpu.memory_space<vmem>>, vector<1x384xf32>
    tpu.vector_store %arg8[%c7_281, %c0_282], %421 {strides = array<i32>} : memref<8x384xf32, #tpu.memory_space<vmem>>, vector<1x384xf32>,
    %c0_283 = arith.constant 0 : index
    %c0_284 = arith.constant 0 : index
    %423 = vector.load %arg8[%c0_283, %c0_284] : memref<8x384xf32, #tpu.memory_space<vmem>>, vector<8x384xf32>
    %c0_285 = arith.constant 0 : index
    %c0_286 = arith.constant 0 : index
    %424 = vector.load %arg3[%c0_285, %c0_286] : memref<128x384xf32, #tpu.memory_space<vmem>>, vector<128x384xf32>
    %cst_287 = arith.constant dense<0.000000e+00> : vector<8x384xf32>
    %425 = tpu.matmul %363, %424, %cst_287 {dimension_numbers = #tpu.dot_dimension_numbers<[1], [0], [0], [1], [0, 0, 1, 1], [], []>} : vector<8x128xf32>, vector<128x384xf32>, vector<8x384xf32> -> vector<8x384xf32>
    %426 = vector.extract_strided_slice %423 {offsets = [0, 0], sizes = [8, 128], strides = [1, 1]} : vector<8x384xf32> to vector<8x128xf32>
    %427 = vector.extract_strided_slice %425 {offsets = [0, 0], sizes = [8, 128], strides = [1, 1]} : vector<8x384xf32> to vector<8x128xf32>
    %428 = arith.addf %426, %427 : vector<8x128xf32>
    %cst_288 = arith.constant 5.000000e-01 : f32
    %429 = vector.broadcast %cst_288 : f32 to vector<8x128xf32>
    %430 = arith.mulf %429, %428 : vector<8x128xf32>
    %431 = math.tanh %430 : vector<8x128xf32>
    %cst_289 = arith.constant 1.000000e+00 : f32
    %432 = vector.broadcast %cst_289 : f32 to vector<8x128xf32>
    %433 = arith.addf %431, %432 : vector<8x128xf32>
    %cst_290 = arith.constant 5.000000e-01 : f32
    %434 = vector.broadcast %cst_290 : f32 to vector<8x128xf32>
    %435 = arith.mulf %434, %433 : vector<8x128xf32>
    %436 = vector.extract_strided_slice %423 {offsets = [0, 128], sizes = [8, 128], strides = [1, 1]} : vector<8x384xf32> to vector<8x128xf32>
    %437 = vector.extract_strided_slice %425 {offsets = [0, 128], sizes = [8, 128], strides = [1, 1]} : vector<8x384xf32> to vector<8x128xf32>
    %438 = arith.addf %436, %437 : vector<8x128xf32>
    %cst_291 = arith.constant 5.000000e-01 : f32
    %439 = vector.broadcast %cst_291 : f32 to vector<8x128xf32>
    %440 = arith.mulf %439, %438 : vector<8x128xf32>
    %441 = math.tanh %440 : vector<8x128xf32>
    %cst_292 = arith.constant 1.000000e+00 : f32
    %442 = vector.broadcast %cst_292 : f32 to vector<8x128xf32>
    %443 = arith.addf %441, %442 : vector<8x128xf32>
    %cst_293 = arith.constant 5.000000e-01 : f32
    %444 = vector.broadcast %cst_293 : f32 to vector<8x128xf32>
    %445 = arith.mulf %444, %443 : vector<8x128xf32>
    %446 = vector.extract_strided_slice %423 {offsets = [0, 256], sizes = [8, 128], strides = [1, 1]} : vector<8x384xf32> to vector<8x128xf32>
    %447 = vector.extract_strided_slice %425 {offsets = [0, 256], sizes = [8, 128], strides = [1, 1]} : vector<8x384xf32> to vector<8x128xf32>
    %448 = arith.addf %447, %1 : vector<8x128xf32>
    %449 = arith.mulf %435, %448 : vector<8x128xf32>
    %450 = arith.addf %446, %449 : vector<8x128xf32>
    %451 = math.tanh %450 : vector<8x128xf32>
    %452 = arith.subf %363, %451 : vector<8x128xf32>
    %453 = arith.mulf %445, %452 : vector<8x128xf32>
    %454 = arith.addf %451, %453 : vector<8x128xf32>
    %c4_294 = arith.constant 4 : index
    %c0_295 = arith.constant 0 : index
    %c0_296 = arith.constant 0 : index
    %455 = vector.load %arg6[%c4_294, %c0_295, %c0_296] : memref<8x8x128xf32, #tpu.memory_space<vmem>>, vector<1x8x128xf32>
    %456 = vector.shape_cast %455 : vector<1x8x128xf32> to vector<8x128xf32>
    %457 = vector.shape_cast %454 : vector<8x128xf32> to vector<1x8x128xf32>
    tpu.vector_store %arg6[%c4_294, %c0_295, %c0_296], %457 {strides = array<i32>} : memref<8x8x128xf32, #tpu.memory_space<vmem>>, vector<1x8x128xf32>,
    %c0_i32_297 = arith.constant 0 : i32
    %458 = arith.addi %0, %c0_i32_297 : i32
    %459 = arith.index_cast %458 : i32 to index
    %c5_298 = arith.constant 5 : index
    %460 = memref.load %arg1[%459, %c5_298] : memref<8x8xi32, #tpu.memory_space<smem>>
    %461 = arith.index_cast %460 : i32 to index
    %c0_299 = arith.constant 0 : index
    %c0_300 = arith.constant 0 : index
    %462 = vector.load %arg2[%461, %c0_299, %c0_300] : memref<16x1x384xf32, #tpu.memory_space<vmem>>, vector<1x1x384xf32>
    %463 = vector.shape_cast %462 : vector<1x1x384xf32> to vector<1x384xf32>
    %c0_301 = arith.constant 0 : index
    %c0_302 = arith.constant 0 : index
    %464 = vector.load %arg8[%c0_301, %c0_302] : memref<8x384xf32, #tpu.memory_space<vmem>>, vector<1x384xf32>
    tpu.vector_store %arg8[%c0_301, %c0_302], %463 {strides = array<i32>} : memref<8x384xf32, #tpu.memory_space<vmem>>, vector<1x384xf32>,
    %c1_i32_303 = arith.constant 1 : i32
    %465 = arith.addi %0, %c1_i32_303 : i32
    %466 = arith.index_cast %465 : i32 to index
    %c5_304 = arith.constant 5 : index
    %467 = memref.load %arg1[%466, %c5_304] : memref<8x8xi32, #tpu.memory_space<smem>>
    %468 = arith.index_cast %467 : i32 to index
    %c0_305 = arith.constant 0 : index
    %c0_306 = arith.constant 0 : index
    %469 = vector.load %arg2[%468, %c0_305, %c0_306] : memref<16x1x384xf32, #tpu.memory_space<vmem>>, vector<1x1x384xf32>
    %470 = vector.shape_cast %469 : vector<1x1x384xf32> to vector<1x384xf32>
    %c1_307 = arith.constant 1 : index
    %c0_308 = arith.constant 0 : index
    %471 = vector.load %arg8[%c1_307, %c0_308] : memref<8x384xf32, #tpu.memory_space<vmem>>, vector<1x384xf32>
    tpu.vector_store %arg8[%c1_307, %c0_308], %470 {strides = array<i32>} : memref<8x384xf32, #tpu.memory_space<vmem>>, vector<1x384xf32>,
    %c2_i32_309 = arith.constant 2 : i32
    %472 = arith.addi %0, %c2_i32_309 : i32
    %473 = arith.index_cast %472 : i32 to index
    %c5_310 = arith.constant 5 : index
    %474 = memref.load %arg1[%473, %c5_310] : memref<8x8xi32, #tpu.memory_space<smem>>
    %475 = arith.index_cast %474 : i32 to index
    %c0_311 = arith.constant 0 : index
    %c0_312 = arith.constant 0 : index
    %476 = vector.load %arg2[%475, %c0_311, %c0_312] : memref<16x1x384xf32, #tpu.memory_space<vmem>>, vector<1x1x384xf32>
    %477 = vector.shape_cast %476 : vector<1x1x384xf32> to vector<1x384xf32>
    %c2_313 = arith.constant 2 : index
    %c0_314 = arith.constant 0 : index
    %478 = vector.load %arg8[%c2_313, %c0_314] : memref<8x384xf32, #tpu.memory_space<vmem>>, vector<1x384xf32>
    tpu.vector_store %arg8[%c2_313, %c0_314], %477 {strides = array<i32>} : memref<8x384xf32, #tpu.memory_space<vmem>>, vector<1x384xf32>,
    %c3_i32_315 = arith.constant 3 : i32
    %479 = arith.addi %0, %c3_i32_315 : i32
    %480 = arith.index_cast %479 : i32 to index
    %c5_316 = arith.constant 5 : index
    %481 = memref.load %arg1[%480, %c5_316] : memref<8x8xi32, #tpu.memory_space<smem>>
    %482 = arith.index_cast %481 : i32 to index
    %c0_317 = arith.constant 0 : index
    %c0_318 = arith.constant 0 : index
    %483 = vector.load %arg2[%482, %c0_317, %c0_318] : memref<16x1x384xf32, #tpu.memory_space<vmem>>, vector<1x1x384xf32>
    %484 = vector.shape_cast %483 : vector<1x1x384xf32> to vector<1x384xf32>
    %c3_319 = arith.constant 3 : index
    %c0_320 = arith.constant 0 : index
    %485 = vector.load %arg8[%c3_319, %c0_320] : memref<8x384xf32, #tpu.memory_space<vmem>>, vector<1x384xf32>
    tpu.vector_store %arg8[%c3_319, %c0_320], %484 {strides = array<i32>} : memref<8x384xf32, #tpu.memory_space<vmem>>, vector<1x384xf32>,
    %c4_i32_321 = arith.constant 4 : i32
    %486 = arith.addi %0, %c4_i32_321 : i32
    %487 = arith.index_cast %486 : i32 to index
    %c5_322 = arith.constant 5 : index
    %488 = memref.load %arg1[%487, %c5_322] : memref<8x8xi32, #tpu.memory_space<smem>>
    %489 = arith.index_cast %488 : i32 to index
    %c0_323 = arith.constant 0 : index
    %c0_324 = arith.constant 0 : index
    %490 = vector.load %arg2[%489, %c0_323, %c0_324] : memref<16x1x384xf32, #tpu.memory_space<vmem>>, vector<1x1x384xf32>
    %491 = vector.shape_cast %490 : vector<1x1x384xf32> to vector<1x384xf32>
    %c4_325 = arith.constant 4 : index
    %c0_326 = arith.constant 0 : index
    %492 = vector.load %arg8[%c4_325, %c0_326] : memref<8x384xf32, #tpu.memory_space<vmem>>, vector<1x384xf32>
    tpu.vector_store %arg8[%c4_325, %c0_326], %491 {strides = array<i32>} : memref<8x384xf32, #tpu.memory_space<vmem>>, vector<1x384xf32>,
    %c5_i32_327 = arith.constant 5 : i32
    %493 = arith.addi %0, %c5_i32_327 : i32
    %494 = arith.index_cast %493 : i32 to index
    %c5_328 = arith.constant 5 : index
    %495 = memref.load %arg1[%494, %c5_328] : memref<8x8xi32, #tpu.memory_space<smem>>
    %496 = arith.index_cast %495 : i32 to index
    %c0_329 = arith.constant 0 : index
    %c0_330 = arith.constant 0 : index
    %497 = vector.load %arg2[%496, %c0_329, %c0_330] : memref<16x1x384xf32, #tpu.memory_space<vmem>>, vector<1x1x384xf32>
    %498 = vector.shape_cast %497 : vector<1x1x384xf32> to vector<1x384xf32>
    %c5_331 = arith.constant 5 : index
    %c0_332 = arith.constant 0 : index
    %499 = vector.load %arg8[%c5_331, %c0_332] : memref<8x384xf32, #tpu.memory_space<vmem>>, vector<1x384xf32>
    tpu.vector_store %arg8[%c5_331, %c0_332], %498 {strides = array<i32>} : memref<8x384xf32, #tpu.memory_space<vmem>>, vector<1x384xf32>,
    %c6_i32_333 = arith.constant 6 : i32
    %500 = arith.addi %0, %c6_i32_333 : i32
    %501 = arith.index_cast %500 : i32 to index
    %c5_334 = arith.constant 5 : index
    %502 = memref.load %arg1[%501, %c5_334] : memref<8x8xi32, #tpu.memory_space<smem>>
    %503 = arith.index_cast %502 : i32 to index
    %c0_335 = arith.constant 0 : index
    %c0_336 = arith.constant 0 : index
    %504 = vector.load %arg2[%503, %c0_335, %c0_336] : memref<16x1x384xf32, #tpu.memory_space<vmem>>, vector<1x1x384xf32>
    %505 = vector.shape_cast %504 : vector<1x1x384xf32> to vector<1x384xf32>
    %c6_337 = arith.constant 6 : index
    %c0_338 = arith.constant 0 : index
    %506 = vector.load %arg8[%c6_337, %c0_338] : memref<8x384xf32, #tpu.memory_space<vmem>>, vector<1x384xf32>
    tpu.vector_store %arg8[%c6_337, %c0_338], %505 {strides = array<i32>} : memref<8x384xf32, #tpu.memory_space<vmem>>, vector<1x384xf32>,
    %c7_i32_339 = arith.constant 7 : i32
    %507 = arith.addi %0, %c7_i32_339 : i32
    %508 = arith.index_cast %507 : i32 to index
    %c5_340 = arith.constant 5 : index
    %509 = memref.load %arg1[%508, %c5_340] : memref<8x8xi32, #tpu.memory_space<smem>>
    %510 = arith.index_cast %509 : i32 to index
    %c0_341 = arith.constant 0 : index
    %c0_342 = arith.constant 0 : index
    %511 = vector.load %arg2[%510, %c0_341, %c0_342] : memref<16x1x384xf32, #tpu.memory_space<vmem>>, vector<1x1x384xf32>
    %512 = vector.shape_cast %511 : vector<1x1x384xf32> to vector<1x384xf32>
    %c7_343 = arith.constant 7 : index
    %c0_344 = arith.constant 0 : index
    %513 = vector.load %arg8[%c7_343, %c0_344] : memref<8x384xf32, #tpu.memory_space<vmem>>, vector<1x384xf32>
    tpu.vector_store %arg8[%c7_343, %c0_344], %512 {strides = array<i32>} : memref<8x384xf32, #tpu.memory_space<vmem>>, vector<1x384xf32>,
    %c0_345 = arith.constant 0 : index
    %c0_346 = arith.constant 0 : index
    %514 = vector.load %arg8[%c0_345, %c0_346] : memref<8x384xf32, #tpu.memory_space<vmem>>, vector<8x384xf32>
    %c0_347 = arith.constant 0 : index
    %c0_348 = arith.constant 0 : index
    %515 = vector.load %arg3[%c0_347, %c0_348] : memref<128x384xf32, #tpu.memory_space<vmem>>, vector<128x384xf32>
    %cst_349 = arith.constant dense<0.000000e+00> : vector<8x384xf32>
    %516 = tpu.matmul %454, %515, %cst_349 {dimension_numbers = #tpu.dot_dimension_numbers<[1], [0], [0], [1], [0, 0, 1, 1], [], []>} : vector<8x128xf32>, vector<128x384xf32>, vector<8x384xf32> -> vector<8x384xf32>
    %517 = vector.extract_strided_slice %514 {offsets = [0, 0], sizes = [8, 128], strides = [1, 1]} : vector<8x384xf32> to vector<8x128xf32>
    %518 = vector.extract_strided_slice %516 {offsets = [0, 0], sizes = [8, 128], strides = [1, 1]} : vector<8x384xf32> to vector<8x128xf32>
    %519 = arith.addf %517, %518 : vector<8x128xf32>
    %cst_350 = arith.constant 5.000000e-01 : f32
    %520 = vector.broadcast %cst_350 : f32 to vector<8x128xf32>
    %521 = arith.mulf %520, %519 : vector<8x128xf32>
    %522 = math.tanh %521 : vector<8x128xf32>
    %cst_351 = arith.constant 1.000000e+00 : f32
    %523 = vector.broadcast %cst_351 : f32 to vector<8x128xf32>
    %524 = arith.addf %522, %523 : vector<8x128xf32>
    %cst_352 = arith.constant 5.000000e-01 : f32
    %525 = vector.broadcast %cst_352 : f32 to vector<8x128xf32>
    %526 = arith.mulf %525, %524 : vector<8x128xf32>
    %527 = vector.extract_strided_slice %514 {offsets = [0, 128], sizes = [8, 128], strides = [1, 1]} : vector<8x384xf32> to vector<8x128xf32>
    %528 = vector.extract_strided_slice %516 {offsets = [0, 128], sizes = [8, 128], strides = [1, 1]} : vector<8x384xf32> to vector<8x128xf32>
    %529 = arith.addf %527, %528 : vector<8x128xf32>
    %cst_353 = arith.constant 5.000000e-01 : f32
    %530 = vector.broadcast %cst_353 : f32 to vector<8x128xf32>
    %531 = arith.mulf %530, %529 : vector<8x128xf32>
    %532 = math.tanh %531 : vector<8x128xf32>
    %cst_354 = arith.constant 1.000000e+00 : f32
    %533 = vector.broadcast %cst_354 : f32 to vector<8x128xf32>
    %534 = arith.addf %532, %533 : vector<8x128xf32>
    %cst_355 = arith.constant 5.000000e-01 : f32
    %535 = vector.broadcast %cst_355 : f32 to vector<8x128xf32>
    %536 = arith.mulf %535, %534 : vector<8x128xf32>
    %537 = vector.extract_strided_slice %514 {offsets = [0, 256], sizes = [8, 128], strides = [1, 1]} : vector<8x384xf32> to vector<8x128xf32>
    %538 = vector.extract_strided_slice %516 {offsets = [0, 256], sizes = [8, 128], strides = [1, 1]} : vector<8x384xf32> to vector<8x128xf32>
    %539 = arith.addf %538, %1 : vector<8x128xf32>
    %540 = arith.mulf %526, %539 : vector<8x128xf32>
    %541 = arith.addf %537, %540 : vector<8x128xf32>
    %542 = math.tanh %541 : vector<8x128xf32>
    %543 = arith.subf %454, %542 : vector<8x128xf32>
    %544 = arith.mulf %536, %543 : vector<8x128xf32>
    %545 = arith.addf %542, %544 : vector<8x128xf32>
    %c5_356 = arith.constant 5 : index
    %c0_357 = arith.constant 0 : index
    %c0_358 = arith.constant 0 : index
    %546 = vector.load %arg6[%c5_356, %c0_357, %c0_358] : memref<8x8x128xf32, #tpu.memory_space<vmem>>, vector<1x8x128xf32>
    %547 = vector.shape_cast %546 : vector<1x8x128xf32> to vector<8x128xf32>
    %548 = vector.shape_cast %545 : vector<8x128xf32> to vector<1x8x128xf32>
    tpu.vector_store %arg6[%c5_356, %c0_357, %c0_358], %548 {strides = array<i32>} : memref<8x8x128xf32, #tpu.memory_space<vmem>>, vector<1x8x128xf32>,
    %c0_i32_359 = arith.constant 0 : i32
    %549 = arith.addi %0, %c0_i32_359 : i32
    %550 = arith.index_cast %549 : i32 to index
    %c6_360 = arith.constant 6 : index
    %551 = memref.load %arg1[%550, %c6_360] : memref<8x8xi32, #tpu.memory_space<smem>>
    %552 = arith.index_cast %551 : i32 to index
    %c0_361 = arith.constant 0 : index
    %c0_362 = arith.constant 0 : index
    %553 = vector.load %arg2[%552, %c0_361, %c0_362] : memref<16x1x384xf32, #tpu.memory_space<vmem>>, vector<1x1x384xf32>
    %554 = vector.shape_cast %553 : vector<1x1x384xf32> to vector<1x384xf32>
    %c0_363 = arith.constant 0 : index
    %c0_364 = arith.constant 0 : index
    %555 = vector.load %arg8[%c0_363, %c0_364] : memref<8x384xf32, #tpu.memory_space<vmem>>, vector<1x384xf32>
    tpu.vector_store %arg8[%c0_363, %c0_364], %554 {strides = array<i32>} : memref<8x384xf32, #tpu.memory_space<vmem>>, vector<1x384xf32>,
    %c1_i32_365 = arith.constant 1 : i32
    %556 = arith.addi %0, %c1_i32_365 : i32
    %557 = arith.index_cast %556 : i32 to index
    %c6_366 = arith.constant 6 : index
    %558 = memref.load %arg1[%557, %c6_366] : memref<8x8xi32, #tpu.memory_space<smem>>
    %559 = arith.index_cast %558 : i32 to index
    %c0_367 = arith.constant 0 : index
    %c0_368 = arith.constant 0 : index
    %560 = vector.load %arg2[%559, %c0_367, %c0_368] : memref<16x1x384xf32, #tpu.memory_space<vmem>>, vector<1x1x384xf32>
    %561 = vector.shape_cast %560 : vector<1x1x384xf32> to vector<1x384xf32>
    %c1_369 = arith.constant 1 : index
    %c0_370 = arith.constant 0 : index
    %562 = vector.load %arg8[%c1_369, %c0_370] : memref<8x384xf32, #tpu.memory_space<vmem>>, vector<1x384xf32>
    tpu.vector_store %arg8[%c1_369, %c0_370], %561 {strides = array<i32>} : memref<8x384xf32, #tpu.memory_space<vmem>>, vector<1x384xf32>,
    %c2_i32_371 = arith.constant 2 : i32
    %563 = arith.addi %0, %c2_i32_371 : i32
    %564 = arith.index_cast %563 : i32 to index
    %c6_372 = arith.constant 6 : index
    %565 = memref.load %arg1[%564, %c6_372] : memref<8x8xi32, #tpu.memory_space<smem>>
    %566 = arith.index_cast %565 : i32 to index
    %c0_373 = arith.constant 0 : index
    %c0_374 = arith.constant 0 : index
    %567 = vector.load %arg2[%566, %c0_373, %c0_374] : memref<16x1x384xf32, #tpu.memory_space<vmem>>, vector<1x1x384xf32>
    %568 = vector.shape_cast %567 : vector<1x1x384xf32> to vector<1x384xf32>
    %c2_375 = arith.constant 2 : index
    %c0_376 = arith.constant 0 : index
    %569 = vector.load %arg8[%c2_375, %c0_376] : memref<8x384xf32, #tpu.memory_space<vmem>>, vector<1x384xf32>
    tpu.vector_store %arg8[%c2_375, %c0_376], %568 {strides = array<i32>} : memref<8x384xf32, #tpu.memory_space<vmem>>, vector<1x384xf32>,
    %c3_i32_377 = arith.constant 3 : i32
    %570 = arith.addi %0, %c3_i32_377 : i32
    %571 = arith.index_cast %570 : i32 to index
    %c6_378 = arith.constant 6 : index
    %572 = memref.load %arg1[%571, %c6_378] : memref<8x8xi32, #tpu.memory_space<smem>>
    %573 = arith.index_cast %572 : i32 to index
    %c0_379 = arith.constant 0 : index
    %c0_380 = arith.constant 0 : index
    %574 = vector.load %arg2[%573, %c0_379, %c0_380] : memref<16x1x384xf32, #tpu.memory_space<vmem>>, vector<1x1x384xf32>
    %575 = vector.shape_cast %574 : vector<1x1x384xf32> to vector<1x384xf32>
    %c3_381 = arith.constant 3 : index
    %c0_382 = arith.constant 0 : index
    %576 = vector.load %arg8[%c3_381, %c0_382] : memref<8x384xf32, #tpu.memory_space<vmem>>, vector<1x384xf32>
    tpu.vector_store %arg8[%c3_381, %c0_382], %575 {strides = array<i32>} : memref<8x384xf32, #tpu.memory_space<vmem>>, vector<1x384xf32>,
    %c4_i32_383 = arith.constant 4 : i32
    %577 = arith.addi %0, %c4_i32_383 : i32
    %578 = arith.index_cast %577 : i32 to index
    %c6_384 = arith.constant 6 : index
    %579 = memref.load %arg1[%578, %c6_384] : memref<8x8xi32, #tpu.memory_space<smem>>
    %580 = arith.index_cast %579 : i32 to index
    %c0_385 = arith.constant 0 : index
    %c0_386 = arith.constant 0 : index
    %581 = vector.load %arg2[%580, %c0_385, %c0_386] : memref<16x1x384xf32, #tpu.memory_space<vmem>>, vector<1x1x384xf32>
    %582 = vector.shape_cast %581 : vector<1x1x384xf32> to vector<1x384xf32>
    %c4_387 = arith.constant 4 : index
    %c0_388 = arith.constant 0 : index
    %583 = vector.load %arg8[%c4_387, %c0_388] : memref<8x384xf32, #tpu.memory_space<vmem>>, vector<1x384xf32>
    tpu.vector_store %arg8[%c4_387, %c0_388], %582 {strides = array<i32>} : memref<8x384xf32, #tpu.memory_space<vmem>>, vector<1x384xf32>,
    %c5_i32_389 = arith.constant 5 : i32
    %584 = arith.addi %0, %c5_i32_389 : i32
    %585 = arith.index_cast %584 : i32 to index
    %c6_390 = arith.constant 6 : index
    %586 = memref.load %arg1[%585, %c6_390] : memref<8x8xi32, #tpu.memory_space<smem>>
    %587 = arith.index_cast %586 : i32 to index
    %c0_391 = arith.constant 0 : index
    %c0_392 = arith.constant 0 : index
    %588 = vector.load %arg2[%587, %c0_391, %c0_392] : memref<16x1x384xf32, #tpu.memory_space<vmem>>, vector<1x1x384xf32>
    %589 = vector.shape_cast %588 : vector<1x1x384xf32> to vector<1x384xf32>
    %c5_393 = arith.constant 5 : index
    %c0_394 = arith.constant 0 : index
    %590 = vector.load %arg8[%c5_393, %c0_394] : memref<8x384xf32, #tpu.memory_space<vmem>>, vector<1x384xf32>
    tpu.vector_store %arg8[%c5_393, %c0_394], %589 {strides = array<i32>} : memref<8x384xf32, #tpu.memory_space<vmem>>, vector<1x384xf32>,
    %c6_i32_395 = arith.constant 6 : i32
    %591 = arith.addi %0, %c6_i32_395 : i32
    %592 = arith.index_cast %591 : i32 to index
    %c6_396 = arith.constant 6 : index
    %593 = memref.load %arg1[%592, %c6_396] : memref<8x8xi32, #tpu.memory_space<smem>>
    %594 = arith.index_cast %593 : i32 to index
    %c0_397 = arith.constant 0 : index
    %c0_398 = arith.constant 0 : index
    %595 = vector.load %arg2[%594, %c0_397, %c0_398] : memref<16x1x384xf32, #tpu.memory_space<vmem>>, vector<1x1x384xf32>
    %596 = vector.shape_cast %595 : vector<1x1x384xf32> to vector<1x384xf32>
    %c6_399 = arith.constant 6 : index
    %c0_400 = arith.constant 0 : index
    %597 = vector.load %arg8[%c6_399, %c0_400] : memref<8x384xf32, #tpu.memory_space<vmem>>, vector<1x384xf32>
    tpu.vector_store %arg8[%c6_399, %c0_400], %596 {strides = array<i32>} : memref<8x384xf32, #tpu.memory_space<vmem>>, vector<1x384xf32>,
    %c7_i32_401 = arith.constant 7 : i32
    %598 = arith.addi %0, %c7_i32_401 : i32
    %599 = arith.index_cast %598 : i32 to index
    %c6_402 = arith.constant 6 : index
    %600 = memref.load %arg1[%599, %c6_402] : memref<8x8xi32, #tpu.memory_space<smem>>
    %601 = arith.index_cast %600 : i32 to index
    %c0_403 = arith.constant 0 : index
    %c0_404 = arith.constant 0 : index
    %602 = vector.load %arg2[%601, %c0_403, %c0_404] : memref<16x1x384xf32, #tpu.memory_space<vmem>>, vector<1x1x384xf32>
    %603 = vector.shape_cast %602 : vector<1x1x384xf32> to vector<1x384xf32>
    %c7_405 = arith.constant 7 : index
    %c0_406 = arith.constant 0 : index
    %604 = vector.load %arg8[%c7_405, %c0_406] : memref<8x384xf32, #tpu.memory_space<vmem>>, vector<1x384xf32>
    tpu.vector_store %arg8[%c7_405, %c0_406], %603 {strides = array<i32>} : memref<8x384xf32, #tpu.memory_space<vmem>>, vector<1x384xf32>,
    %c0_407 = arith.constant 0 : index
    %c0_408 = arith.constant 0 : index
    %605 = vector.load %arg8[%c0_407, %c0_408] : memref<8x384xf32, #tpu.memory_space<vmem>>, vector<8x384xf32>
    %c0_409 = arith.constant 0 : index
    %c0_410 = arith.constant 0 : index
    %606 = vector.load %arg3[%c0_409, %c0_410] : memref<128x384xf32, #tpu.memory_space<vmem>>, vector<128x384xf32>
    %cst_411 = arith.constant dense<0.000000e+00> : vector<8x384xf32>
    %607 = tpu.matmul %545, %606, %cst_411 {dimension_numbers = #tpu.dot_dimension_numbers<[1], [0], [0], [1], [0, 0, 1, 1], [], []>} : vector<8x128xf32>, vector<128x384xf32>, vector<8x384xf32> -> vector<8x384xf32>
    %608 = vector.extract_strided_slice %605 {offsets = [0, 0], sizes = [8, 128], strides = [1, 1]} : vector<8x384xf32> to vector<8x128xf32>
    %609 = vector.extract_strided_slice %607 {offsets = [0, 0], sizes = [8, 128], strides = [1, 1]} : vector<8x384xf32> to vector<8x128xf32>
    %610 = arith.addf %608, %609 : vector<8x128xf32>
    %cst_412 = arith.constant 5.000000e-01 : f32
    %611 = vector.broadcast %cst_412 : f32 to vector<8x128xf32>
    %612 = arith.mulf %611, %610 : vector<8x128xf32>
    %613 = math.tanh %612 : vector<8x128xf32>
    %cst_413 = arith.constant 1.000000e+00 : f32
    %614 = vector.broadcast %cst_413 : f32 to vector<8x128xf32>
    %615 = arith.addf %613, %614 : vector<8x128xf32>
    %cst_414 = arith.constant 5.000000e-01 : f32
    %616 = vector.broadcast %cst_414 : f32 to vector<8x128xf32>
    %617 = arith.mulf %616, %615 : vector<8x128xf32>
    %618 = vector.extract_strided_slice %605 {offsets = [0, 128], sizes = [8, 128], strides = [1, 1]} : vector<8x384xf32> to vector<8x128xf32>
    %619 = vector.extract_strided_slice %607 {offsets = [0, 128], sizes = [8, 128], strides = [1, 1]} : vector<8x384xf32> to vector<8x128xf32>
    %620 = arith.addf %618, %619 : vector<8x128xf32>
    %cst_415 = arith.constant 5.000000e-01 : f32
    %621 = vector.broadcast %cst_415 : f32 to vector<8x128xf32>
    %622 = arith.mulf %621, %620 : vector<8x128xf32>
    %623 = math.tanh %622 : vector<8x128xf32>
    %cst_416 = arith.constant 1.000000e+00 : f32
    %624 = vector.broadcast %cst_416 : f32 to vector<8x128xf32>
    %625 = arith.addf %623, %624 : vector<8x128xf32>
    %cst_417 = arith.constant 5.000000e-01 : f32
    %626 = vector.broadcast %cst_417 : f32 to vector<8x128xf32>
    %627 = arith.mulf %626, %625 : vector<8x128xf32>
    %628 = vector.extract_strided_slice %605 {offsets = [0, 256], sizes = [8, 128], strides = [1, 1]} : vector<8x384xf32> to vector<8x128xf32>
    %629 = vector.extract_strided_slice %607 {offsets = [0, 256], sizes = [8, 128], strides = [1, 1]} : vector<8x384xf32> to vector<8x128xf32>
    %630 = arith.addf %629, %1 : vector<8x128xf32>
    %631 = arith.mulf %617, %630 : vector<8x128xf32>
    %632 = arith.addf %628, %631 : vector<8x128xf32>
    %633 = math.tanh %632 : vector<8x128xf32>
    %634 = arith.subf %545, %633 : vector<8x128xf32>
    %635 = arith.mulf %627, %634 : vector<8x128xf32>
    %636 = arith.addf %633, %635 : vector<8x128xf32>
    %c6_418 = arith.constant 6 : index
    %c0_419 = arith.constant 0 : index
    %c0_420 = arith.constant 0 : index
    %637 = vector.load %arg6[%c6_418, %c0_419, %c0_420] : memref<8x8x128xf32, #tpu.memory_space<vmem>>, vector<1x8x128xf32>
    %638 = vector.shape_cast %637 : vector<1x8x128xf32> to vector<8x128xf32>
    %639 = vector.shape_cast %636 : vector<8x128xf32> to vector<1x8x128xf32>
    tpu.vector_store %arg6[%c6_418, %c0_419, %c0_420], %639 {strides = array<i32>} : memref<8x8x128xf32, #tpu.memory_space<vmem>>, vector<1x8x128xf32>,
    %c0_i32_421 = arith.constant 0 : i32
    %640 = arith.addi %0, %c0_i32_421 : i32
    %641 = arith.index_cast %640 : i32 to index
    %c7_422 = arith.constant 7 : index
    %642 = memref.load %arg1[%641, %c7_422] : memref<8x8xi32, #tpu.memory_space<smem>>
    %643 = arith.index_cast %642 : i32 to index
    %c0_423 = arith.constant 0 : index
    %c0_424 = arith.constant 0 : index
    %644 = vector.load %arg2[%643, %c0_423, %c0_424] : memref<16x1x384xf32, #tpu.memory_space<vmem>>, vector<1x1x384xf32>
    %645 = vector.shape_cast %644 : vector<1x1x384xf32> to vector<1x384xf32>
    %c0_425 = arith.constant 0 : index
    %c0_426 = arith.constant 0 : index
    %646 = vector.load %arg8[%c0_425, %c0_426] : memref<8x384xf32, #tpu.memory_space<vmem>>, vector<1x384xf32>
    tpu.vector_store %arg8[%c0_425, %c0_426], %645 {strides = array<i32>} : memref<8x384xf32, #tpu.memory_space<vmem>>, vector<1x384xf32>,
    %c1_i32_427 = arith.constant 1 : i32
    %647 = arith.addi %0, %c1_i32_427 : i32
    %648 = arith.index_cast %647 : i32 to index
    %c7_428 = arith.constant 7 : index
    %649 = memref.load %arg1[%648, %c7_428] : memref<8x8xi32, #tpu.memory_space<smem>>
    %650 = arith.index_cast %649 : i32 to index
    %c0_429 = arith.constant 0 : index
    %c0_430 = arith.constant 0 : index
    %651 = vector.load %arg2[%650, %c0_429, %c0_430] : memref<16x1x384xf32, #tpu.memory_space<vmem>>, vector<1x1x384xf32>
    %652 = vector.shape_cast %651 : vector<1x1x384xf32> to vector<1x384xf32>
    %c1_431 = arith.constant 1 : index
    %c0_432 = arith.constant 0 : index
    %653 = vector.load %arg8[%c1_431, %c0_432] : memref<8x384xf32, #tpu.memory_space<vmem>>, vector<1x384xf32>
    tpu.vector_store %arg8[%c1_431, %c0_432], %652 {strides = array<i32>} : memref<8x384xf32, #tpu.memory_space<vmem>>, vector<1x384xf32>,
    %c2_i32_433 = arith.constant 2 : i32
    %654 = arith.addi %0, %c2_i32_433 : i32
    %655 = arith.index_cast %654 : i32 to index
    %c7_434 = arith.constant 7 : index
    %656 = memref.load %arg1[%655, %c7_434] : memref<8x8xi32, #tpu.memory_space<smem>>
    %657 = arith.index_cast %656 : i32 to index
    %c0_435 = arith.constant 0 : index
    %c0_436 = arith.constant 0 : index
    %658 = vector.load %arg2[%657, %c0_435, %c0_436] : memref<16x1x384xf32, #tpu.memory_space<vmem>>, vector<1x1x384xf32>
    %659 = vector.shape_cast %658 : vector<1x1x384xf32> to vector<1x384xf32>
    %c2_437 = arith.constant 2 : index
    %c0_438 = arith.constant 0 : index
    %660 = vector.load %arg8[%c2_437, %c0_438] : memref<8x384xf32, #tpu.memory_space<vmem>>, vector<1x384xf32>
    tpu.vector_store %arg8[%c2_437, %c0_438], %659 {strides = array<i32>} : memref<8x384xf32, #tpu.memory_space<vmem>>, vector<1x384xf32>,
    %c3_i32_439 = arith.constant 3 : i32
    %661 = arith.addi %0, %c3_i32_439 : i32
    %662 = arith.index_cast %661 : i32 to index
    %c7_440 = arith.constant 7 : index
    %663 = memref.load %arg1[%662, %c7_440] : memref<8x8xi32, #tpu.memory_space<smem>>
    %664 = arith.index_cast %663 : i32 to index
    %c0_441 = arith.constant 0 : index
    %c0_442 = arith.constant 0 : index
    %665 = vector.load %arg2[%664, %c0_441, %c0_442] : memref<16x1x384xf32, #tpu.memory_space<vmem>>, vector<1x1x384xf32>
    %666 = vector.shape_cast %665 : vector<1x1x384xf32> to vector<1x384xf32>
    %c3_443 = arith.constant 3 : index
    %c0_444 = arith.constant 0 : index
    %667 = vector.load %arg8[%c3_443, %c0_444] : memref<8x384xf32, #tpu.memory_space<vmem>>, vector<1x384xf32>
    tpu.vector_store %arg8[%c3_443, %c0_444], %666 {strides = array<i32>} : memref<8x384xf32, #tpu.memory_space<vmem>>, vector<1x384xf32>,
    %c4_i32_445 = arith.constant 4 : i32
    %668 = arith.addi %0, %c4_i32_445 : i32
    %669 = arith.index_cast %668 : i32 to index
    %c7_446 = arith.constant 7 : index
    %670 = memref.load %arg1[%669, %c7_446] : memref<8x8xi32, #tpu.memory_space<smem>>
    %671 = arith.index_cast %670 : i32 to index
    %c0_447 = arith.constant 0 : index
    %c0_448 = arith.constant 0 : index
    %672 = vector.load %arg2[%671, %c0_447, %c0_448] : memref<16x1x384xf32, #tpu.memory_space<vmem>>, vector<1x1x384xf32>
    %673 = vector.shape_cast %672 : vector<1x1x384xf32> to vector<1x384xf32>
    %c4_449 = arith.constant 4 : index
    %c0_450 = arith.constant 0 : index
    %674 = vector.load %arg8[%c4_449, %c0_450] : memref<8x384xf32, #tpu.memory_space<vmem>>, vector<1x384xf32>
    tpu.vector_store %arg8[%c4_449, %c0_450], %673 {strides = array<i32>} : memref<8x384xf32, #tpu.memory_space<vmem>>, vector<1x384xf32>,
    %c5_i32_451 = arith.constant 5 : i32
    %675 = arith.addi %0, %c5_i32_451 : i32
    %676 = arith.index_cast %675 : i32 to index
    %c7_452 = arith.constant 7 : index
    %677 = memref.load %arg1[%676, %c7_452] : memref<8x8xi32, #tpu.memory_space<smem>>
    %678 = arith.index_cast %677 : i32 to index
    %c0_453 = arith.constant 0 : index
    %c0_454 = arith.constant 0 : index
    %679 = vector.load %arg2[%678, %c0_453, %c0_454] : memref<16x1x384xf32, #tpu.memory_space<vmem>>, vector<1x1x384xf32>
    %680 = vector.shape_cast %679 : vector<1x1x384xf32> to vector<1x384xf32>
    %c5_455 = arith.constant 5 : index
    %c0_456 = arith.constant 0 : index
    %681 = vector.load %arg8[%c5_455, %c0_456] : memref<8x384xf32, #tpu.memory_space<vmem>>, vector<1x384xf32>
    tpu.vector_store %arg8[%c5_455, %c0_456], %680 {strides = array<i32>} : memref<8x384xf32, #tpu.memory_space<vmem>>, vector<1x384xf32>,
    %c6_i32_457 = arith.constant 6 : i32
    %682 = arith.addi %0, %c6_i32_457 : i32
    %683 = arith.index_cast %682 : i32 to index
    %c7_458 = arith.constant 7 : index
    %684 = memref.load %arg1[%683, %c7_458] : memref<8x8xi32, #tpu.memory_space<smem>>
    %685 = arith.index_cast %684 : i32 to index
    %c0_459 = arith.constant 0 : index
    %c0_460 = arith.constant 0 : index
    %686 = vector.load %arg2[%685, %c0_459, %c0_460] : memref<16x1x384xf32, #tpu.memory_space<vmem>>, vector<1x1x384xf32>
    %687 = vector.shape_cast %686 : vector<1x1x384xf32> to vector<1x384xf32>
    %c6_461 = arith.constant 6 : index
    %c0_462 = arith.constant 0 : index
    %688 = vector.load %arg8[%c6_461, %c0_462] : memref<8x384xf32, #tpu.memory_space<vmem>>, vector<1x384xf32>
    tpu.vector_store %arg8[%c6_461, %c0_462], %687 {strides = array<i32>} : memref<8x384xf32, #tpu.memory_space<vmem>>, vector<1x384xf32>,
    %c7_i32_463 = arith.constant 7 : i32
    %689 = arith.addi %0, %c7_i32_463 : i32
    %690 = arith.index_cast %689 : i32 to index
    %c7_464 = arith.constant 7 : index
    %691 = memref.load %arg1[%690, %c7_464] : memref<8x8xi32, #tpu.memory_space<smem>>
    %692 = arith.index_cast %691 : i32 to index
    %c0_465 = arith.constant 0 : index
    %c0_466 = arith.constant 0 : index
    %693 = vector.load %arg2[%692, %c0_465, %c0_466] : memref<16x1x384xf32, #tpu.memory_space<vmem>>, vector<1x1x384xf32>
    %694 = vector.shape_cast %693 : vector<1x1x384xf32> to vector<1x384xf32>
    %c7_467 = arith.constant 7 : index
    %c0_468 = arith.constant 0 : index
    %695 = vector.load %arg8[%c7_467, %c0_468] : memref<8x384xf32, #tpu.memory_space<vmem>>, vector<1x384xf32>
    tpu.vector_store %arg8[%c7_467, %c0_468], %694 {strides = array<i32>} : memref<8x384xf32, #tpu.memory_space<vmem>>, vector<1x384xf32>,
    %c0_469 = arith.constant 0 : index
    %c0_470 = arith.constant 0 : index
    %696 = vector.load %arg8[%c0_469, %c0_470] : memref<8x384xf32, #tpu.memory_space<vmem>>, vector<8x384xf32>
    %c0_471 = arith.constant 0 : index
    %c0_472 = arith.constant 0 : index
    %697 = vector.load %arg3[%c0_471, %c0_472] : memref<128x384xf32, #tpu.memory_space<vmem>>, vector<128x384xf32>
    %cst_473 = arith.constant dense<0.000000e+00> : vector<8x384xf32>
    %698 = tpu.matmul %636, %697, %cst_473 {dimension_numbers = #tpu.dot_dimension_numbers<[1], [0], [0], [1], [0, 0, 1, 1], [], []>} : vector<8x128xf32>, vector<128x384xf32>, vector<8x384xf32> -> vector<8x384xf32>
    %699 = vector.extract_strided_slice %696 {offsets = [0, 0], sizes = [8, 128], strides = [1, 1]} : vector<8x384xf32> to vector<8x128xf32>
    %700 = vector.extract_strided_slice %698 {offsets = [0, 0], sizes = [8, 128], strides = [1, 1]} : vector<8x384xf32> to vector<8x128xf32>
    %701 = arith.addf %699, %700 : vector<8x128xf32>
    %cst_474 = arith.constant 5.000000e-01 : f32
    %702 = vector.broadcast %cst_474 : f32 to vector<8x128xf32>
    %703 = arith.mulf %702, %701 : vector<8x128xf32>
    %704 = math.tanh %703 : vector<8x128xf32>
    %cst_475 = arith.constant 1.000000e+00 : f32
    %705 = vector.broadcast %cst_475 : f32 to vector<8x128xf32>
    %706 = arith.addf %704, %705 : vector<8x128xf32>
    %cst_476 = arith.constant 5.000000e-01 : f32
    %707 = vector.broadcast %cst_476 : f32 to vector<8x128xf32>
    %708 = arith.mulf %707, %706 : vector<8x128xf32>
    %709 = vector.extract_strided_slice %696 {offsets = [0, 128], sizes = [8, 128], strides = [1, 1]} : vector<8x384xf32> to vector<8x128xf32>
    %710 = vector.extract_strided_slice %698 {offsets = [0, 128], sizes = [8, 128], strides = [1, 1]} : vector<8x384xf32> to vector<8x128xf32>
    %711 = arith.addf %709, %710 : vector<8x128xf32>
    %cst_477 = arith.constant 5.000000e-01 : f32
    %712 = vector.broadcast %cst_477 : f32 to vector<8x128xf32>
    %713 = arith.mulf %712, %711 : vector<8x128xf32>
    %714 = math.tanh %713 : vector<8x128xf32>
    %cst_478 = arith.constant 1.000000e+00 : f32
    %715 = vector.broadcast %cst_478 : f32 to vector<8x128xf32>
    %716 = arith.addf %714, %715 : vector<8x128xf32>
    %cst_479 = arith.constant 5.000000e-01 : f32
    %717 = vector.broadcast %cst_479 : f32 to vector<8x128xf32>
    %718 = arith.mulf %717, %716 : vector<8x128xf32>
    %719 = vector.extract_strided_slice %696 {offsets = [0, 256], sizes = [8, 128], strides = [1, 1]} : vector<8x384xf32> to vector<8x128xf32>
    %720 = vector.extract_strided_slice %698 {offsets = [0, 256], sizes = [8, 128], strides = [1, 1]} : vector<8x384xf32> to vector<8x128xf32>
    %721 = arith.addf %720, %1 : vector<8x128xf32>
    %722 = arith.mulf %708, %721 : vector<8x128xf32>
    %723 = arith.addf %719, %722 : vector<8x128xf32>
    %724 = math.tanh %723 : vector<8x128xf32>
    %725 = arith.subf %636, %724 : vector<8x128xf32>
    %726 = arith.mulf %718, %725 : vector<8x128xf32>
    %727 = arith.addf %724, %726 : vector<8x128xf32>
    %c7_480 = arith.constant 7 : index
    %c0_481 = arith.constant 0 : index
    %c0_482 = arith.constant 0 : index
    %728 = vector.load %arg6[%c7_480, %c0_481, %c0_482] : memref<8x8x128xf32, #tpu.memory_space<vmem>>, vector<1x8x128xf32>
    %729 = vector.shape_cast %728 : vector<1x8x128xf32> to vector<8x128xf32>
    %730 = vector.shape_cast %727 : vector<8x128xf32> to vector<1x8x128xf32>
    tpu.vector_store %arg6[%c7_480, %c0_481, %c0_482], %730 {strides = array<i32>} : memref<8x8x128xf32, #tpu.memory_space<vmem>>, vector<1x8x128xf32>,
    %c0_483 = arith.constant 0 : index
    %c0_484 = arith.constant 0 : index
    %731 = vector.load %arg7[%c0_483, %c0_484] : memref<8x128xf32, #tpu.memory_space<vmem>>, vector<8x128xf32>
    tpu.vector_store %arg7[%c0_483, %c0_484], %727 {strides = array<i32>} : memref<8x128xf32, #tpu.memory_space<vmem>>, vector<8x128xf32>,
    return
  }
  func.func @transform_0(%arg0: i32, %arg1: memref<8x8xi32, #tpu.memory_space<smem>>) -> (i32, i32, i32) {
    %c0_i32 = arith.constant 0 : i32
    %c0_i32_0 = arith.constant 0 : i32
    %c0_i32_1 = arith.constant 0 : i32
    %c0_i32_2 = arith.constant 0 : i32
    return %c0_i32, %c0_i32_0, %c0_i32_1 : i32, i32, i32
  }
  func.func @transform_1(%arg0: i32, %arg1: memref<8x8xi32, #tpu.memory_space<smem>>) -> (i32, i32) {
    %c0_i32 = arith.constant 0 : i32
    %c0_i32_0 = arith.constant 0 : i32
    %c0_i32_1 = arith.constant 0 : i32
    return %c0_i32, %c0_i32_0 : i32, i32
  }
  func.func @transform_2(%arg0: i32, %arg1: memref<8x8xi32, #tpu.memory_space<smem>>) -> (i32, i32) {
    %c0_i32 = arith.constant 0 : i32
    %c0_i32_0 = arith.constant 0 : i32
    %c0_i32_1 = arith.constant 0 : i32
    return %c0_i32, %c0_i32_0 : i32, i32
  }
  func.func @transform_3(%arg0: i32, %arg1: memref<8x8xi32, #tpu.memory_space<smem>>) -> (i32, i32) {
    %c0_i32 = arith.constant 0 : i32
    %c0_i32_0 = arith.constant 0 : i32
    return %arg0, %c0_i32 : i32, i32
  }
  func.func @transform_4(%arg0: i32, %arg1: memref<8x8xi32, #tpu.memory_space<smem>>) -> (i32, i32, i32) {
    %c0_i32 = arith.constant 0 : i32
    %c0_i32_0 = arith.constant 0 : i32
    %c0_i32_1 = arith.constant 0 : i32
    return %c0_i32, %arg0, %c0_i32_0 : i32, i32, i32
  }
  func.func @transform_5(%arg0: i32, %arg1: memref<8x8xi32, #tpu.memory_space<smem>>) -> (i32, i32) {
    %c0_i32 = arith.constant 0 : i32
    %c0_i32_0 = arith.constant 0 : i32
    return %arg0, %c0_i32 : i32, i32
  }
}

</mosaic_0001>

<bundles_post_ra>
// kernel: reward_network_rnn_forward.1
= control target key start
LH: loop header
LB: loop body
LE: loop exit
PB: predicated region body
PF: predicated region fallthrough
CT: control target
= control target key end

     0   :  { %s4128_s0 = inlined_call_operand.vmem [shape: s32[8,8], index: 0, kind: input, shape index: {}]   ;;  %s4129_s1 = inlined_call_operand.hbm [shape: f32[16,1,384], index: 1, kind: input, shape index: {}]   ;;  %s4130_s2 = inlined_call_operand.hbm [shape: f32[128,384], index: 2, kind: input, shape index: {}]   ;;  %s4131_s3 = inlined_call_operand.vmem [shape: f32[8,128], index: 3, kind: input, shape index: {}]   ;;  %s4132_s4 = inlined_call_operand.vmem [shape: f32[8,128], index: 4, kind: input, shape index: {}]   ;;  %s4133_s5 = inlined_call_operand.vmem [shape: f32[8,8,128], index: 5, kind: output, shape index: {0}]   ;;  %s4134_s6 = inlined_call_operand.vmem [shape: f32[8,128], index: 6, kind: output, shape index: {1}]  }
   0x1   :  { %s12_s23 = sshll.u32 %s4128_s0, 4  ;;  %s13_s23 = int_to_ptr.vmem [resolvable:$true] %s12_s23 }
   0x2   :  { %s2893_s24 = scalar_lea.vmem %s13_s23, 128  ;;  %p2898_p1 = scmp.lt.s32.totalorder %s13_s23, %s13_s23 }
   0x3   :  { %p2894_p0 = scmp.ne.s32.totalorder %s13_s23, %s2893_s24  ;;  %p2899_p2 = scmp.lt.s32.totalorder %s2893_s24, %s2893_s24 }
   0x5   :  { %p2900_p3 = por %p2899_p2, %p2898_p1 }
   0x7   :  { %p2901_p4 = pnand %p2900_p3, %p2894_p0 }
   0x9   :  { %2904 = shalt.err (!%p2901_p4)  }
   0xa   :  { %s2951_s25 = smov [#allocation4]  }
   0xb   :  { %15 = dma.vmem_to_smem %s13_s23, 128, %s2951_s25, [#allocation3] }
   0xc   :  { %2945 = dma.done.wait [#allocation3], 128 }
   0xd   :  { %2946 = vsyncadd [#allocation3], 4294967168 }
   0xe   :  { %17 = sfence }
   0xf   :  { %18 = vsyncpa [#allocation6], 0 }
  0x10   :  { %19 = vsyncpa [#allocation8], 0  ;;  %s2952_s26 = smov [#allocation5]  }
  0x11   :  { %s25_s27 = sshll.u32 %s2952_s26, 4  ;;  %s26_s27 = int_to_ptr.vmem [resolvable:$true] %s25_s27 }
  0x12   :  { %s2913_s28 = scalar_lea.vmem %s26_s27, 768  ;;  %p2918_p6 = scmp.lt.s32.totalorder %s26_s27, %s26_s27 }
  0x13   :  { %p2914_p5 = scmp.ne.s32.totalorder %s26_s27, %s2913_s28  ;;  %p2919_p7 = scmp.lt.s32.totalorder %s2913_s28, %s2913_s28 }
  0x15   :  { %p2920_p8 = por %p2919_p7, %p2918_p6 }
  0x17   :  { %p2921_p9 = pnand %p2920_p8, %p2914_p5 }
  0x19   :  { %2924 = shalt.err (!%p2921_p9)
}
  0x1a   :  { %s2953_s0 = smov 48   ;;  %s2954_s29 = smov 3  }
  0x1b   :  { %31 = dma.hbm_to_vmem [thread:$0]  %s4129_s1, 768, %s26_s27, [#allocation6], %s2953_s0, %s2953_s0, %s2954_s29  }
  0x1c   :  { %s2955_s8 = smov [#allocation7]  }
  0x1d   :  { %s37_s9 = sshll.u32 %s2955_s8, 4  ;;  %s38_s9 = int_to_ptr.vmem [resolvable:$true] %s37_s9 }
  0x1e   :  { %s2933_s10 = scalar_lea.vmem %s38_s9, 6144  ;;  %p2938_p11 = scmp.lt.s32.totalorder %s38_s9, %s38_s9 }
  0x1f   :  { %p2934_p10 = scmp.ne.s32.totalorder %s38_s9, %s2933_s10  ;;  %p2939_p12 = scmp.lt.s32.totalorder %s2933_s10, %s2933_s10 }
  0x21   :  { %p2940_p13 = por %p2939_p12, %p2938_p11 }
  0x23   :  { %p2941_p0 = pnand %p2940_p13, %p2934_p10 }
  0x25   :  { %2944 = shalt.err (!%p2941_p0)
}
  0x26   :  { %s2956_s11 = smov 384   ;;  %s2957_s12 = smov 24  }
  0x27   :  { %43 = dma.hbm_to_vmem [thread:$0]  %s4130_s2, 6144, %s38_s9, [#allocation8], %s2956_s11, %s2956_s11, %s2957_s12  }
  0x28   :  { %2947 = dma.done.wait [#allocation6], 768  }
  0x29   :  { %2948 = vsyncadd [#allocation6], 4294966528 }
  0x2a   :  { %2949 = dma.done.wait [#allocation8], 6144  }
  0x2b   :  { %2950 = vsyncadd [#allocation8], 4294961152  ;;  %v4135_v0 = vmov 0.0   ;;  %vm2959_vm0 = vmmov 0   ;;  %s3008_s1 = sld [smem:[#allocation4]]  ;;  %v3016_v1 = vld [vmem:[#allocation7 + $0x170] sm:$0xff]  ;;  %v62_v18 = vlaneseq }
  0x2c   :  { %2555 = vmatprep.subr.mxu1 %v4135_v0  ;;  %246 = vmatprep.mubr.f32.mxu0 %v4135_v0  ;;  %s3010_s15 = sld [smem:[#allocation4 + $0x80]]  ;;  %v3018_v2 = vld [vmem:[#allocation7 + $0x168] sm:$0xff]  ;;  %v3020_v3 = vld [vmem:[#allocation7 + $0x158] sm:$0xff]  ;;  %v3025_v4 = vld [vmem:[#allocation7 + $0x150] sm:$0xff]  ;;  %v4150_v26 = vmov 0 }
  0x2d   :  { %2587 = vmatprep.mubr.msk.f32.mxu1 %vm2959_vm0, %v4135_v0  ;;  %s3012_s16 = sld [smem:[#allocation4 + $0x100]]  ;;  %182 = vmatprep.subr.mxu0 %v3016_v1  ;;  %v3030_v5 = vld [vmem:[#allocation7 + $0x140] sm:$0xff]  ;;  %v3035_v6 = vld [vmem:[#allocation7 + $0x138] sm:$0xff]  ;;  %v3040_v7 = vld [vmem:[#allocation7 + $0x128] sm:$0xff]  ;;  %vm3102_vm1 = vcmp.lt.s32.totalorder %v62_v18, 384 }
  0x2e   :  { %s3014_s2 = sld [smem:[#allocation4 + $0x180]]  ;;  %183 = vmatpush1.msra.mxu0 %v3018_v2  ;;  %v3044_v8 = vld [vmem:[#allocation7 + $0x120] sm:$0xff]  ;;  %v3048_v9 = vld [vmem:[#allocation7 + $0x110] sm:$0xff]  ;;  %v3050_v10 = vld [vmem:[#allocation7 + $0x178] sm:$0xff]  ;;  %v4151_v26 = vsel %vm3102_vm1, 4294967295, %v4150_v26 }
  0x2f   :  { %s3022_s17 = sld [smem:[#allocation4 + $0x200]]  ;;  %184 = vmatprep.subr.mxu0 %v3020_v3  ;;  %v3054_v11 = vld [vmem:[#allocation7 + $0x108] sm:$0xff]  ;;  %2556 = vmatpush3.msra.mxu1 %v3050_v10  ;;  %v3057_v12 = vld [vmem:[#allocation7 + $0x160] sm:$0xff]  ;;  %v3061_v13 = vld [vmem:[#allocation7 + $0xf8] sm:$0xff]  ;;  %4152 = vst [vmem:[#allocation12_spill] sm:$0xff] %v4151_v26 }
  0x30   :  { %s3027_s18 = sld [smem:[#allocation4 + $0x280]]  ;;  %185 = vmatpush1.msra.mxu0 %v3025_v4  ;;  %2557 = vmatprep.subr.mxu1 %v4135_v0  ;;  %v3064_v14 = vld [vmem:[#allocation7 + $0x148] sm:$0xff]  ;;  %v3068_v15 = vld [vmem:[#allocation7 + $0xf0] sm:$0xff]  ;;  %v3073_v16 = vld [vmem:[#allocation7 + $0xe0] sm:$0xff] }
  0x31   :  { %s3032_s19 = sld [smem:[#allocation4 + $0x300]]  ;;  %s59_s21 = smul.u32 3, %s3008_s1  ;;  %186 = vmatprep.subr.mxu0 %v3030_v5  ;;  %2558 = vmatpush3.msra.mxu1 %v3057_v12  ;;  %v3076_v17 = vld [vmem:[#allocation7 + $0x130] sm:$0xff]  ;;  %v3080_v19 = vld [vmem:[#allocation7 + $0xd8] sm:$0xff]  ;;  %v3085_v20 = vld [vmem:[#allocation7 + $0xc8] sm:$0xff] }
  0x32   :  { %s3037_s20 = sld [smem:[#allocation4 + $0x380]]  ;;  %s71_s22 = smul.u32 3, %s3010_s15  ;;  %187 = vmatpush1.msra.mxu0 %v3035_v6  ;;  %2559 = vmatprep.subr.mxu1 %v4135_v0  ;;  %v3088_v21 = vld [vmem:[#allocation7 + $0x118] sm:$0xff]  ;;  %v3091_v22 = vld [vmem:[#allocation7 + $0xc0] sm:$0xff]  ;;  %v3095_v23 = vld [vmem:[#allocation7 + $0xb0] sm:$0xff] }
  0x33   :  { %s80_s23 = smul.u32 3, %s3012_s16  ;;  %188 = vmatprep.subr.mxu0 %v3040_v7  ;;  %2560 = vmatpush3.msra.mxu1 %v3064_v14  ;;  %v3097_v24 = vld [vmem:[#allocation7 + $0xa8] sm:$0xff]  ;;  %v3100_v25 = vld [vmem:[#allocation7 + $0x100] sm:$0xff]  ;;  %v3107_v27 = vld [vmem:[#allocation7 + $0x98] sm:$0xff]  ;;  %s60_s0 = scalar_lea.vmem [#allocation5], %s59_s21 }
  0x34   :  { %s89_s24 = smul.u32 3, %s3014_s2  ;;  %189 = vmatpush1.msra.mxu0 %v3044_v8  ;;  %2561 = vmatprep.subr.mxu1 %v4135_v0  ;;  %v3109_v28 = vld [vmem:[#allocation7 + $0x90] sm:$0xff]  ;;  %v3112_v29 = vld [vmem:[#allocation7 + $0xe8] sm:$0xff]  ;;  %v3115_v30 = vld [vmem:[#allocation7 + $0x80] sm:$0xff]  ;;  %s72_s29 = scalar_lea.vmem [#allocation5], %s71_s22 }
  0x35   :  { %s98_s25 = smul.u32 3, %s3022_s17  ;;  %190 = vmatprep.subr.mxu0 %v3048_v9  ;;  %2562 = vmatpush3.msra.mxu1 %v3076_v17  ;;  %v3118_v31 = vld [vmem:[#allocation7 + $0xd0] sm:$0xff]  ;;  %v61_v32 = vld [vmem:[%s60_s0] sm:$0x7]  ;;  %s81_s30 = scalar_lea.vmem [#allocation5], %s80_s23  ;;  %v3161_v41 = vld [vmem:[#allocation7 + $0x68] sm:$0xff] }
  0x36   :  { %s107_s26 = smul.u32 3, %s3027_s18  ;;  %191 = vmatpush1.msra.mxu0 %v3054_v11  ;;  %2563 = vmatprep.subr.mxu1 %v4135_v0  ;;  %v73_v33 = vld [vmem:[%s72_s29] sm:$0x7]  ;;  %66 = vst.msk [vmem:[#allocation2] ss:$8 sm:$0x7] %vm3102_vm1, %v61_v32 }
  0x37   :  { %s116_s27 = smul.u32 3, %s3032_s19  ;;  %192 = vmatprep.subr.mxu0 %v3061_v13  ;;  %2564 = vmatpush3.msra.mxu1 %v3088_v21  ;;  %75 = vst.msk [vmem:[#allocation2 + $0x1] ss:$8 sm:$0x7] %vm3102_vm1, %v73_v33  ;;  %v82_v34 = vld [vmem:[%s81_s30] sm:$0x7] }
  0x38   :  { %s125_s28 = smul.u32 3, %s3037_s20  ;;  %193 = vmatpush1.msra.mxu0 %v3068_v15  ;;  %2565 = vmatprep.subr.mxu1 %v4135_v0  ;;  %s90_s7 = scalar_lea.vmem [#allocation5], %s89_s24  ;;  %84 = vst.msk [vmem:[#allocation2 + $0x2] ss:$8 sm:$0x7] %vm3102_vm1, %v82_v34  ;;  %v3151_v40 = vld [vmem:[#allocation7 + $0x78] sm:$0xff] }
  0x39   :  { %194 = vmatprep.subr.mxu0 %v3073_v16  ;;  %2566 = vmatpush3.msra.mxu1 %v3100_v25  ;;  %v91_v35 = vld [vmem:[%s90_s7] sm:$0x7]  ;;  %s99_s8 = scalar_lea.vmem [#allocation5], %s98_s25  ;;  %s108_s9 = scalar_lea.vmem [#allocation5], %s107_s26  ;;  %v3167_v43 = vld [vmem:[#allocation7 + $0x60] sm:$0xff]  ;;  %v3171_v44 = vld [vmem:[#allocation7 + $0x50] sm:$0xff] }
  0x3a   :  { %195 = vmatpush1.msra.mxu0 %v3080_v19  ;;  %v100_v36 = vld [vmem:[%s99_s8] sm:$0x7]  ;;  %2567 = vmatprep.subr.mxu1 %v4135_v0  ;;  %93 = vst.msk [vmem:[#allocation2 + $0x3] ss:$8 sm:$0x7] %vm3102_vm1, %v91_v35  ;;  %s117_s10 = scalar_lea.vmem [#allocation5], %s116_s27 }
  0x3b   :  { %196 = vmatprep.subr.mxu0 %v3085_v20  ;;  %102 = vst.msk [vmem:[#allocation2 + $0x4] ss:$8 sm:$0x7] %vm3102_vm1, %v100_v36  ;;  %v109_v37 = vld [vmem:[%s108_s9] sm:$0x7]  ;;  %s126_s11 = scalar_lea.vmem [#allocation5], %s125_s28  ;;  %2568 = vmatpush3.msra.mxu1 %v3112_v29 }
  0x3c   :  { %197 = vmatpush1.msra.mxu0 %v3091_v22  ;;  %v118_v38 = vld [vmem:[%s117_s10] sm:$0x7]  ;;  %111 = vst.msk [vmem:[#allocation2 + $0x5] ss:$8 sm:$0x7] %vm3102_vm1, %v109_v37  ;;  %2569 = vmatprep.subr.mxu1 %v4135_v0  ;;  %v3174_v45 = vld [vmem:[#allocation7 + $0xa0] sm:$0xff] }
  0x3d   :  { %198 = vmatprep.subr.mxu0 %v3095_v23  ;;  %v127_v39 = vld [vmem:[%s126_s11] sm:$0x7]  ;;  %120 = vst.msk [vmem:[#allocation2 + $0x6] ss:$8 sm:$0x7] %vm3102_vm1, %v118_v38  ;;  %2570 = vmatpush3.msra.mxu1 %v3118_v31  ;;  %v3177_v46 = vld [vmem:[#allocation7 + $0x48] sm:$0xff] }
  0x3e   :  { %199 = vmatpush1.msra.mxu0 %v3097_v24  ;;  %129 = vst.msk [vmem:[#allocation2 + $0x7] ss:$8 sm:$0x7] %vm3102_vm1, %v127_v39  ;;  %v3164_v42 = vld [vmem:[#allocation7 + $0xb8] sm:$0xff]  ;;  %2571 = vmatprep.subr.mxu1 %v4135_v0  ;;  %v3184_v48 = vld [vmem:[#allocation7 + $0x88] sm:$0xff]  ;;  %v3187_v49 = vld [vmem:[#allocation7 + $0x30] sm:$0xff] }
  0x3f   :  { %200 = vmatprep.subr.mxu0 %v3107_v27  ;;  %2572 = vmatpush3.msra.mxu1 %v3164_v42  ;;  %v3181_v47 = vld [vmem:[#allocation7 + $0x38] sm:$0xff]  ;;  %v3191_v50 = vld [vmem:[#allocation7 + $0x20] sm:$0xff]  ;;  %v3194_v51 = vld [vmem:[#allocation7 + $0x70] sm:$0xff]  ;;  %s2357_s14 = sld [smem:[#allocation4 + $0x81]] }
  0x40   :  { %201 = vmatpush1.msra.mxu0 %v3109_v28  ;;  %2573 = vmatprep.subr.mxu1 %v4135_v0  ;;  %v3197_v52 = vld [vmem:[#allocation7 + $0x18] sm:$0xff]  ;;  %v3201_v53 = vld [vmem:[#allocation7 + $0x8] sm:$0xff]  ;;  %v3207_v55 = vld [vmem:[#allocation7] sm:$0xff]  ;;  %s2358_s1 = sld [smem:[#allocation4 + $0x101]] }
  0x41   :  { %202 = vmatprep.subr.mxu0 %v3115_v30  ;;  %2574 = vmatpush3.msra.mxu1 %v3174_v45  ;;  %v3204_v54 = vld [vmem:[#allocation7 + $0x58] sm:$0xff]  ;;  %4153 = vst [vmem:[#allocation13_spill] sm:$0xff] %v3207_v55  ;;  %v3217_v57 = vld [vmem:[#allocation7 + $0x40] sm:$0xff]  ;;  %v3223_v58 = vld [vmem:[#allocation7 + $0x28] sm:$0xff]  ;;  %s2359_s15 = sld [smem:[#allocation4 + $0x181]] }
  0x42   :  { %203 = vmatpush1.msra.mxu0 %v3151_v40  ;;  %2575 = vmatprep.subr.mxu1 %v4135_v0  ;;  %v3214_v56 = vld [vmem:[%s4132_s4] sm:$0xff]  ;;  %v3228_v59 = vld [vmem:[#allocation7 + $0x10] sm:$0xff]  ;;  %s2356_s4 = sld [smem:[#allocation4 + $0x1]] }
  0x43   :  { %204 = vmatprep.subr.mxu0 %v3161_v41  ;;  %2576 = vmatpush3.msra.mxu1 %v3184_v48  ;;  %4154 = vst [vmem:[#allocation14_spill] sm:$0xff] %v3228_v59  ;;  %s2360_s16 = sld [smem:[#allocation4 + $0x201]] }
  0x44   :  { %205 = vmatpush1.msra.mxu0 %v3167_v43  ;;  %2577 = vmatprep.subr.mxu1 %v4135_v0  ;;  %s3303_s2 = sld [smem:[#allocation4 + $0x281]] }
  0x45   :  { %206 = vmatprep.subr.mxu0 %v3171_v44  ;;  %2578 = vmatpush3.msra.mxu1 %v3194_v51  ;;  %s3305_s18 = sld [smem:[#allocation4 + $0x301]]  ;;  %s350_s19 = smul.u32 3, %s2357_s14  ;;  %v131_v60 = vld [vmem:[#allocation2] sm:$0xff]  ;;  %v132_v61 = vld [vmem:[#allocation2 + $0x8] sm:$0xff]  ;;  %v133_v62 = vld [vmem:[#allocation2 + $0x10] sm:$0xff] }
  0x46   :  { %207 = vmatpush1.msra.mxu0 %v3177_v46  ;;  %2579 = vmatprep.subr.mxu1 %v4135_v0  ;;  %s3307_s20 = sld [smem:[#allocation4 + $0x381]]  ;;  %s357_s21 = smul.u32 3, %s2358_s1 }
  0x47   :  { %208 = vmatprep.subr.mxu0 %v3181_v47  ;;  %2580 = vmatpush3.msra.mxu1 %v3204_v54  ;;  %s364_s23 = smul.u32 3, %s2359_s15  ;;  %s351_s24 = scalar_lea.vmem [#allocation5], %s350_s19 }
  0x48   :  { %209 = vmatpush1.msra.mxu0 %v3187_v49  ;;  %2581 = vmatprep.subr.mxu1 %v4135_v0  ;;  %s343_s17 = smul.u32 3, %s2356_s4  ;;  %s358_s26 = scalar_lea.vmem [#allocation5], %s357_s21 }
  0x49   :  { %210 = vmatprep.subr.mxu0 %v3191_v50  ;;  %2582 = vmatpush3.msra.mxu1 %v3217_v57  ;;  %s371_s25 = smul.u32 3, %s2360_s16  ;;  %v359_v18 = vld [vmem:[%s358_s26] sm:$0x7]  ;;  %s365_s28 = scalar_lea.vmem [#allocation5], %s364_s23 }
  0x4a   :  { %211 = vmatpush1.msra.mxu0 %v3197_v52  ;;  %2583 = vmatprep.subr.mxu1 %v4135_v0  ;;  %s344_s22 = scalar_lea.vmem [#allocation5], %s343_s17  ;;  %s378_s27 = smul.u32 3, %s3303_s2  ;;  %360 = vst.msk [vmem:[#allocation2 + $0x2] ss:$8 sm:$0x7] %vm3102_vm1, %v359_v18 }
  0x4b   :  { %212 = vmatprep.subr.mxu0 %v3201_v53  ;;  %2584 = vmatpush3.msra.mxu1 %v3223_v58  ;;  %v345_v63 = vld [vmem:[%s344_s22] sm:$0x7]  ;;  %s385_s0 = smul.u32 3, %s3305_s18  ;;  %s372_s29 = scalar_lea.vmem [#allocation5], %s371_s25 }
  0x4c   :  { %213 = vmatpush1.msra.mxu0 %v3207_v55  ;;  %2585 = vmatprep.subr.mxu1 %v4135_v0  ;;  %346 = vst.msk [vmem:[#allocation2] ss:$8 sm:$0x7] %vm3102_vm1, %v345_v63  ;;  %v366_v32 = vld [vmem:[%s365_s28] sm:$0x7]  ;;  %s392_s30 = smul.u32 3, %s3307_s20 }
  0x4d   :  { %247 = vmatmul.mubr.f32.vlgmr.msra.gmra.mxu0 %v3214_v56  ;;  %448 = vmatprep.subr.mxu0 %v3016_v1  ;;  %367 = vst.msk [vmem:[#allocation2 + $0x3] ss:$8 sm:$0x7] %vm3102_vm1, %v366_v32  ;;  %v373_v33 = vld [vmem:[%s372_s29] sm:$0x7]  ;;  %s379_s7 = scalar_lea.vmem [#allocation5], %s378_s27 }
  0x4e   :  { %449 = vmatpush1.msra.mxu0 %v3018_v2  ;;  %2586 = vmatpush3.msra.mxu1 %v3228_v59  ;;  %374 = vst.msk [vmem:[#allocation2 + $0x4] ss:$8 sm:$0x7] %vm3102_vm1, %v373_v33  ;;  %v380_v34 = vld [vmem:[%s379_s7] sm:$0x7]  ;;  %s386_s8 = scalar_lea.vmem [#allocation5], %s385_s0 }
  0x4f   :  { %450 = vmatprep.subr.mxu0 %v3020_v3  ;;  %2588 = vmatmul.mubr.f32.vlgmr.msra.gmra.mxu1 %v3214_v56  ;;  %381 = vst.msk [vmem:[#allocation2 + $0x5] ss:$8 sm:$0x7] %vm3102_vm1, %v380_v34  ;;  %v387_v35 = vld [vmem:[%s386_s8] sm:$0x7]  ;;  %s393_s9 = scalar_lea.vmem [#allocation5], %s392_s30 }
  0x50   :  { %451 = vmatpush1.msra.mxu0 %v3025_v4  ;;  %2590 = vmatprep.subr.mxu1 %v4135_v0  ;;  %388 = vst.msk [vmem:[#allocation2 + $0x6] ss:$8 sm:$0x7] %vm3102_vm1, %v387_v35  ;;  %v394_v36 = vld [vmem:[%s393_s9] sm:$0x7]  ;;  %s2365_s4 = sld [smem:[#allocation4 + $0x2]] }
  0x51   :  { %2591 = vmatpush3.msra.mxu1 %v3050_v10  ;;  %452 = vmatprep.subr.mxu0 %v3030_v5  ;;  %395 = vst.msk [vmem:[#allocation2 + $0x7] ss:$8 sm:$0x7] %vm3102_vm1, %v394_v36  ;;  %v3331_v33 = vld [vmem:[%s4131_s3] sm:$0xff]  ;;  %s2366_s14 = sld [smem:[#allocation4 + $0x82]] }
  0x52   :  { %2592 = vmatprep.subr.mxu1 %v4135_v0  ;;  %453 = vmatpush1.msra.mxu0 %v3035_v6  ;;  %s2367_s1 = sld [smem:[#allocation4 + $0x102]] }
  0x53   :  { %2593 = vmatpush3.msra.mxu1 %v3057_v12  ;;  %454 = vmatprep.subr.mxu0 %v3040_v7  ;;  %s2368_s15 = sld [smem:[#allocation4 + $0x182]] }
  0x54   :  { %2594 = vmatprep.subr.mxu1 %v4135_v0  ;;  %455 = vmatpush1.msra.mxu0 %v3044_v8  ;;  %s2369_s16 = sld [smem:[#allocation4 + $0x202]] }
  0x55   :  { %2595 = vmatpush3.msra.mxu1 %v3064_v14  ;;  %456 = vmatprep.subr.mxu0 %v3048_v9  ;;  %s3409_s2 = sld [smem:[#allocation4 + $0x282]] }
  0x56   :  { %2596 = vmatprep.subr.mxu1 %v4135_v0  ;;  %457 = vmatpush1.msra.mxu0 %v3054_v11  ;;  %s610_s17 = smul.u32 3, %s2365_s4  ;;  %s3411_s18 = sld [smem:[#allocation4 + $0x302]] }
  0x57   :  { %2597 = vmatpush3.msra.mxu1 %v3076_v17  ;;  %458 = vmatprep.subr.mxu0 %v3061_v13  ;;  %s617_s19 = smul.u32 3, %s2366_s14  ;;  %s3413_s20 = sld [smem:[#allocation4 + $0x382]] }
  0x58   :  { %2598 = vmatprep.subr.mxu1 %v4135_v0  ;;  %459 = vmatpush1.msra.mxu0 %v3068_v15  ;;  %s624_s21 = smul.u32 3, %s2367_s1  ;;  %s611_s22 = scalar_lea.vmem [#allocation5], %s610_s17 }
  0x59   :  { %2599 = vmatpush3.msra.mxu1 %v3088_v21  ;;  %460 = vmatprep.subr.mxu0 %v3073_v16  ;;  %s631_s23 = smul.u32 3, %s2368_s15  ;;  %s2374_s12 = sld [smem:[#allocation4 + $0x3]] }
  0x5a   :  { %2600 = vmatprep.subr.mxu1 %v4135_v0  ;;  %461 = vmatpush1.msra.mxu0 %v3080_v19  ;;  %s638_s25 = smul.u32 3, %s2369_s16  ;;  %s625_s26 = scalar_lea.vmem [#allocation5], %s624_s21 }
  0x5b   :  { %2601 = vmatpush3.msra.mxu1 %v3100_v25  ;;  %462 = vmatprep.subr.mxu0 %v3085_v20  ;;  %s645_s27 = smul.u32 3, %s3409_s2  ;;  %s632_s28 = scalar_lea.vmem [#allocation5], %s631_s23 }
  0x5c   :  { %2602 = vmatprep.subr.mxu1 %v4135_v0  ;;  %463 = vmatpush1.msra.mxu0 %v3091_v22  ;;  %s652_s0 = smul.u32 3, %s3411_s18  ;;  %s639_s29 = scalar_lea.vmem [#allocation5], %s638_s25 }
  0x5d   :  { %2603 = vmatpush3.msra.mxu1 %v3112_v29  ;;  %464 = vmatprep.subr.mxu0 %v3095_v23  ;;  %s659_s30 = smul.u32 3, %s3413_s20  ;;  %s646_s7 = scalar_lea.vmem [#allocation5], %s645_s27 }
  0x5e   :  { %2604 = vmatprep.subr.mxu1 %v4135_v0  ;;  %465 = vmatpush1.msra.mxu0 %v3097_v24  ;;  %s653_s8 = scalar_lea.vmem [#allocation5], %s652_s0  ;;  %s2375_s13 = sld [smem:[#allocation4 + $0x83]] }
  0x5f   :  { %2605 = vmatpush3.msra.mxu1 %v3118_v31  ;;  %466 = vmatprep.subr.mxu0 %v3107_v27  ;;  %s660_s9 = scalar_lea.vmem [#allocation5], %s659_s30  ;;  %s2376_s4 = sld [smem:[#allocation4 + $0x103]] }
  0x60   :  { %2606 = vmatprep.subr.mxu1 %v4135_v0  ;;  %467 = vmatpush1.msra.mxu0 %v3109_v28  ;;  %s2377_s14 = sld [smem:[#allocation4 + $0x183]]  ;;  %s877_s16 = smul.u32 3, %s2374_s12 }
  0x61   :  { %2607 = vmatpush3.msra.mxu1 %v3164_v42  ;;  %468 = vmatprep.subr.mxu0 %v3115_v30  ;;  %s2378_s1 = sld [smem:[#allocation4 + $0x203]] }
  0x62   :  { %2608 = vmatprep.subr.mxu1 %v4135_v0  ;;  %469 = vmatpush1.msra.mxu0 %v3151_v40  ;;  %s3592_s15 = sld [smem:[#allocation4 + $0x283]]  ;;  %s878_s20 = scalar_lea.vmem [#allocation5], %s877_s16 }
  0x63   :  { %2609 = vmatpush3.msra.mxu1 %v3174_v45  ;;  %470 = vmatprep.subr.mxu0 %v3161_v41  ;;  %s3594_s2 = sld [smem:[#allocation4 + $0x303]] }
  0x64   :  { %2610 = vmatprep.subr.mxu1 %v4135_v0  ;;  %471 = vmatpush1.msra.mxu0 %v3167_v43  ;;  %s884_s17 = smul.u32 3, %s2375_s13  ;;  %s3596_s18 = sld [smem:[#allocation4 + $0x383]] }
  0x65   :  { %2611 = vmatpush3.msra.mxu1 %v3184_v48  ;;  %472 = vmatprep.subr.mxu0 %v3171_v44  ;;  %s2383_s10 = sld [smem:[#allocation4 + $0x4]] }
  0x66   :  { %2612 = vmatprep.subr.mxu1 %v4135_v0  ;;  %473 = vmatpush1.msra.mxu0 %v3177_v46  ;;  %s898_s21 = smul.u32 3, %s2377_s14  ;;  %s2384_s11 = sld [smem:[#allocation4 + $0x84]] }
  0x67   :  { %2613 = vmatpush3.msra.mxu1 %v3194_v51  ;;  %474 = vmatprep.subr.mxu0 %v3181_v47  ;;  %s905_s23 = smul.u32 3, %s2378_s1  ;;  %s2385_s12 = sld [smem:[#allocation4 + $0x104]] }
  0x68   :  { %2614 = vmatprep.subr.mxu1 %v4135_v0  ;;  %475 = vmatpush1.msra.mxu0 %v3187_v49  ;;  %s912_s25 = smul.u32 3, %s3592_s15  ;;  %s2386_s13 = sld [smem:[#allocation4 + $0x184]] }
  0x69   :  { %2615 = vmatpush3.msra.mxu1 %v3204_v54  ;;  %476 = vmatprep.subr.mxu0 %v3191_v50  ;;  %s919_s27 = smul.u32 3, %s3594_s2  ;;  %s3710_s14 = sld [smem:[#allocation4 + $0x284]] }
  0x6a   :  { %2616 = vmatprep.subr.mxu1 %v4135_v0  ;;  %477 = vmatpush1.msra.mxu0 %v3197_v52  ;;  %s926_s0 = smul.u32 3, %s3596_s18  ;;  %s3712_s15 = sld [smem:[#allocation4 + $0x304]] }
  0x6b   :  { %2617 = vmatpush3.msra.mxu1 %v3217_v57  ;;  %478 = vmatprep.subr.mxu0 %v3201_v53  ;;  %s920_s30 = scalar_lea.vmem [#allocation5], %s919_s27  ;;  %s1144_s1 = smul.u32 3, %s2383_s10 }
  0x6c   :  { %2618 = vmatprep.subr.mxu1 %v4135_v0  ;;  %479 = vmatpush1.msra.mxu0 %v3207_v55  ;;  %s1151_s16 = smul.u32 3, %s2384_s11  ;;  %s3714_s2 = sld [smem:[#allocation4 + $0x384]] }
  0x6d   :  { %2619 = vmatpush3.msra.mxu1 %v3223_v58  ;;  %512 = vmatprep.mubr.f32.mxu0 %v4135_v0  ;;  %s1145_s18 = scalar_lea.vmem [#allocation5], %s1144_s1  ;;  %s2394_s10 = sld [smem:[#allocation4 + $0x105]] }
  0x6e   :  { %2620 = vmatprep.subr.mxu1 %v4135_v0  ;;  %2622 = vmatprep.mubr.msk.f32.mxu1 %vm2959_vm0, %v4135_v0  ;;  %s2395_s11 = sld [smem:[#allocation4 + $0x185]] }
  0x6f   :  { %2621 = vmatpush3.msra.mxu1 %v3228_v59  ;;  %715 = vmatprep.subr.mxu0 %v3016_v1  ;;  %v352_v1 = vld [vmem:[%s351_s24] sm:$0x7]  ;;  %s618_s24 = scalar_lea.vmem [#allocation5], %s617_s19  ;;  %s891_s19 = smul.u32 3, %s2376_s4 }
  0x70   :  { %2625 = vmatprep.subr.mxu1 %v4135_v0  ;;  %353 = vst.msk [vmem:[#allocation2 + $0x1] ss:$8 sm:$0x7] %vm3102_vm1, %v352_v1  ;;  %s2387_s4 = sld [smem:[#allocation4 + $0x204]] }
  0x72   :  { %s1193_s27 = smul.u32 3, %s3714_s2 }
 0x10d   :  { %v248_v37 = vpop.f32.mrf.mxu0 }
 0x10e   :  { %v323_v38 = vadd.f32 %v248_v37, %v131_v60 }
 0x10f   :  { %v319_v63 = vpop.f32.mrf.mxu1  ;;  %v250_v18 = vpop.f32.mrf.mxu0 }
 0x110   :  { %v324_v39 = vmul.f32 0.5, %v323_v38  ;;  %v328_v32 = vadd.f32 %v250_v18, %v132_v61  ;;  %v333_v59 = vadd.f32 %v319_v63, %v3331_v33  ;;  %v3508_v63 = vld [vmem:[#allocation7 + $0xc0] sm:$0xff] }
 0x111   :  { %v2589_v1 = vpop.f32.mrf.mxu1 }
 0x112   :  { %2844 = vtanh.f32 %v324_v39  ;;  %v329_v34 = vmul.f32 0.5, %v328_v32  ;;  %v3511_v32 = vld [vmem:[#allocation7 + $0xb0] sm:$0xff] }
 0x114   :  { %2846 = vtanh.f32 %v329_v34  ;;  %v3514_v34 = vld [vmem:[#allocation7 + $0xa8] sm:$0xff] }
 0x11f   :  { %v2845_v35 = vpop.eup %2844 }
 0x120   :  { %v326_v0 = vadd.f32 1.0, %v2845_v35  ;;  %v3516_v35 = vld [vmem:[#allocation7 + $0xb8] sm:$0xff] }
 0x121   :  { %v2847_v37 = vpop.eup %2846 }
 0x122   :  { %v327_v36 = vmul.f32 0.5, %v326_v0  ;;  %v331_v38 = vadd.f32 1.0, %v2847_v37  ;;  %v4155_v0 = vmov 0.0   ;;  %v3526_v37 = vld [vmem:[#allocation7 + $0xa0] sm:$0xff] }
 0x124   :  { %v334_v26 = vmul.f32 %v333_v59, %v327_v36  ;;  %v332_v1 = vmul.f32 0.5, %v331_v38  ;;  %v3502_v59 = vld [vmem:[#allocation7 + $0xd8] sm:$0xff]  ;;  %v3530_v38 = vld [vmem:[#allocation7 + $0x80] sm:$0xff] }
 0x125   :  { %v3520_v36 = vld [vmem:[#allocation7 + $0x98] sm:$0xff] }
 0x126   :  { %v335_v60 = vadd.f32 %v334_v26, %v133_v62  ;;  %v3505_v62 = vld [vmem:[#allocation7 + $0xc8] sm:$0xff] }
 0x128   :  { %2848 = vtanh.f32 %v335_v60  ;;  %v3524_v60 = vld [vmem:[#allocation7 + $0x90] sm:$0xff] }
 0x135   :  { %v2849_v39 = vpop.eup %2848 }
 0x136   :  { %v337_v61 = vsub.f32 %v3214_v56, %v2849_v39  ;;  %v3493_v56 = vld [vmem:[#allocation7 + $0xf8] sm:$0xff] }
 0x138   :  { %v338_v18 = vmul.f32 %v337_v61, %v332_v1  ;;  %v3536_v1 = vld [vmem:[#allocation7 + $0x88] sm:$0xff] }
 0x139   :  { %v3540_v61 = vld [vmem:[#allocation7 + $0x68] sm:$0xff] }
 0x13a   :  { %v3335_v55 = vadd.f32 %v2849_v39, %v338_v18  ;;  %v3534_v39 = vld [vmem:[#allocation7 + $0x78] sm:$0xff]  ;;  %v3544_v18 = vld [vmem:[#allocation7 + $0x60] sm:$0xff] }
 0x13c   :  { %340 = vst [vmem:[%s4133_s5] sm:$0xff] %v3335_v55  ;;  %513 = vmatmul.mubr.f32.vlgmr.msra.gmra.mxu0 %v3335_v55  ;;  %2623 = vmatmul.mubr.f32.vlgmr.msra.gmra.mxu1 %v3335_v55 }
 0x13d   :  { %716 = vmatpush1.msra.mxu0 %v3018_v2  ;;  %2626 = vmatpush3.msra.mxu1 %v3050_v10  ;;  %v4156_v2 = vld [vmem:[#allocation13_spill] sm:$0xff] }
 0x13e   :  { %717 = vmatprep.subr.mxu0 %v3020_v3  ;;  %2627 = vmatprep.subr.mxu1 %v4155_v0  ;;  %v4157_v3 = vld [vmem:[#allocation14_spill] sm:$0xff] }
 0x13f   :  { %718 = vmatpush1.msra.mxu0 %v3025_v4  ;;  %2628 = vmatpush3.msra.mxu1 %v3057_v12  ;;  %v397_v4 = vld [vmem:[#allocation2] sm:$0xff] }
 0x140   :  { %719 = vmatprep.subr.mxu0 %v3030_v5  ;;  %2629 = vmatprep.subr.mxu1 %v4155_v0  ;;  %v399_v5 = vld [vmem:[#allocation2 + $0x10] sm:$0xff] }
 0x141   :  { %720 = vmatpush1.msra.mxu0 %v3035_v6  ;;  %2630 = vmatpush3.msra.mxu1 %v3064_v14  ;;  %v398_v6 = vld [vmem:[#allocation2 + $0x8] sm:$0xff] }
 0x142   :  { %721 = vmatprep.subr.mxu0 %v3040_v7  ;;  %2631 = vmatprep.subr.mxu1 %v4155_v0  ;;  %v612_v7 = vld [vmem:[%s611_s22] sm:$0x7]  ;;  %s885_s22 = scalar_lea.vmem [#allocation5], %s884_s17  ;;  %s1158_s17 = smul.u32 3, %s2385_s12 }
 0x143   :  { %722 = vmatpush1.msra.mxu0 %v3044_v8  ;;  %2632 = vmatpush3.msra.mxu1 %v3076_v17  ;;  %613 = vst.msk [vmem:[#allocation2] ss:$8 sm:$0x7] %vm3102_vm1, %v612_v7  ;;  %v3564_v7 = vld [vmem:[#allocation7 + $0x30] sm:$0xff]  ;;  %s2396_s12 = sld [smem:[#allocation4 + $0x205]] }
 0x144   :  { %723 = vmatprep.subr.mxu0 %v3048_v9  ;;  %2633 = vmatprep.subr.mxu1 %v4155_v0  ;;  %v619_v9 = vld [vmem:[%s618_s24] sm:$0x7]  ;;  %s892_s24 = scalar_lea.vmem [#allocation5], %s891_s19  ;;  %s1165_s19 = smul.u32 3, %s2386_s13 }
 0x145   :  { %724 = vmatpush1.msra.mxu0 %v3054_v11  ;;  %2634 = vmatpush3.msra.mxu1 %v3088_v21  ;;  %620 = vst.msk [vmem:[#allocation2 + $0x1] ss:$8 sm:$0x7] %vm3102_vm1, %v619_v9  ;;  %v626_v11 = vld [vmem:[%s625_s26] sm:$0x7]  ;;  %v3566_v9 = vld [vmem:[#allocation7 + $0x40] sm:$0xff] }
 0x146   :  { %725 = vmatprep.subr.mxu0 %v3061_v13  ;;  %2635 = vmatprep.subr.mxu1 %v4155_v0  ;;  %627 = vst.msk [vmem:[#allocation2 + $0x2] ss:$8 sm:$0x7] %vm3102_vm1, %v626_v11  ;;  %v633_v13 = vld [vmem:[%s632_s28] sm:$0x7]  ;;  %4159 = vst [vmem:[#allocation13_spill] sm:$0xff] %v3566_v9 }
 0x147   :  { %726 = vmatpush1.msra.mxu0 %v3068_v15  ;;  %2636 = vmatpush3.msra.mxu1 %v3100_v25  ;;  %634 = vst.msk [vmem:[#allocation2 + $0x3] ss:$8 sm:$0x7] %vm3102_vm1, %v633_v13  ;;  %v640_v15 = vld [vmem:[%s639_s29] sm:$0x7]  ;;  %v3570_v11 = vld [vmem:[#allocation7 + $0x20] sm:$0xff] }
 0x148   :  { %727 = vmatprep.subr.mxu0 %v3073_v16  ;;  %2637 = vmatprep.subr.mxu1 %v4155_v0  ;;  %641 = vst.msk [vmem:[#allocation2 + $0x4] ss:$8 sm:$0x7] %vm3102_vm1, %v640_v15  ;;  %v647_v16 = vld [vmem:[%s646_s7] sm:$0x7]  ;;  %4160 = vst [vmem:[#allocation14_spill] sm:$0xff] %v3570_v11 }
 0x149   :  { %728 = vmatpush1.msra.mxu0 %v3080_v19  ;;  %2638 = vmatpush3.msra.mxu1 %v3112_v29  ;;  %648 = vst.msk [vmem:[#allocation2 + $0x5] ss:$8 sm:$0x7] %vm3102_vm1, %v647_v16  ;;  %v654_v19 = vld [vmem:[%s653_s8] sm:$0x7]  ;;  %v3576_v15 = vld [vmem:[#allocation7 + $0x28] sm:$0xff] }
 0x14a   :  { %729 = vmatprep.subr.mxu0 %v3085_v20  ;;  %2639 = vmatprep.subr.mxu1 %v4155_v0  ;;  %655 = vst.msk [vmem:[#allocation2 + $0x6] ss:$8 sm:$0x7] %vm3102_vm1, %v654_v19  ;;  %v661_v20 = vld [vmem:[%s660_s9] sm:$0x7]  ;;  %4162 = vst [vmem:[#allocation16_spill] sm:$0xff] %v3576_v15 }
 0x14b   :  { %730 = vmatpush1.msra.mxu0 %v3091_v22  ;;  %2640 = vmatpush3.msra.mxu1 %v3118_v31  ;;  %662 = vst.msk [vmem:[#allocation2 + $0x7] ss:$8 sm:$0x7] %vm3102_vm1, %v661_v20  ;;  %v3574_v13 = vld [vmem:[#allocation7 + $0x18] sm:$0xff]  ;;  %v3578_v16 = vld [vmem:[#allocation7 + $0x8] sm:$0xff]  ;;  %v3582_v19 = vld [vmem:[#allocation7] sm:$0xff] }
 0x14c   :  { %731 = vmatprep.subr.mxu0 %v3095_v23  ;;  %2641 = vmatprep.subr.mxu1 %v4155_v0  ;;  %4161 = vst [vmem:[#allocation15_spill] sm:$0xff] %v3574_v13  ;;  %4163 = vst [vmem:[#allocation17_spill] sm:$0xff] %v3578_v16  ;;  %v3584_v20 = vld [vmem:[#allocation7 + $0x10] sm:$0xff]  ;;  %s899_s26 = scalar_lea.vmem [#allocation5], %s898_s21  ;;  %s906_s28 = scalar_lea.vmem [#allocation5], %s905_s23 }
 0x14d   :  { %732 = vmatpush1.msra.mxu0 %v3097_v24  ;;  %2642 = vmatpush3.msra.mxu1 %v3164_v42  ;;  %4164 = vst [vmem:[#allocation18_spill] sm:$0xff] %v3582_v19  ;;  %4165 = vst [vmem:[#allocation19_spill] sm:$0xff] %v3584_v20  ;;  %s913_s29 = scalar_lea.vmem [#allocation5], %s912_s25  ;;  %s927_s7 = scalar_lea.vmem [#allocation5], %s926_s0 }
 0x14e   :  { %733 = vmatprep.subr.mxu0 %v3107_v27  ;;  %2643 = vmatprep.subr.mxu1 %v4155_v0  ;;  %s1172_s21 = smul.u32 3, %s2387_s4  ;;  %s2392_s8 = sld [smem:[#allocation4 + $0x5]] }
 0x14f   :  { %734 = vmatpush1.msra.mxu0 %v3109_v28  ;;  %2644 = vmatpush3.msra.mxu1 %v3174_v45  ;;  %s1179_s23 = smul.u32 3, %s3710_s14  ;;  %s2393_s9 = sld [smem:[#allocation4 + $0x85]] }
 0x150   :  { %735 = vmatprep.subr.mxu0 %v3115_v30  ;;  %2645 = vmatprep.subr.mxu1 %v4155_v0  ;;  %s1186_s25 = smul.u32 3, %s3712_s15  ;;  %s3811_s13 = sld [smem:[#allocation4 + $0x285]] }
 0x151   :  { %736 = vmatpush1.msra.mxu0 %v3151_v40  ;;  %2646 = vmatpush3.msra.mxu1 %v3184_v48  ;;  %s3813_s14 = sld [smem:[#allocation4 + $0x305]] }
 0x152   :  { %737 = vmatprep.subr.mxu0 %v3161_v41  ;;  %2647 = vmatprep.subr.mxu1 %v4155_v0  ;;  %s1187_s0 = scalar_lea.vmem [#allocation5], %s1186_s25  ;;  %s3815_s15 = sld [smem:[#allocation4 + $0x385]] }
 0x153   :  { %738 = vmatpush1.msra.mxu0 %v3167_v43  ;;  %2648 = vmatpush3.msra.mxu1 %v3194_v51 }
 0x154   :  { %739 = vmatprep.subr.mxu0 %v3171_v44  ;;  %2649 = vmatprep.subr.mxu1 %v4155_v0  ;;  %s1411_s4 = smul.u32 3, %s2392_s8  ;;  %s2402_s8 = sld [smem:[#allocation4 + $0x86]] }
 0x155   :  { %740 = vmatpush1.msra.mxu0 %v3177_v46  ;;  %2650 = vmatpush3.msra.mxu1 %v3204_v54  ;;  %v3487_v54 = vld [vmem:[#allocation7 + $0x110] sm:$0xff]  ;;  %s1418_s1 = smul.u32 3, %s2393_s9  ;;  %s2403_s9 = sld [smem:[#allocation4 + $0x106]] }
 0x156   :  { %741 = vmatprep.subr.mxu0 %v3181_v47  ;;  %2651 = vmatprep.subr.mxu1 %v4155_v0  ;;  %s1412_s2 = scalar_lea.vmem [#allocation5], %s1411_s4  ;;  %s4001_s4 = sld [smem:[#allocation4 + $0x306]] }
 0x157   :  { %742 = vmatpush1.msra.mxu0 %v3187_v49  ;;  %2652 = vmatpush3.msra.mxu1 %v3217_v57  ;;  %v3496_v57 = vld [vmem:[#allocation7 + $0xf0] sm:$0xff] }
 0x158   :  { %743 = vmatprep.subr.mxu0 %v3191_v50  ;;  %2653 = vmatprep.subr.mxu1 %v4155_v0  ;;  %s1460_s25 = smul.u32 3, %s3815_s15 }
 0x159   :  { %744 = vmatpush1.msra.mxu0 %v3197_v52  ;;  %2654 = vmatpush3.msra.mxu1 %v3223_v58  ;;  %v3499_v58 = vld [vmem:[#allocation7 + $0xe0] sm:$0xff] }
 0x15a   :  { %745 = vmatprep.subr.mxu0 %v3201_v53  ;;  %2655 = vmatprep.subr.mxu1 %v4155_v0 }
 0x15b   :  { %746 = vmatpush1.msra.mxu0 %v4156_v2  ;;  %779 = vmatprep.mubr.f32.mxu0 %v4155_v0  ;;  %v3546_v2 = vld [vmem:[#allocation7 + $0x70] sm:$0xff]  ;;  %s1692_s15 = smul.u32 3, %s2403_s9  ;;  %s4091_s9 = sld [smem:[#allocation4 + $0x287]] }
 0x15c   :  { %2656 = vmatpush3.msra.mxu1 %v4157_v3  ;;  %2657 = vmatprep.mubr.msk.f32.mxu1 %vm2959_vm0, %v4155_v0  ;;  %v3550_v3 = vld [vmem:[#allocation7 + $0x50] sm:$0xff] }
 0x15d   :  { %2660 = vmatprep.subr.mxu1 %v4155_v0 }
 0x1fc   :  { %v514_v22 = vpop.f32.mrf.mxu0  ;;  %v585_v23 = vpop.f32.mrf.mxu1 }
 0x1fd   :  { %v589_v24 = vadd.f32 %v514_v22, %v397_v4  ;;  %v599_v44 = vadd.f32 %v585_v23, %v3331_v33  ;;  %v3554_v4 = vld [vmem:[#allocation7 + $0x48] sm:$0xff]  ;;  %v664_v22 = vld [vmem:[#allocation2] sm:$0xff] }
 0x1fe   :  { %v2624_v26 = vpop.f32.mrf.mxu1  ;;  %v516_v28 = vpop.f32.mrf.mxu0  ;;  %v666_v23 = vld [vmem:[#allocation2 + $0x10] sm:$0xff] }
 0x1ff   :  { %v590_v27 = vmul.f32 0.5, %v589_v24  ;;  %v594_v30 = vadd.f32 %v516_v28, %v398_v6  ;;  %v3560_v6 = vld [vmem:[#allocation7 + $0x38] sm:$0xff]  ;;  %v665_v24 = vld [vmem:[#allocation2 + $0x8] sm:$0xff] }
 0x200   :  { %v879_v26 = vld [vmem:[%s878_s20] sm:$0x7]  ;;  %s1152_s20 = scalar_lea.vmem [#allocation5], %s1151_s16  ;;  %s1425_s16 = smul.u32 3, %s2394_s10 }
 0x201   :  { %2850 = vtanh.f32 %v590_v27  ;;  %v595_v40 = vmul.f32 0.5, %v594_v30  ;;  %880 = vst.msk [vmem:[#allocation2] ss:$8 sm:$0x7] %vm3102_vm1, %v879_v26  ;;  %v886_v27 = vld [vmem:[%s885_s22] sm:$0x7] }
 0x202   :  { %887 = vst.msk [vmem:[#allocation2 + $0x1] ss:$8 sm:$0x7] %vm3102_vm1, %v886_v27  ;;  %v893_v28 = vld [vmem:[%s892_s24] sm:$0x7]  ;;  %s1159_s22 = scalar_lea.vmem [#allocation5], %s1158_s17 }
 0x203   :  { %2852 = vtanh.f32 %v595_v40  ;;  %894 = vst.msk [vmem:[#allocation2 + $0x2] ss:$8 sm:$0x7] %vm3102_vm1, %v893_v28  ;;  %v900_v30 = vld [vmem:[%s899_s26] sm:$0x7]  ;;  %s1166_s24 = scalar_lea.vmem [#allocation5], %s1165_s19 }
 0x204   :  { %901 = vst.msk [vmem:[#allocation2 + $0x3] ss:$8 sm:$0x7] %vm3102_vm1, %v900_v30  ;;  %v907_v40 = vld [vmem:[%s906_s28] sm:$0x7]  ;;  %s1173_s26 = scalar_lea.vmem [#allocation5], %s1172_s21 }
 0x205   :  { %908 = vst.msk [vmem:[#allocation2 + $0x4] ss:$8 sm:$0x7] %vm3102_vm1, %v907_v40  ;;  %s1180_s28 = scalar_lea.vmem [#allocation5], %s1179_s23  ;;  %s1432_s17 = smul.u32 3, %s2395_s11 }
 0x206   :  { %s1439_s19 = smul.u32 3, %s2396_s12  ;;  %s2404_s10 = sld [smem:[#allocation4 + $0x186]] }
 0x207   :  { %s1446_s21 = smul.u32 3, %s3811_s13  ;;  %s2405_s11 = sld [smem:[#allocation4 + $0x206]] }
 0x208   :  { %s1453_s23 = smul.u32 3, %s3813_s14  ;;  %s3999_s12 = sld [smem:[#allocation4 + $0x286]] }
 0x209   :  { %s1685_s14 = smul.u32 3, %s2402_s8  ;;  %s2414_s8 = sld [smem:[#allocation4 + $0x207]] }
 0x20e   :  { %v2851_v41 = vpop.eup %2850 }
 0x20f   :  { %v592_v42 = vadd.f32 1.0, %v2851_v41  ;;  %v914_v41 = vld [vmem:[%s913_s29] sm:$0x7]  ;;  %s1194_s29 = scalar_lea.vmem [#allocation5], %s1193_s27  ;;  %s1454_s27 = scalar_lea.vmem [#allocation5], %s1453_s23 }
 0x210   :  { %v2853_v47 = vpop.eup %2852  ;;  %915 = vst.msk [vmem:[#allocation2 + $0x5] ss:$8 sm:$0x7] %vm3102_vm1, %v914_v41 }
 0x211   :  { %v593_v43 = vmul.f32 0.5, %v592_v42  ;;  %v597_v48 = vadd.f32 1.0, %v2853_v47  ;;  %v921_v42 = vld [vmem:[%s920_s30] sm:$0x7]  ;;  %s2411_s30 = sld [smem:[#allocation4 + $0x87]] }
 0x212   :  { %922 = vst.msk [vmem:[#allocation2 + $0x6] ss:$8 sm:$0x7] %vm3102_vm1, %v921_v42 }
 0x213   :  { %v600_v45 = vmul.f32 %v599_v44, %v593_v43  ;;  %v598_v50 = vmul.f32 0.5, %v597_v48  ;;  %v928_v43 = vld [vmem:[%s927_s7] sm:$0x7]  ;;  %s2412_s7 = sld [smem:[#allocation4 + $0x107]] }
 0x214   :  { %929 = vst.msk [vmem:[#allocation2 + $0x7] ss:$8 sm:$0x7] %vm3102_vm1, %v928_v43 }
 0x215   :  { %v601_v46 = vadd.f32 %v600_v45, %v399_v5  ;;  %v3556_v5 = vld [vmem:[#allocation7 + $0x58] sm:$0xff] }
 0x217   :  { %2854 = vtanh.f32 %v601_v46 }
 0x224   :  { %v2855_v49 = vpop.eup %2854 }
 0x225   :  { %v603_v51 = vsub.f32 %v3335_v55, %v2855_v49  ;;  %v3490_v55 = vld [vmem:[#allocation7 + $0x108] sm:$0xff] }
 0x227   :  { %v604_v52 = vmul.f32 %v603_v51, %v598_v50 }
 0x229   :  { %v3436_v53 = vadd.f32 %v2855_v49, %v604_v52 }
 0x22b   :  { %2364 = vst [vmem:[%s4133_s5 + $0x8] sm:$0xff] %v3436_v53  ;;  %780 = vmatmul.mubr.f32.vlgmr.msra.gmra.mxu0 %v3436_v53  ;;  %2658 = vmatmul.mubr.f32.vlgmr.msra.gmra.mxu1 %v3436_v53 }
 0x22c   :  { %2661 = vmatpush3.msra.mxu1 %v3050_v10  ;;  %1046 = vmatprep.mubr.f32.mxu0 %v4155_v0  ;;  %v3463_v10 = vld [vmem:[#allocation7 + $0x170] sm:$0xff] }
 0x22d   :  { %2662 = vmatprep.subr.mxu1 %v4155_v0  ;;  %2692 = vmatprep.mubr.msk.f32.mxu1 %vm2959_vm0, %v4155_v0 }
 0x22e   :  { %2663 = vmatpush3.msra.mxu1 %v3057_v12  ;;  %982 = vmatprep.subr.mxu0 %v3463_v10  ;;  %v3466_v12 = vld [vmem:[#allocation7 + $0x168] sm:$0xff] }
 0x22f   :  { %2664 = vmatprep.subr.mxu1 %v4155_v0  ;;  %983 = vmatpush1.msra.mxu0 %v3466_v12 }
 0x230   :  { %2665 = vmatpush3.msra.mxu1 %v3064_v14  ;;  %v3469_v14 = vld [vmem:[#allocation7 + $0x158] sm:$0xff] }
 0x231   :  { %2666 = vmatprep.subr.mxu1 %v4155_v0  ;;  %984 = vmatprep.subr.mxu0 %v3469_v14 }
 0x232   :  { %2667 = vmatpush3.msra.mxu1 %v3076_v17  ;;  %v3472_v17 = vld [vmem:[#allocation7 + $0x150] sm:$0xff] }
 0x233   :  { %2668 = vmatprep.subr.mxu1 %v4155_v0  ;;  %985 = vmatpush1.msra.mxu0 %v3472_v17 }
 0x234   :  { %2669 = vmatpush3.msra.mxu1 %v3088_v21  ;;  %v3475_v21 = vld [vmem:[#allocation7 + $0x140] sm:$0xff] }
 0x235   :  { %2670 = vmatprep.subr.mxu1 %v4155_v0  ;;  %986 = vmatprep.subr.mxu0 %v3475_v21 }
 0x236   :  { %2671 = vmatpush3.msra.mxu1 %v3100_v25  ;;  %v3478_v25 = vld [vmem:[#allocation7 + $0x138] sm:$0xff] }
 0x237   :  { %2672 = vmatprep.subr.mxu1 %v4155_v0  ;;  %987 = vmatpush1.msra.mxu0 %v3478_v25 }
 0x238   :  { %2673 = vmatpush3.msra.mxu1 %v3112_v29  ;;  %v3481_v29 = vld [vmem:[#allocation7 + $0x128] sm:$0xff] }
 0x239   :  { %2674 = vmatprep.subr.mxu1 %v4155_v0  ;;  %988 = vmatprep.subr.mxu0 %v3481_v29 }
 0x23a   :  { %2675 = vmatpush3.msra.mxu1 %v3118_v31  ;;  %v3484_v31 = vld [vmem:[#allocation7 + $0x120] sm:$0xff] }
 0x23b   :  { %2676 = vmatprep.subr.mxu1 %v4155_v0  ;;  %989 = vmatpush1.msra.mxu0 %v3484_v31 }
 0x23c   :  { %990 = vmatprep.subr.mxu0 %v3487_v54  ;;  %2677 = vmatpush3.msra.mxu1 %v3516_v35 }
 0x23d   :  { %991 = vmatpush1.msra.mxu0 %v3490_v55  ;;  %2678 = vmatprep.subr.mxu1 %v4155_v0 }
 0x23e   :  { %992 = vmatprep.subr.mxu0 %v3493_v56  ;;  %2679 = vmatpush3.msra.mxu1 %v3526_v37 }
 0x23f   :  { %993 = vmatpush1.msra.mxu0 %v3496_v57  ;;  %2680 = vmatprep.subr.mxu1 %v4155_v0 }
 0x240   :  { %994 = vmatprep.subr.mxu0 %v3499_v58  ;;  %2681 = vmatpush3.msra.mxu1 %v3536_v1 }
 0x241   :  { %995 = vmatpush1.msra.mxu0 %v3502_v59  ;;  %2682 = vmatprep.subr.mxu1 %v4155_v0 }
 0x242   :  { %996 = vmatprep.subr.mxu0 %v3505_v62  ;;  %2683 = vmatpush3.msra.mxu1 %v3546_v2 }
 0x243   :  { %997 = vmatpush1.msra.mxu0 %v3508_v63  ;;  %2684 = vmatprep.subr.mxu1 %v4155_v0 }
 0x244   :  { %998 = vmatprep.subr.mxu0 %v3511_v32  ;;  %2685 = vmatpush3.msra.mxu1 %v3556_v5 }
 0x245   :  { %999 = vmatpush1.msra.mxu0 %v3514_v34  ;;  %2686 = vmatprep.subr.mxu1 %v4155_v0 }
 0x246   :  { %1000 = vmatprep.subr.mxu0 %v3520_v36  ;;  %2687 = vmatpush3.msra.mxu1 %v3566_v9 }
 0x247   :  { %1001 = vmatpush1.msra.mxu0 %v3524_v60  ;;  %2688 = vmatprep.subr.mxu1 %v4155_v0 }
 0x248   :  { %1002 = vmatprep.subr.mxu0 %v3530_v38  ;;  %2689 = vmatpush3.msra.mxu1 %v3576_v15 }
 0x249   :  { %1003 = vmatpush1.msra.mxu0 %v3534_v39  ;;  %2690 = vmatprep.subr.mxu1 %v4155_v0 }
 0x24a   :  { %1004 = vmatprep.subr.mxu0 %v3540_v61  ;;  %2691 = vmatpush3.msra.mxu1 %v3584_v20 }
 0x24b   :  { %1005 = vmatpush1.msra.mxu0 %v3544_v18  ;;  %2695 = vmatprep.subr.mxu1 %v4155_v0 }
 0x24c   :  { %1006 = vmatprep.subr.mxu0 %v3550_v3 }
 0x24d   :  { %1007 = vmatpush1.msra.mxu0 %v3554_v4 }
 0x24e   :  { %1008 = vmatprep.subr.mxu0 %v3560_v6 }
 0x24f   :  { %1009 = vmatpush1.msra.mxu0 %v3564_v7 }
 0x250   :  { %1010 = vmatprep.subr.mxu0 %v3570_v11 }
 0x251   :  { %1011 = vmatpush1.msra.mxu0 %v3574_v13 }
 0x252   :  { %1012 = vmatprep.subr.mxu0 %v3578_v16 }
 0x253   :  { %1013 = vmatpush1.msra.mxu0 %v3582_v19 }
 0x254   :  { %1249 = vmatprep.subr.mxu0 %v3463_v10 }
 0x2eb   :  { %v781_v44 = vpop.f32.mrf.mxu0  ;;  %v852_v45 = vpop.f32.mrf.mxu1 }
 0x2ec   :  { %v856_v46 = vadd.f32 %v781_v44, %v664_v22  ;;  %v866_v28 = vadd.f32 %v852_v45, %v3331_v33  ;;  %v3682_v45 = vld [vmem:[#allocation7 + $0x100] sm:$0xff] }
 0x2ed   :  { %v2659_v47 = vpop.f32.mrf.mxu1  ;;  %v783_v49 = vpop.f32.mrf.mxu0 }
 0x2ee   :  { %v857_v48 = vmul.f32 0.5, %v856_v46  ;;  %v861_v50 = vadd.f32 %v783_v49, %v665_v24  ;;  %v3674_v24 = vld [vmem:[#allocation7 + $0x130] sm:$0xff]  ;;  %v3686_v47 = vld [vmem:[#allocation7 + $0xe8] sm:$0xff]  ;;  %v931_v49 = vld [vmem:[#allocation2] sm:$0xff] }
 0x2f0   :  { %2856 = vtanh.f32 %v857_v48  ;;  %v862_v51 = vmul.f32 0.5, %v861_v50  ;;  %v3690_v48 = vld [vmem:[#allocation7 + $0xd0] sm:$0xff]  ;;  %v933_v50 = vld [vmem:[#allocation2 + $0x10] sm:$0xff] }
 0x2f2   :  { %2858 = vtanh.f32 %v862_v51  ;;  %v932_v51 = vld [vmem:[#allocation2 + $0x8] sm:$0xff] }
 0x2fd   :  { %v2857_v52 = vpop.eup %2856 }
 0x2fe   :  { %v859_v26 = vadd.f32 1.0, %v2857_v52  ;;  %v1146_v52 = vld [vmem:[%s1145_s18] sm:$0x7]  ;;  %s1419_s18 = scalar_lea.vmem [#allocation5], %s1418_s1  ;;  %s4003_s1 = sld [smem:[#allocation4 + $0x386]] }
 0x2ff   :  { %v2859_v41 = vpop.eup %2858  ;;  %1147 = vst.msk [vmem:[#allocation2] ss:$8 sm:$0x7] %vm3102_vm1, %v1146_v52 }
 0x300   :  { %v860_v27 = vmul.f32 0.5, %v859_v26  ;;  %v864_v42 = vadd.f32 1.0, %v2859_v41  ;;  %v1181_v41 = vld [vmem:[%s1180_s28] sm:$0x7]  ;;  %s1461_s28 = scalar_lea.vmem [#allocation5], %s1460_s25 }
 0x301   :  { %1182 = vst.msk [vmem:[#allocation2 + $0x5] ss:$8 sm:$0x7] %vm3102_vm1, %v1181_v41 }
 0x302   :  { %v867_v30 = vmul.f32 %v866_v28, %v860_v27  ;;  %v865_v8 = vmul.f32 0.5, %v864_v42  ;;  %v1153_v27 = vld [vmem:[%s1152_s20] sm:$0x7]  ;;  %s1426_s20 = scalar_lea.vmem [#allocation5], %s1425_s16 }
 0x303   :  { %1154 = vst.msk [vmem:[#allocation2 + $0x1] ss:$8 sm:$0x7] %vm3102_vm1, %v1153_v27  ;;  %v1160_v28 = vld [vmem:[%s1159_s22] sm:$0x7]  ;;  %s1433_s22 = scalar_lea.vmem [#allocation5], %s1432_s17 }
 0x304   :  { %v868_v40 = vadd.f32 %v867_v30, %v666_v23  ;;  %v3670_v23 = vld [vmem:[#allocation7 + $0x148] sm:$0xff]  ;;  %1161 = vst.msk [vmem:[#allocation2 + $0x2] ss:$8 sm:$0x7] %vm3102_vm1, %v1160_v28  ;;  %v1167_v30 = vld [vmem:[%s1166_s24] sm:$0x7] }
 0x305   :  { %1168 = vst.msk [vmem:[#allocation2 + $0x3] ss:$8 sm:$0x7] %vm3102_vm1, %v1167_v30  ;;  %v1188_v42 = vld [vmem:[%s1187_s0] sm:$0x7]  ;;  %s1440_s24 = scalar_lea.vmem [#allocation5], %s1439_s19 }
 0x306   :  { %2860 = vtanh.f32 %v868_v40  ;;  %v1174_v40 = vld [vmem:[%s1173_s26] sm:$0x7]  ;;  %1189 = vst.msk [vmem:[#allocation2 + $0x6] ss:$8 sm:$0x7] %vm3102_vm1, %v1188_v42  ;;  %s1447_s26 = scalar_lea.vmem [#allocation5], %s1446_s21 }
 0x307   :  { %1175 = vst.msk [vmem:[#allocation2 + $0x4] ss:$8 sm:$0x7] %vm3102_vm1, %v1174_v40  ;;  %s1686_s17 = scalar_lea.vmem [#allocation5], %s1685_s14  ;;  %s1693_s19 = scalar_lea.vmem [#allocation5], %s1692_s15 }
 0x313   :  { %v2861_v43 = vpop.eup %2860 }
 0x314   :  { %v870_v22 = vsub.f32 %v3436_v53, %v2861_v43  ;;  %v3666_v53 = vld [vmem:[#allocation7 + $0x160] sm:$0xff] }
 0x316   :  { %v871_v44 = vmul.f32 %v870_v22, %v865_v8  ;;  %v3662_v8 = vld [vmem:[#allocation7 + $0x178] sm:$0xff] }
 0x318   :  { %v3619_v46 = vadd.f32 %v2861_v43, %v871_v44  ;;  %v1195_v43 = vld [vmem:[%s1194_s29] sm:$0x7]  ;;  %s2410_s29 = sld [smem:[#allocation4 + $0x7]] }
 0x319   :  { %1196 = vst.msk [vmem:[#allocation2 + $0x7] ss:$8 sm:$0x7] %vm3102_vm1, %v1195_v43 }
 0x31a   :  { %2373 = vst [vmem:[%s4133_s5 + $0x10] sm:$0xff] %v3619_v46  ;;  %1047 = vmatmul.mubr.f32.vlgmr.msra.gmra.mxu0 %v3619_v46  ;;  %2693 = vmatmul.mubr.f32.vlgmr.msra.gmra.mxu1 %v3619_v46 }
 0x31b   :  { %1250 = vmatpush1.msra.mxu0 %v3466_v12  ;;  %1313 = vmatprep.mubr.f32.mxu0 %v4155_v0 }
 0x31c   :  { %1251 = vmatprep.subr.mxu0 %v3469_v14  ;;  %2727 = vmatprep.mubr.msk.f32.mxu1 %vm2959_vm0, %v4155_v0 }
 0x31d   :  { %1252 = vmatpush1.msra.mxu0 %v3472_v17  ;;  %2696 = vmatpush3.msra.mxu1 %v3662_v8 }
 0x31e   :  { %1253 = vmatprep.subr.mxu0 %v3475_v21  ;;  %2697 = vmatprep.subr.mxu1 %v4155_v0 }
 0x31f   :  { %1254 = vmatpush1.msra.mxu0 %v3478_v25  ;;  %2698 = vmatpush3.msra.mxu1 %v3666_v53 }
 0x320   :  { %1255 = vmatprep.subr.mxu0 %v3481_v29  ;;  %2699 = vmatprep.subr.mxu1 %v4155_v0 }
 0x321   :  { %1256 = vmatpush1.msra.mxu0 %v3484_v31  ;;  %2700 = vmatpush3.msra.mxu1 %v3670_v23 }
 0x322   :  { %1257 = vmatprep.subr.mxu0 %v3487_v54  ;;  %2701 = vmatprep.subr.mxu1 %v4155_v0 }
 0x323   :  { %1258 = vmatpush1.msra.mxu0 %v3490_v55  ;;  %2702 = vmatpush3.msra.mxu1 %v3674_v24 }
 0x324   :  { %1259 = vmatprep.subr.mxu0 %v3493_v56  ;;  %2703 = vmatprep.subr.mxu1 %v4155_v0 }
 0x325   :  { %1260 = vmatpush1.msra.mxu0 %v3496_v57 }
 0x326   :  { %1261 = vmatprep.subr.mxu0 %v3499_v58 }
 0x327   :  { %1262 = vmatpush1.msra.mxu0 %v3502_v59 }
 0x328   :  { %1263 = vmatprep.subr.mxu0 %v3505_v62 }
 0x329   :  { %1264 = vmatpush1.msra.mxu0 %v3508_v63 }
 0x32a   :  { %1265 = vmatprep.subr.mxu0 %v3511_v32 }
 0x32b   :  { %1266 = vmatpush1.msra.mxu0 %v3514_v34 }
 0x32c   :  { %1267 = vmatprep.subr.mxu0 %v3520_v36 }
 0x32d   :  { %1268 = vmatpush1.msra.mxu0 %v3524_v60 }
 0x32e   :  { %1269 = vmatprep.subr.mxu0 %v3530_v38 }
 0x32f   :  { %1270 = vmatpush1.msra.mxu0 %v3534_v39 }
 0x330   :  { %1271 = vmatprep.subr.mxu0 %v3540_v61 }
 0x331   :  { %1272 = vmatpush1.msra.mxu0 %v3544_v18 }
 0x332   :  { %1273 = vmatprep.subr.mxu0 %v3550_v3 }
 0x333   :  { %1274 = vmatpush1.msra.mxu0 %v3554_v4 }
 0x334   :  { %1275 = vmatprep.subr.mxu0 %v3560_v6 }
 0x335   :  { %1276 = vmatpush1.msra.mxu0 %v3564_v7 }
 0x336   :  { %1277 = vmatprep.subr.mxu0 %v3570_v11 }
 0x337   :  { %1278 = vmatpush1.msra.mxu0 %v3574_v13 }
 0x338   :  { %1279 = vmatprep.subr.mxu0 %v3578_v16 }
 0x339   :  { %1280 = vmatpush1.msra.mxu0 %v3582_v19 }
 0x33a   :  { %1516 = vmatprep.subr.mxu0 %v3463_v10  ;;  %v3678_v10 = vld [vmem:[#allocation7 + $0x118] sm:$0xff] }
 0x33b   :  { %2704 = vmatpush3.msra.mxu1 %v3678_v10 }
 0x33c   :  { %2705 = vmatprep.subr.mxu1 %v4155_v0 }
 0x33d   :  { %2706 = vmatpush3.msra.mxu1 %v3682_v45 }
 0x33e   :  { %2707 = vmatprep.subr.mxu1 %v4155_v0 }
 0x33f   :  { %2708 = vmatpush3.msra.mxu1 %v3686_v47 }
 0x340   :  { %2709 = vmatprep.subr.mxu1 %v4155_v0 }
 0x341   :  { %2710 = vmatpush3.msra.mxu1 %v3690_v48 }
 0x342   :  { %2711 = vmatprep.subr.mxu1 %v4155_v0 }
 0x343   :  { %2712 = vmatpush3.msra.mxu1 %v3516_v35 }
 0x344   :  { %2713 = vmatprep.subr.mxu1 %v4155_v0 }
 0x345   :  { %2714 = vmatpush3.msra.mxu1 %v3526_v37 }
 0x346   :  { %2715 = vmatprep.subr.mxu1 %v4155_v0 }
 0x347   :  { %2716 = vmatpush3.msra.mxu1 %v3536_v1 }
 0x348   :  { %2717 = vmatprep.subr.mxu1 %v4155_v0 }
 0x349   :  { %2718 = vmatpush3.msra.mxu1 %v3546_v2 }
 0x34a   :  { %2719 = vmatprep.subr.mxu1 %v4155_v0 }
 0x34b   :  { %2720 = vmatpush3.msra.mxu1 %v3556_v5 }
 0x34c   :  { %2721 = vmatprep.subr.mxu1 %v4155_v0 }
 0x34d   :  { %2722 = vmatpush3.msra.mxu1 %v3566_v9 }
 0x34e   :  { %2723 = vmatprep.subr.mxu1 %v4155_v0 }
 0x34f   :  { %2724 = vmatpush3.msra.mxu1 %v3576_v15 }
 0x350   :  { %2725 = vmatprep.subr.mxu1 %v4155_v0 }
 0x351   :  { %2726 = vmatpush3.msra.mxu1 %v3584_v20 }
 0x352   :  { %2730 = vmatprep.subr.mxu1 %v4155_v0 }
 0x3da   :  { %v1048_v22 = vpop.f32.mrf.mxu0  ;;  %v1119_v44 = vpop.f32.mrf.mxu1 }
 0x3db   :  { %v1123_v52 = vadd.f32 %v1048_v22, %v931_v49  ;;  %v1133_v15 = vadd.f32 %v1119_v44, %v3331_v33  ;;  %v4167_v33 = vld [vmem:[#allocation13_spill] sm:$0xff]  ;;  %v3903_v44 = vld [vmem:[#allocation7 + $0xf0] sm:$0xff] }
 0x3dc   :  { %v2694_v27 = vpop.f32.mrf.mxu1  ;;  %v1050_v30 = vpop.f32.mrf.mxu0 }
 0x3dd   :  { %v1124_v28 = vmul.f32 0.5, %v1123_v52  ;;  %v1128_v40 = vadd.f32 %v1050_v30, %v932_v51  ;;  %v3897_v51 = vld [vmem:[#allocation7 + $0x108] sm:$0xff]  ;;  %v3906_v27 = vld [vmem:[#allocation7 + $0xe0] sm:$0xff] }
 0x3de   :  { %v3912_v30 = vld [vmem:[#allocation7 + $0xc8] sm:$0xff] }
 0x3df   :  { %2862 = vtanh.f32 %v1124_v28  ;;  %v1129_v20 = vmul.f32 0.5, %v1128_v40  ;;  %v3909_v28 = vld [vmem:[#allocation7 + $0xd8] sm:$0xff]  ;;  %v3915_v40 = vld [vmem:[#allocation7 + $0xc0] sm:$0xff] }
 0x3e1   :  { %2864 = vtanh.f32 %v1129_v20 }
 0x3ec   :  { %v2863_v41 = vpop.eup %2862 }
 0x3ed   :  { %v1126_v19 = vadd.f32 1.0, %v2863_v41  ;;  %v3918_v41 = vld [vmem:[#allocation7 + $0xb0] sm:$0xff] }
 0x3ee   :  { %v2865_v26 = vpop.eup %2864 }
 0x3ef   :  { %v1127_v16 = vmul.f32 0.5, %v1126_v19  ;;  %v1131_v43 = vadd.f32 1.0, %v2865_v26  ;;  %v3900_v26 = vld [vmem:[#allocation7 + $0xf8] sm:$0xff] }
 0x3f1   :  { %v1134_v42 = vmul.f32 %v1133_v15, %v1127_v16  ;;  %v1132_v9 = vmul.f32 0.5, %v1131_v43  ;;  %v3923_v43 = vld [vmem:[#allocation7 + $0xb8] sm:$0xff] }
 0x3f3   :  { %v1135_v13 = vadd.f32 %v1134_v42, %v933_v50  ;;  %v3894_v50 = vld [vmem:[#allocation7 + $0x110] sm:$0xff]  ;;  %v3921_v42 = vld [vmem:[#allocation7 + $0xa8] sm:$0xff] }
 0x3f5   :  { %2866 = vtanh.f32 %v1135_v13 }
 0x402   :  { %v2867_v11 = vpop.eup %2866 }
 0x403   :  { %v1137_v49 = vsub.f32 %v3619_v46, %v2867_v11 }
 0x405   :  { %v1138_v22 = vmul.f32 %v1137_v49, %v1132_v9  ;;  %v3927_v49 = vld [vmem:[#allocation7 + $0x98] sm:$0xff] }
 0x407   :  { %v3737_v52 = vadd.f32 %v2867_v11, %v1138_v22  ;;  %v3931_v22 = vld [vmem:[#allocation7 + $0x90] sm:$0xff] }
 0x409   :  { %2382 = vst [vmem:[%s4133_s5 + $0x18] sm:$0xff] %v3737_v52  ;;  %1314 = vmatmul.mubr.f32.vlgmr.msra.gmra.mxu0 %v3737_v52  ;;  %2728 = vmatmul.mubr.f32.vlgmr.msra.gmra.mxu1 %v3737_v52 }
 0x40a   :  { %1517 = vmatpush1.msra.mxu0 %v3466_v12  ;;  %2731 = vmatpush3.msra.mxu1 %v3662_v8  ;;  %v4168_v12 = vld [vmem:[#allocation14_spill] sm:$0xff] }
 0x40b   :  { %1518 = vmatprep.subr.mxu0 %v3469_v14  ;;  %2732 = vmatprep.subr.mxu1 %v4155_v0  ;;  %v4169_v14 = vld [vmem:[#allocation15_spill] sm:$0xff] }
 0x40c   :  { %1519 = vmatpush1.msra.mxu0 %v3472_v17  ;;  %2733 = vmatpush3.msra.mxu1 %v3666_v53  ;;  %v4170_v17 = vld [vmem:[#allocation16_spill] sm:$0xff] }
 0x40d   :  { %1520 = vmatprep.subr.mxu0 %v3475_v21  ;;  %2734 = vmatprep.subr.mxu1 %v4155_v0  ;;  %v4171_v21 = vld [vmem:[#allocation17_spill] sm:$0xff] }
 0x40e   :  { %1521 = vmatpush1.msra.mxu0 %v3478_v25  ;;  %2735 = vmatpush3.msra.mxu1 %v3670_v23  ;;  %v4172_v25 = vld [vmem:[#allocation18_spill] sm:$0xff] }
 0x40f   :  { %1522 = vmatprep.subr.mxu0 %v3481_v29  ;;  %2736 = vmatprep.subr.mxu1 %v4155_v0  ;;  %v4173_v29 = vld [vmem:[#allocation19_spill] sm:$0xff] }
 0x410   :  { %1523 = vmatpush1.msra.mxu0 %v3484_v31  ;;  %2737 = vmatpush3.msra.mxu1 %v3674_v24  ;;  %v1198_v31 = vld [vmem:[#allocation2] sm:$0xff] }
 0x411   :  { %1524 = vmatprep.subr.mxu0 %v3487_v54  ;;  %2738 = vmatprep.subr.mxu1 %v4155_v0  ;;  %v1200_v54 = vld [vmem:[#allocation2 + $0x10] sm:$0xff] }
 0x412   :  { %1525 = vmatpush1.msra.mxu0 %v3490_v55  ;;  %2739 = vmatpush3.msra.mxu1 %v3678_v10  ;;  %v1199_v55 = vld [vmem:[#allocation2 + $0x8] sm:$0xff] }
 0x413   :  { %1526 = vmatprep.subr.mxu0 %v3493_v56  ;;  %2740 = vmatprep.subr.mxu1 %v4155_v0  ;;  %v1413_v56 = vld [vmem:[%s1412_s2] sm:$0x7]  ;;  %s1699_s2 = smul.u32 3, %s2404_s10 }
 0x414   :  { %1527 = vmatpush1.msra.mxu0 %v3496_v57  ;;  %2741 = vmatpush3.msra.mxu1 %v3682_v45  ;;  %1414 = vst.msk [vmem:[#allocation2] ss:$8 sm:$0x7] %vm3102_vm1, %v1413_v56  ;;  %v3971_v56 = vld [vmem:[#allocation7 + $0x30] sm:$0xff]  ;;  %s1945_s10 = smul.u32 3, %s2410_s29 }
 0x415   :  { %1528 = vmatprep.subr.mxu0 %v3499_v58  ;;  %2742 = vmatprep.subr.mxu1 %v4155_v0  ;;  %v1420_v58 = vld [vmem:[%s1419_s18] sm:$0x7]  ;;  %s1706_s18 = smul.u32 3, %s2405_s11  ;;  %s1700_s21 = scalar_lea.vmem [#allocation5], %s1699_s2 }
 0x416   :  { %1529 = vmatpush1.msra.mxu0 %v3502_v59  ;;  %2743 = vmatpush3.msra.mxu1 %v3686_v47  ;;  %1421 = vst.msk [vmem:[#allocation2 + $0x1] ss:$8 sm:$0x7] %vm3102_vm1, %v1420_v58  ;;  %v1427_v59 = vld [vmem:[%s1426_s20] sm:$0x7]  ;;  %v3973_v58 = vld [vmem:[#allocation7 + $0x40] sm:$0xff] }
 0x417   :  { %1530 = vmatprep.subr.mxu0 %v3505_v62  ;;  %2744 = vmatprep.subr.mxu1 %v4155_v0  ;;  %1428 = vst.msk [vmem:[#allocation2 + $0x2] ss:$8 sm:$0x7] %vm3102_vm1, %v1427_v59  ;;  %v1434_v62 = vld [vmem:[%s1433_s22] sm:$0x7]  ;;  %v3977_v59 = vld [vmem:[#allocation7 + $0x20] sm:$0xff] }
 0x418   :  { %1531 = vmatpush1.msra.mxu0 %v3508_v63  ;;  %2745 = vmatpush3.msra.mxu1 %v3690_v48  ;;  %1435 = vst.msk [vmem:[#allocation2 + $0x3] ss:$8 sm:$0x7] %vm3102_vm1, %v1434_v62  ;;  %v1441_v63 = vld [vmem:[%s1440_s24] sm:$0x7]  ;;  %s1713_s20 = smul.u32 3, %s3999_s12 }
 0x419   :  { %1532 = vmatprep.subr.mxu0 %v3511_v32  ;;  %2746 = vmatprep.subr.mxu1 %v4155_v0  ;;  %1442 = vst.msk [vmem:[#allocation2 + $0x4] ss:$8 sm:$0x7] %vm3102_vm1, %v1441_v63  ;;  %v1448_v32 = vld [vmem:[%s1447_s26] sm:$0x7]  ;;  %v3983_v63 = vld [vmem:[#allocation7 + $0x28] sm:$0xff] }
 0x41a   :  { %1533 = vmatpush1.msra.mxu0 %v3514_v34  ;;  %2747 = vmatpush3.msra.mxu1 %v3516_v35  ;;  %1449 = vst.msk [vmem:[#allocation2 + $0x5] ss:$8 sm:$0x7] %vm3102_vm1, %v1448_v32  ;;  %v1455_v34 = vld [vmem:[%s1454_s27] sm:$0x7]  ;;  %v3985_v32 = vld [vmem:[#allocation7 + $0x8] sm:$0xff] }
 0x41b   :  { %1534 = vmatprep.subr.mxu0 %v3520_v36  ;;  %2748 = vmatprep.subr.mxu1 %v4155_v0  ;;  %1456 = vst.msk [vmem:[#allocation2 + $0x6] ss:$8 sm:$0x7] %vm3102_vm1, %v1455_v34  ;;  %v1462_v35 = vld [vmem:[%s1461_s28] sm:$0x7]  ;;  %v3989_v34 = vld [vmem:[#allocation7] sm:$0xff] }
 0x41c   :  { %1535 = vmatpush1.msra.mxu0 %v3524_v60  ;;  %2749 = vmatpush3.msra.mxu1 %v3526_v37  ;;  %1463 = vst.msk [vmem:[#allocation2 + $0x7] ss:$8 sm:$0x7] %vm3102_vm1, %v1462_v35  ;;  %v3981_v62 = vld [vmem:[#allocation7 + $0x18] sm:$0xff]  ;;  %v3991_v35 = vld [vmem:[#allocation7 + $0x10] sm:$0xff]  ;;  %s1720_s22 = smul.u32 3, %s4001_s4 }
 0x41d   :  { %1536 = vmatprep.subr.mxu0 %v3530_v38  ;;  %2750 = vmatprep.subr.mxu1 %v4155_v0  ;;  %s1707_s23 = scalar_lea.vmem [#allocation5], %s1706_s18  ;;  %s1727_s24 = smul.u32 3, %s4003_s1 }
 0x41e   :  { %1537 = vmatpush1.msra.mxu0 %v3534_v39  ;;  %2751 = vmatpush3.msra.mxu1 %v3536_v1  ;;  %s1714_s25 = scalar_lea.vmem [#allocation5], %s1713_s20  ;;  %s1721_s26 = scalar_lea.vmem [#allocation5], %s1720_s22 }
 0x41f   :  { %1538 = vmatprep.subr.mxu0 %v3540_v61  ;;  %2752 = vmatprep.subr.mxu1 %v4155_v0  ;;  %s1728_s27 = scalar_lea.vmem [#allocation5], %s1727_s24  ;;  %s4093_s11 = sld [smem:[#allocation4 + $0x307]] }
 0x420   :  { %1539 = vmatpush1.msra.mxu0 %v3544_v18  ;;  %2753 = vmatpush3.msra.mxu1 %v3546_v2  ;;  %s1952_s12 = smul.u32 3, %s2411_s30  ;;  %s1946_s14 = scalar_lea.vmem [#allocation5], %s1945_s10 }
 0x421   :  { %1540 = vmatprep.subr.mxu0 %v3550_v3  ;;  %2754 = vmatprep.subr.mxu1 %v4155_v0  ;;  %s1959_s4 = smul.u32 3, %s2412_s7 }
 0x422   :  { %1541 = vmatpush1.msra.mxu0 %v3554_v4  ;;  %2755 = vmatpush3.msra.mxu1 %v3556_v5  ;;  %v3839_v5 = vld [vmem:[%s4131_s3] sm:$0xff]  ;;  %s2401_s3 = sld [smem:[#allocation4 + $0x6]]  ;;  %s1953_s15 = scalar_lea.vmem [#allocation5], %s1952_s12 }
 0x423   :  { %1542 = vmatprep.subr.mxu0 %v3560_v6  ;;  %2756 = vmatprep.subr.mxu1 %v4155_v0  ;;  %s1960_s2 = scalar_lea.vmem [#allocation5], %s1959_s4 }
 0x424   :  { %1543 = vmatpush1.msra.mxu0 %v3564_v7  ;;  %2757 = vmatpush3.msra.mxu1 %v4167_v33  ;;  %v3937_v33 = vld [vmem:[#allocation7 + $0x80] sm:$0xff] }
 0x425   :  { %1544 = vmatprep.subr.mxu0 %v4168_v12  ;;  %2758 = vmatprep.subr.mxu1 %v4155_v0  ;;  %v3941_v12 = vld [vmem:[#allocation7 + $0x78] sm:$0xff] }
 0x426   :  { %1545 = vmatpush1.msra.mxu0 %v4169_v14  ;;  %2759 = vmatpush3.msra.mxu1 %v4170_v17  ;;  %v3943_v14 = vld [vmem:[#allocation7 + $0x88] sm:$0xff] }
 0x427   :  { %1546 = vmatprep.subr.mxu0 %v4171_v21  ;;  %2760 = vmatprep.subr.mxu1 %v4155_v0  ;;  %v3947_v17 = vld [vmem:[#allocation7 + $0x68] sm:$0xff]  ;;  %v3951_v21 = vld [vmem:[#allocation7 + $0x60] sm:$0xff] }
 0x428   :  { %1547 = vmatpush1.msra.mxu0 %v4172_v25  ;;  %1580 = vmatprep.mubr.f32.mxu0 %v4155_v0  ;;  %v3953_v25 = vld [vmem:[#allocation7 + $0x70] sm:$0xff]  ;;  %s1678_s13 = smul.u32 3, %s2401_s3  ;;  %s2413_s3 = sld [smem:[#allocation4 + $0x187]] }
 0x429   :  { %2761 = vmatpush3.msra.mxu1 %v4173_v29  ;;  %2762 = vmatprep.mubr.msk.f32.mxu1 %vm2959_vm0, %v4155_v0  ;;  %v3957_v29 = vld [vmem:[#allocation7 + $0x50] sm:$0xff] }
 0x42a   :  { %2765 = vmatprep.subr.mxu1 %v4155_v0  ;;  %s1679_s16 = scalar_lea.vmem [#allocation5], %s1678_s13  ;;  %s4095_s13 = sld [smem:[#allocation4 + $0x387]] }
 0x42e   :  { %s1966_s1 = smul.u32 3, %s2413_s3 }
 0x430   :  { %s1967_s18 = scalar_lea.vmem [#allocation5], %s1966_s1 }
 0x4c9   :  { %v1315_v36 = vpop.f32.mrf.mxu0  ;;  %v1386_v60 = vpop.f32.mrf.mxu1 }
 0x4ca   :  { %v1390_v37 = vadd.f32 %v1315_v36, %v1198_v31  ;;  %v1400_v6 = vadd.f32 %v3839_v5, %v1386_v60  ;;  %v3961_v31 = vld [vmem:[#allocation7 + $0x48] sm:$0xff]  ;;  %v1465_v36 = vld [vmem:[#allocation2] sm:$0xff] }
 0x4cb   :  { %v2729_v38 = vpop.f32.mrf.mxu1  ;;  %v1317_v1 = vpop.f32.mrf.mxu0  ;;  %v1467_v60 = vld [vmem:[#allocation2 + $0x10] sm:$0xff] }
 0x4cc   :  { %v1391_v39 = vmul.f32 0.5, %v1390_v37  ;;  %v1395_v61 = vadd.f32 %v1317_v1, %v1199_v55  ;;  %v3967_v55 = vld [vmem:[#allocation7 + $0x38] sm:$0xff]  ;;  %v1466_v37 = vld [vmem:[#allocation2 + $0x8] sm:$0xff] }
 0x4cd   :  { %v1680_v38 = vld [vmem:[%s1679_s16] sm:$0x7]  ;;  %s1973_s16 = smul.u32 3, %s2414_s8 }
 0x4ce   :  { %2868 = vtanh.f32 %v1391_v39  ;;  %v1396_v18 = vmul.f32 0.5, %v1395_v61  ;;  %1681 = vst.msk [vmem:[#allocation2] ss:$8 sm:$0x7] %vm3102_vm1, %v1680_v38  ;;  %v1687_v39 = vld [vmem:[%s1686_s17] sm:$0x7] }
 0x4cf   :  { %1688 = vst.msk [vmem:[#allocation2 + $0x1] ss:$8 sm:$0x7] %vm3102_vm1, %v1687_v39  ;;  %v1694_v1 = vld [vmem:[%s1693_s19] sm:$0x7]  ;;  %s1980_s17 = smul.u32 3, %s4091_s9 }
 0x4d0   :  { %2870 = vtanh.f32 %v1396_v18  ;;  %1695 = vst.msk [vmem:[#allocation2 + $0x2] ss:$8 sm:$0x7] %vm3102_vm1, %v1694_v1  ;;  %v1701_v61 = vld [vmem:[%s1700_s21] sm:$0x7]  ;;  %s1987_s19 = smul.u32 3, %s4093_s11 }
 0x4d1   :  { %1702 = vst.msk [vmem:[#allocation2 + $0x3] ss:$8 sm:$0x7] %vm3102_vm1, %v1701_v61  ;;  %v1708_v18 = vld [vmem:[%s1707_s23] sm:$0x7]  ;;  %s1974_s20 = scalar_lea.vmem [#allocation5], %s1973_s16 }
 0x4d2   :  { %1709 = vst.msk [vmem:[#allocation2 + $0x4] ss:$8 sm:$0x7] %vm3102_vm1, %v1708_v18  ;;  %s1994_s21 = smul.u32 3, %s4095_s13  ;;  %s1981_s22 = scalar_lea.vmem [#allocation5], %s1980_s17 }
 0x4d3   :  { %s1988_s23 = scalar_lea.vmem [#allocation5], %s1987_s19 }
 0x4d4   :  { %s1995_s24 = scalar_lea.vmem [#allocation5], %s1994_s21 }
 0x4db   :  { %v2869_v2 = vpop.eup %2868 }
 0x4dc   :  { %v1393_v3 = vadd.f32 1.0, %v2869_v2  ;;  %v1715_v2 = vld [vmem:[%s1714_s25] sm:$0x7] }
 0x4dd   :  { %v2871_v11 = vpop.eup %2870  ;;  %1716 = vst.msk [vmem:[#allocation2 + $0x5] ss:$8 sm:$0x7] %vm3102_vm1, %v1715_v2 }
 0x4de   :  { %v1394_v4 = vmul.f32 0.5, %v1393_v3  ;;  %v1398_v13 = vadd.f32 1.0, %v2871_v11  ;;  %v1722_v3 = vld [vmem:[%s1721_s26] sm:$0x7] }
 0x4df   :  { %1723 = vst.msk [vmem:[#allocation2 + $0x6] ss:$8 sm:$0x7] %vm3102_vm1, %v1722_v3 }
 0x4e0   :  { %v1401_v7 = vmul.f32 %v1400_v6, %v1394_v4  ;;  %v1399_v16 = vmul.f32 0.5, %v1398_v13  ;;  %v1729_v4 = vld [vmem:[%s1728_s27] sm:$0x7] }
 0x4e1   :  { %1730 = vst.msk [vmem:[#allocation2 + $0x7] ss:$8 sm:$0x7] %vm3102_vm1, %v1729_v4 }
 0x4e2   :  { %v1402_v9 = vadd.f32 %v1401_v7, %v1200_v54  ;;  %v3963_v54 = vld [vmem:[#allocation7 + $0x58] sm:$0xff] }
 0x4e4   :  { %2872 = vtanh.f32 %v1402_v9 }
 0x4f1   :  { %v2873_v15 = vpop.eup %2872 }
 0x4f2   :  { %v1404_v19 = vsub.f32 %v3737_v52, %v2873_v15  ;;  %v3933_v52 = vld [vmem:[#allocation7 + $0xa0] sm:$0xff] }
 0x4f4   :  { %v1405_v20 = vmul.f32 %v1404_v19, %v1399_v16 }
 0x4f6   :  { %v3843_v46 = vadd.f32 %v2873_v15, %v1405_v20 }
 0x4f8   :  { %2391 = vst [vmem:[%s4133_s5 + $0x20] sm:$0xff] %v3843_v46  ;;  %1581 = vmatmul.mubr.f32.vlgmr.msra.gmra.mxu0 %v3843_v46  ;;  %2763 = vmatmul.mubr.f32.vlgmr.msra.gmra.mxu1 %v3843_v46 }
 0x4f9   :  { %2766 = vmatpush3.msra.mxu1 %v3662_v8  ;;  %1847 = vmatprep.mubr.f32.mxu0 %v4155_v0  ;;  %v3870_v8 = vld [vmem:[#allocation7 + $0x170] sm:$0xff] }
 0x4fa   :  { %2767 = vmatprep.subr.mxu1 %v4155_v0  ;;  %2797 = vmatprep.mubr.msk.f32.mxu1 %vm2959_vm0, %v4155_v0 }
 0x4fb   :  { %2768 = vmatpush3.msra.mxu1 %v3666_v53  ;;  %1783 = vmatprep.subr.mxu0 %v3870_v8  ;;  %v3873_v53 = vld [vmem:[#allocation7 + $0x168] sm:$0xff] }
 0x4fc   :  { %2769 = vmatprep.subr.mxu1 %v4155_v0  ;;  %1784 = vmatpush1.msra.mxu0 %v3873_v53 }
 0x4fd   :  { %2770 = vmatpush3.msra.mxu1 %v3670_v23  ;;  %v3876_v23 = vld [vmem:[#allocation7 + $0x158] sm:$0xff] }
 0x4fe   :  { %2771 = vmatprep.subr.mxu1 %v4155_v0  ;;  %1785 = vmatprep.subr.mxu0 %v3876_v23 }
 0x4ff   :  { %2772 = vmatpush3.msra.mxu1 %v3674_v24  ;;  %v3879_v24 = vld [vmem:[#allocation7 + $0x150] sm:$0xff] }
 0x500   :  { %2773 = vmatprep.subr.mxu1 %v4155_v0  ;;  %1786 = vmatpush1.msra.mxu0 %v3879_v24 }
 0x501   :  { %2774 = vmatpush3.msra.mxu1 %v3678_v10  ;;  %v3882_v10 = vld [vmem:[#allocation7 + $0x140] sm:$0xff] }
 0x502   :  { %2775 = vmatprep.subr.mxu1 %v4155_v0  ;;  %1787 = vmatprep.subr.mxu0 %v3882_v10 }
 0x503   :  { %2776 = vmatpush3.msra.mxu1 %v3682_v45  ;;  %v3885_v45 = vld [vmem:[#allocation7 + $0x138] sm:$0xff] }
 0x504   :  { %2777 = vmatprep.subr.mxu1 %v4155_v0  ;;  %1788 = vmatpush1.msra.mxu0 %v3885_v45 }
 0x505   :  { %2778 = vmatpush3.msra.mxu1 %v3686_v47  ;;  %v3888_v47 = vld [vmem:[#allocation7 + $0x128] sm:$0xff] }
 0x506   :  { %2779 = vmatprep.subr.mxu1 %v4155_v0  ;;  %1789 = vmatprep.subr.mxu0 %v3888_v47 }
 0x507   :  { %2780 = vmatpush3.msra.mxu1 %v3690_v48  ;;  %v3891_v48 = vld [vmem:[#allocation7 + $0x120] sm:$0xff] }
 0x508   :  { %2781 = vmatprep.subr.mxu1 %v4155_v0  ;;  %1790 = vmatpush1.msra.mxu0 %v3891_v48 }
 0x509   :  { %1791 = vmatprep.subr.mxu0 %v3894_v50  ;;  %2782 = vmatpush3.msra.mxu1 %v3923_v43 }
 0x50a   :  { %1792 = vmatpush1.msra.mxu0 %v3897_v51  ;;  %2783 = vmatprep.subr.mxu1 %v4155_v0 }
 0x50b   :  { %1793 = vmatprep.subr.mxu0 %v3900_v26  ;;  %2784 = vmatpush3.msra.mxu1 %v3933_v52 }
 0x50c   :  { %1794 = vmatpush1.msra.mxu0 %v3903_v44  ;;  %2785 = vmatprep.subr.mxu1 %v4155_v0 }
 0x50d   :  { %1795 = vmatprep.subr.mxu0 %v3906_v27  ;;  %2786 = vmatpush3.msra.mxu1 %v3943_v14 }
 0x50e   :  { %1796 = vmatpush1.msra.mxu0 %v3909_v28  ;;  %2787 = vmatprep.subr.mxu1 %v4155_v0 }
 0x50f   :  { %1797 = vmatprep.subr.mxu0 %v3912_v30  ;;  %2788 = vmatpush3.msra.mxu1 %v3953_v25 }
 0x510   :  { %1798 = vmatpush1.msra.mxu0 %v3915_v40  ;;  %2789 = vmatprep.subr.mxu1 %v4155_v0 }
 0x511   :  { %1799 = vmatprep.subr.mxu0 %v3918_v41  ;;  %2790 = vmatpush3.msra.mxu1 %v3963_v54 }
 0x512   :  { %1800 = vmatpush1.msra.mxu0 %v3921_v42  ;;  %2791 = vmatprep.subr.mxu1 %v4155_v0 }
 0x513   :  { %1801 = vmatprep.subr.mxu0 %v3927_v49  ;;  %2792 = vmatpush3.msra.mxu1 %v3973_v58 }
 0x514   :  { %1802 = vmatpush1.msra.mxu0 %v3931_v22  ;;  %2793 = vmatprep.subr.mxu1 %v4155_v0 }
 0x515   :  { %1803 = vmatprep.subr.mxu0 %v3937_v33  ;;  %2794 = vmatpush3.msra.mxu1 %v3983_v63 }
 0x516   :  { %1804 = vmatpush1.msra.mxu0 %v3941_v12  ;;  %2795 = vmatprep.subr.mxu1 %v4155_v0 }
 0x517   :  { %1805 = vmatprep.subr.mxu0 %v3947_v17  ;;  %2796 = vmatpush3.msra.mxu1 %v3991_v35 }
 0x518   :  { %1806 = vmatpush1.msra.mxu0 %v3951_v21  ;;  %2800 = vmatprep.subr.mxu1 %v4155_v0 }
 0x519   :  { %1807 = vmatprep.subr.mxu0 %v3957_v29 }
 0x51a   :  { %1808 = vmatpush1.msra.mxu0 %v3961_v31 }
 0x51b   :  { %1809 = vmatprep.subr.mxu0 %v3967_v55 }
 0x51c   :  { %1810 = vmatpush1.msra.mxu0 %v3971_v56 }
 0x51d   :  { %1811 = vmatprep.subr.mxu0 %v3977_v59 }
 0x51e   :  { %1812 = vmatpush1.msra.mxu0 %v3981_v62 }
 0x51f   :  { %1813 = vmatprep.subr.mxu0 %v3985_v32 }
 0x520   :  { %1814 = vmatpush1.msra.mxu0 %v3989_v34 }
 0x521   :  { %2050 = vmatprep.subr.mxu0 %v3870_v8 }
 0x5b8   :  { %v1582_v6 = vpop.f32.mrf.mxu0  ;;  %v1653_v7 = vpop.f32.mrf.mxu1 }
 0x5b9   :  { %v1657_v9 = vadd.f32 %v1582_v6, %v1465_v36  ;;  %v1667_v39 = vadd.f32 %v3839_v5, %v1653_v7 }
 0x5ba   :  { %v2764_v11 = vpop.f32.mrf.mxu1  ;;  %v1584_v15 = vpop.f32.mrf.mxu0 }
 0x5bb   :  { %v1658_v13 = vmul.f32 0.5, %v1657_v9  ;;  %v1662_v16 = vadd.f32 %v1584_v15, %v1466_v37 }
 0x5bd   :  { %2874 = vtanh.f32 %v1658_v13  ;;  %v1663_v19 = vmul.f32 0.5, %v1662_v16 }
 0x5bf   :  { %2876 = vtanh.f32 %v1663_v19 }
 0x5ca   :  { %v2875_v20 = vpop.eup %2874 }
 0x5cb   :  { %v1660_v8 = vadd.f32 1.0, %v2875_v20 }
 0x5cc   :  { %v2877_v18 = vpop.eup %2876 }
 0x5cd   :  { %v1661_v38 = vmul.f32 0.5, %v1660_v8  ;;  %v1665_v2 = vadd.f32 1.0, %v2877_v18 }
 0x5cf   :  { %v1668_v1 = vmul.f32 %v1667_v39, %v1661_v38  ;;  %v1666_v4 = vmul.f32 0.5, %v1665_v2 }
 0x5d1   :  { %v1669_v61 = vadd.f32 %v1668_v1, %v1467_v60 }
 0x5d3   :  { %2878 = vtanh.f32 %v1669_v61 }
 0x5e0   :  { %v2879_v3 = vpop.eup %2878 }
 0x5e1   :  { %v1671_v36 = vsub.f32 %v3843_v46, %v2879_v3  ;;  %v2049_v46 = vld [vmem:[#allocation7 + $0x178] sm:$0xff] }
 0x5e3   :  { %v1672_v6 = vmul.f32 %v1671_v36, %v1666_v4 }
 0x5e5   :  { %v4026_v9 = vadd.f32 %v2879_v3, %v1672_v6 }
 0x5e7   :  { %2400 = vst [vmem:[%s4133_s5 + $0x28] sm:$0xff] %v4026_v9  ;;  %1848 = vmatmul.mubr.f32.vlgmr.msra.gmra.mxu0 %v4026_v9  ;;  %2798 = vmatmul.mubr.f32.vlgmr.msra.gmra.mxu1 %v4026_v9 }
 0x5e8   :  { %2051 = vmatpush1.msra.mxu0 %v3873_v53  ;;  %2114 = vmatprep.mubr.f32.mxu0 %v4155_v0  ;;  %v2046_v53 = vld [vmem:[#allocation7 + $0x160] sm:$0xff] }
 0x5e9   :  { %2052 = vmatprep.subr.mxu0 %v3876_v23  ;;  %2832 = vmatprep.mubr.msk.f32.mxu1 %vm2959_vm0, %v4155_v0  ;;  %v2043_v23 = vld [vmem:[#allocation7 + $0x148] sm:$0xff] }
 0x5ea   :  { %2053 = vmatpush1.msra.mxu0 %v3879_v24  ;;  %2801 = vmatpush3.msra.mxu1 %v2049_v46  ;;  %v2040_v24 = vld [vmem:[#allocation7 + $0x130] sm:$0xff] }
 0x5eb   :  { %2054 = vmatprep.subr.mxu0 %v3882_v10  ;;  %2802 = vmatprep.subr.mxu1 %v4155_v0  ;;  %v2037_v10 = vld [vmem:[#allocation7 + $0x118] sm:$0xff] }
 0x5ec   :  { %2055 = vmatpush1.msra.mxu0 %v3885_v45  ;;  %2803 = vmatpush3.msra.mxu1 %v2046_v53  ;;  %v2034_v45 = vld [vmem:[#allocation7 + $0x100] sm:$0xff] }
 0x5ed   :  { %2056 = vmatprep.subr.mxu0 %v3888_v47  ;;  %2804 = vmatprep.subr.mxu1 %v4155_v0  ;;  %v2031_v47 = vld [vmem:[#allocation7 + $0xe8] sm:$0xff] }
 0x5ee   :  { %2057 = vmatpush1.msra.mxu0 %v3891_v48  ;;  %2805 = vmatpush3.msra.mxu1 %v2043_v23  ;;  %v2028_v48 = vld [vmem:[#allocation7 + $0xd0] sm:$0xff] }
 0x5ef   :  { %2058 = vmatprep.subr.mxu0 %v3894_v50  ;;  %2806 = vmatprep.subr.mxu1 %v4155_v0  ;;  %v1732_v50 = vld [vmem:[#allocation2] sm:$0xff] }
 0x5f0   :  { %2059 = vmatpush1.msra.mxu0 %v3897_v51  ;;  %2807 = vmatpush3.msra.mxu1 %v2040_v24  ;;  %v1734_v51 = vld [vmem:[#allocation2 + $0x10] sm:$0xff] }
 0x5f1   :  { %2060 = vmatprep.subr.mxu0 %v3900_v26  ;;  %2808 = vmatprep.subr.mxu1 %v4155_v0  ;;  %v1947_v26 = vld [vmem:[%s1946_s14] sm:$0x7] }
 0x5f2   :  { %2061 = vmatpush1.msra.mxu0 %v3903_v44  ;;  %2809 = vmatpush3.msra.mxu1 %v2037_v10  ;;  %v1954_v44 = vld [vmem:[%s1953_s15] sm:$0x7] }
 0x5f3   :  { %2062 = vmatprep.subr.mxu0 %v3906_v27  ;;  %2810 = vmatprep.subr.mxu1 %v4155_v0  ;;  %v1961_v27 = vld [vmem:[%s1960_s2] sm:$0x7] }
 0x5f4   :  { %2063 = vmatpush1.msra.mxu0 %v3909_v28  ;;  %2811 = vmatpush3.msra.mxu1 %v2034_v45  ;;  %v1968_v28 = vld [vmem:[%s1967_s18] sm:$0x7] }
 0x5f5   :  { %2064 = vmatprep.subr.mxu0 %v3912_v30  ;;  %2812 = vmatprep.subr.mxu1 %v4155_v0  ;;  %v1975_v30 = vld [vmem:[%s1974_s20] sm:$0x7] }
 0x5f6   :  { %2065 = vmatpush1.msra.mxu0 %v3915_v40  ;;  %2813 = vmatpush3.msra.mxu1 %v2031_v47  ;;  %v1982_v40 = vld [vmem:[%s1981_s22] sm:$0x7] }
 0x5f7   :  { %2066 = vmatprep.subr.mxu0 %v3918_v41  ;;  %2814 = vmatprep.subr.mxu1 %v4155_v0  ;;  %v1989_v41 = vld [vmem:[%s1988_s23] sm:$0x7] }
 0x5f8   :  { %2067 = vmatpush1.msra.mxu0 %v3921_v42  ;;  %2815 = vmatpush3.msra.mxu1 %v2028_v48  ;;  %v1996_v42 = vld [vmem:[%s1995_s24] sm:$0x7] }
 0x5f9   :  { %2068 = vmatprep.subr.mxu0 %v3927_v49  ;;  %2816 = vmatprep.subr.mxu1 %v4155_v0 }
 0x5fa   :  { %2069 = vmatpush1.msra.mxu0 %v3931_v22  ;;  %2817 = vmatpush3.msra.mxu1 %v3923_v43 }
 0x5fb   :  { %2070 = vmatprep.subr.mxu0 %v3937_v33  ;;  %2818 = vmatprep.subr.mxu1 %v4155_v0 }
 0x5fc   :  { %2071 = vmatpush1.msra.mxu0 %v3941_v12  ;;  %2819 = vmatpush3.msra.mxu1 %v3933_v52 }
 0x5fd   :  { %2072 = vmatprep.subr.mxu0 %v3947_v17  ;;  %2820 = vmatprep.subr.mxu1 %v4155_v0 }
 0x5fe   :  { %2073 = vmatpush1.msra.mxu0 %v3951_v21  ;;  %2821 = vmatpush3.msra.mxu1 %v3943_v14 }
 0x5ff   :  { %2074 = vmatprep.subr.mxu0 %v3957_v29  ;;  %2822 = vmatprep.subr.mxu1 %v4155_v0 }
 0x600   :  { %2075 = vmatpush1.msra.mxu0 %v3961_v31  ;;  %2823 = vmatpush3.msra.mxu1 %v3953_v25 }
 0x601   :  { %2076 = vmatprep.subr.mxu0 %v3967_v55  ;;  %2824 = vmatprep.subr.mxu1 %v4155_v0 }
 0x602   :  { %2077 = vmatpush1.msra.mxu0 %v3971_v56  ;;  %2825 = vmatpush3.msra.mxu1 %v3963_v54 }
 0x603   :  { %2078 = vmatprep.subr.mxu0 %v3977_v59  ;;  %2826 = vmatprep.subr.mxu1 %v4155_v0 }
 0x604   :  { %2079 = vmatpush1.msra.mxu0 %v3981_v62  ;;  %2827 = vmatpush3.msra.mxu1 %v3973_v58 }
 0x605   :  { %2080 = vmatprep.subr.mxu0 %v3985_v32  ;;  %2828 = vmatprep.subr.mxu1 %v4155_v0 }
 0x606   :  { %2081 = vmatpush1.msra.mxu0 %v3989_v34  ;;  %2829 = vmatpush3.msra.mxu1 %v3983_v63 }
 0x607   :  { %2830 = vmatprep.subr.mxu1 %v4155_v0  ;;  %v1733_v0 = vld [vmem:[#allocation2 + $0x8] sm:$0xff] }
 0x608   :  { %2831 = vmatpush3.msra.mxu1 %v3991_v35  ;;  %1948 = vst.msk [vmem:[#allocation2] ss:$8 sm:$0x7] %vm3102_vm1, %v1947_v26  ;;  %1955 = vst.msk [vmem:[#allocation2 + $0x1] ss:$8 sm:$0x7] %vm3102_vm1, %v1954_v44 }
 0x609   :  { %1962 = vst.msk [vmem:[#allocation2 + $0x2] ss:$8 sm:$0x7] %vm3102_vm1, %v1961_v27  ;;  %1969 = vst.msk [vmem:[#allocation2 + $0x3] ss:$8 sm:$0x7] %vm3102_vm1, %v1968_v28 }
 0x60a   :  { %1976 = vst.msk [vmem:[#allocation2 + $0x4] ss:$8 sm:$0x7] %vm3102_vm1, %v1975_v30  ;;  %1983 = vst.msk [vmem:[#allocation2 + $0x5] ss:$8 sm:$0x7] %vm3102_vm1, %v1982_v40 }
 0x60b   :  { %1990 = vst.msk [vmem:[#allocation2 + $0x6] ss:$8 sm:$0x7] %vm3102_vm1, %v1989_v41  ;;  %1997 = vst.msk [vmem:[#allocation2 + $0x7] ss:$8 sm:$0x7] %vm3102_vm1, %v1996_v42 }
 0x612   :  { %v1999_v34 = vld [vmem:[#allocation2] sm:$0xff]  ;;  %v2000_v13 = vld [vmem:[#allocation2 + $0x8] sm:$0xff]  ;;  %v2001_v1 = vld [vmem:[#allocation2 + $0x10] sm:$0xff] }
 0x6a7   :  { %v1849_v43 = vpop.f32.mrf.mxu0  ;;  %v1920_v49 = vpop.f32.mrf.mxu1 }
 0x6a8   :  { %v1924_v22 = vadd.f32 %v1849_v43, %v1732_v50  ;;  %v1934_v31 = vadd.f32 %v3839_v5, %v1920_v49 }
 0x6a9   :  { %v2799_v52 = vpop.f32.mrf.mxu1  ;;  %v1851_v12 = vpop.f32.mrf.mxu0 }
 0x6aa   :  { %v1925_v33 = vmul.f32 0.5, %v1924_v22  ;;  %v1929_v14 = vadd.f32 %v1851_v12, %v1733_v0 }
 0x6ac   :  { %2880 = vtanh.f32 %v1925_v33  ;;  %v1930_v17 = vmul.f32 0.5, %v1929_v14 }
 0x6ae   :  { %2882 = vtanh.f32 %v1930_v17 }
 0x6b9   :  { %v2881_v21 = vpop.eup %2880 }
 0x6ba   :  { %v1927_v25 = vadd.f32 1.0, %v2881_v21 }
 0x6bb   :  { %v2883_v57 = vpop.eup %2882 }
 0x6bc   :  { %v1928_v29 = vmul.f32 0.5, %v1927_v25  ;;  %v1932_v56 = vadd.f32 1.0, %v2883_v57 }
 0x6be   :  { %v1935_v54 = vmul.f32 %v1934_v31, %v1928_v29  ;;  %v1933_v59 = vmul.f32 0.5, %v1932_v56 }
 0x6c0   :  { %v1936_v55 = vadd.f32 %v1935_v54, %v1734_v51 }
 0x6c2   :  { %2884 = vtanh.f32 %v1936_v55 }
 0x6cf   :  { %v2885_v58 = vpop.eup %2884 }
 0x6d0   :  { %v1938_v62 = vsub.f32 %v4026_v9, %v2885_v58 }
 0x6d2   :  { %v1939_v63 = vmul.f32 %v1938_v62, %v1933_v59 }
 0x6d4   :  { %v1940_v32 = vadd.f32 %v2885_v58, %v1939_v63 }
 0x6d6   :  { %2409 = vst [vmem:[%s4133_s5 + $0x30] sm:$0xff] %v1940_v32  ;;  %2115 = vmatmul.mubr.f32.vlgmr.msra.gmra.mxu0 %v1940_v32  ;;  %2833 = vmatmul.mubr.f32.vlgmr.msra.gmra.mxu1 %v1940_v32 }
 0x796   :  { %v2116_v35 = vpop.f32.mrf.mxu0  ;;  %v2187_v60 = vpop.f32.mrf.mxu1 }
 0x797   :  { %v2191_v37 = vadd.f32 %v2116_v35, %v1999_v34  ;;  %v2201_v39 = vadd.f32 %v3839_v5, %v2187_v60 }
 0x798   :  { %v2834_v7 = vpop.f32.mrf.mxu1  ;;  %v2118_v15 = vpop.f32.mrf.mxu0 }
 0x799   :  { %v2192_v11 = vmul.f32 0.5, %v2191_v37  ;;  %v2196_v16 = vadd.f32 %v2118_v15, %v2000_v13 }
 0x79b   :  { %2886 = vtanh.f32 %v2192_v11  ;;  %v2197_v19 = vmul.f32 0.5, %v2196_v16 }
 0x79d   :  { %2888 = vtanh.f32 %v2197_v19 }
 0x7a8   :  { %v2887_v20 = vpop.eup %2886 }
 0x7a9   :  { %v2194_v8 = vadd.f32 1.0, %v2887_v20 }
 0x7aa   :  { %v2889_v2 = vpop.eup %2888 }
 0x7ab   :  { %v2195_v38 = vmul.f32 0.5, %v2194_v8  ;;  %v2199_v3 = vadd.f32 1.0, %v2889_v2 }
 0x7ad   :  { %v2202_v61 = vmul.f32 %v2201_v39, %v2195_v38  ;;  %v2200_v36 = vmul.f32 0.5, %v2199_v3 }
 0x7af   :  { %v2203_v18 = vadd.f32 %v2202_v61, %v2001_v1 }
 0x7b1   :  { %2890 = vtanh.f32 %v2203_v18 }
 0x7be   :  { %v2891_v4 = vpop.eup %2890 }
 0x7bf   :  { %v2205_v6 = vsub.f32 %v1940_v32, %v2891_v4 }
 0x7c1   :  { %v2206_v9 = vmul.f32 %v2205_v6, %v2200_v36 }
 0x7c3   :  { %v2207_v46 = vadd.f32 %v2891_v4, %v2206_v9 }
 0x7c5   :  { %2418 = vst [vmem:[%s4133_s5 + $0x38] sm:$0xff] %v2207_v46  ;;  %2210 = vst [vmem:[%s4134_s6] sm:$0xff] %v2207_v46 }
 0x7c6   :  { %2219 = vsyncpa [#allocation6], 1 }
 0x7c7   :  { %2220 = vsyncpa [#allocation8], 1 }

</bundles_post_ra>
